<compile_context>
chip_gen: v7x
topology: tpu7x:2x2x1
jax: 0.10.0
libtpu: 0.0.40
codegen_flags: <defaults>
</compile_context>

<pallas_src>
import functools

import jax
import jax.numpy as jnp
from jax.experimental import pallas as pl
from jax.experimental.pallas import tpu as pltpu

LN_EPS = 1e-6


# ----------------------------- in-kernel helpers -----------------------------
def _erf(z):
    # Abramowitz & Stegun 7.1.26 polynomial, |abs err| <= 1.5e-7 (f32 level).
    # TODO(synk): exact lax.erf is not guaranteed to lower in Mosaic; this is a
    # numerically-equivalent (to f32 precision) replacement for erf-based GELU.
    a1, a2, a3, a4, a5 = 0.254829592, -0.284496736, 1.421413741, -1.453152027, 1.061405429
    p = 0.3275911
    az = jnp.abs(z)
    t = 1.0 / (1.0 + p * az)
    poly = ((((a5 * t + a4) * t + a3) * t + a2) * t + a1) * t
    y = 1.0 - poly * jnp.exp(-az * az)
    return jnp.where(z >= 0, y, -y)


def _gelu(v):  # exact (erf-based) GELU, matching torch.nn.GELU()
    return 0.5 * v * (1.0 + _erf(v * 0.7071067811865476))


def _layernorm(v, w, b):
    # LayerNorm over the channel (lane) axis of a (rows, C) tile.
    mu = jnp.mean(v, axis=-1, keepdims=True)
    d = v - mu
    var = jnp.mean(d * d, axis=-1, keepdims=True)
    return d * jax.lax.rsqrt(var + LN_EPS) * w + b


# --------------------------------- the kernel --------------------------------
def _block_kernel(x_ref, cst_ref, pe_ref, b1_ref, w1_ref, w2_ref, out_ref,
                  *, B, H, W, C):
    M = B * H * W          # rows of the narrow layout (row = (b, h, w))
    HW = H * W             # rows per batch slab
    x = x_ref[...]         # (M, C) f32
    cst = cst_ref[...]     # (H + W + 8, C) packed constants

    w_h = cst[0:H]                         # (H, C): zero on the 'W' channel half
    w_w = cst[H:H + W]                     # (W, C): zero on the 'H' channel half
    o = H + W
    ln_t_w, ln_t_b = cst[o + 0:o + 1], cst[o + 1:o + 2]
    ln_c_w, ln_c_b = cst[o + 2:o + 3], cst[o + 3:o + 4]
    gamma_t, gamma_c = cst[o + 4:o + 5], cst[o + 5:o + 6]
    bias_hw, b2 = cst[o + 6:o + 7], cst[o + 7:o + 8]

    # ---- norm_t + positional encodings ---------------------------------------
    xt = _layernorm(x, ln_t_w, ln_t_b)
    xp = xt + pe_ref[...]                  # pe_h on first C/2 chans, pe_w on last

    # ---- gcc_Conv2d 'H': circular depthwise conv along H ---------------------
    # Rows are (b, h, w); rolling h by k == rolling rows by k*W inside each
    # HW-row batch slab -> aligned (multiple-of-8) row slices + concat.
    def roll_h(v, s):
        pieces = []
        for b in range(B):
            lo = b * HW
            pieces.append(v[lo + s:lo + HW])
            pieces.append(v[lo:lo + s])
        return jnp.concatenate(pieces, axis=0)

    # tap 0 of both branches (channel supports are disjoint)
    conv = xp * (w_h[0:1] + w_w[0:1])
    for k in range(1, H):
        conv = conv + roll_h(xp, k * W) * w_h[k:k + 1]

    # ---- gcc_Conv2d 'W': circular depthwise conv along W ---------------------
    # Each (b, h) group is exactly one aligned 8-row sublane tile -> single-tile
    # pltpu.roll per tap (no block-circulant matmul, no 256 KiB constant).
    parts = []
    for g in range(B * H):
        grp = xp[g * W:(g + 1) * W]        # (W, C), one sublane tile
        acc = jnp.zeros_like(grp)
        for k in range(1, W):
            acc = acc + pltpu.roll(grp, shift=W - k, axis=0) * w_w[k:k + 1]
        parts.append(acc)
    conv = conv + jnp.concatenate(parts, axis=0)   # aligned tile concat

    # ---- layer scale gamma_t + first residual --------------------------------
    xr = x + gamma_t * (conv + bias_hw)

    # ---- norm_c + MLP (pwconv1 -> GELU -> pwconv2), gamma_c, second residual -
    xn = _layernorm(xr, ln_c_w, ln_c_b)
    h1 = jnp.dot(xn.astype(jnp.bfloat16), w1_ref[...],
                 preferred_element_type=jnp.float32) + b1_ref[...]
    h1 = _gelu(h1)                                   # (M, 4C) lane-dense
    h2 = jnp.dot(h1.astype(jnp.bfloat16), w2_ref[...],
                 preferred_element_type=jnp.float32) + b2
    out_ref[...] = xr + gamma_c * h2


# --------------------------- one-time parameter prep ---------------------------
def prepare_params(p, B, H, W):
    """Pack module parameters for the kernel.  Called ONCE (hoisted out of the
    per-call path); the jitted forward only consumes the prepacked arrays."""
    C = p['ln_t_w'].shape[0]
    C2 = C // 2
    f32 = jnp.float32

    w_h_pad = jnp.pad(p['w_h'].astype(f32), ((0, 0), (0, C2)))   # (H, C)
    w_w_pad = jnp.pad(p['w_w'].astype(f32), ((0, 0), (C2, 0)))   # (W, C)
    rows = jnp.stack([
        p['ln_t_w'], p['ln_t_b'], p['ln_c_w'], p['ln_c_b'],
        p['gamma_t'], p['gamma_c'],
        jnp.concatenate([p['b_h'], p['b_w']]),                   # conv biases
        p['b2'],
    ]).astype(f32)                                               # (8, C)
    cst = jnp.concatenate([w_h_pad, w_w_pad, rows], axis=0)      # (H+W+8, C)

    pe_hc = jnp.pad(p['pe_h'].astype(f32), ((0, 0), (0, C2)))    # (H, C)
    pe_wc = jnp.pad(p['pe_w'].astype(f32), ((0, 0), (C2, 0)))    # (W, C)
    pe = (pe_hc[:, None, :] + pe_wc[None, :, :]).reshape(1, H * W, C)
    pe = jnp.broadcast_to(pe, (B, H * W, C)).reshape(B * H * W, C)

    return {
        'cst': cst,                                   # ~3 KiB
        'pe': pe,                                     # 16 KiB
        'b1': p['b1'].reshape(1, -1).astype(f32),     # 0.5 KiB
        'w1': p['w1'].astype(jnp.bfloat16),           # 8 KiB
        'w2': p['w2'].astype(jnp.bfloat16),           # 8 KiB
    }


# --------------------------------- wrapper ------------------------------------
@jax.jit
def gcc_block_forward(x_nhwc, packed):
    """Forward pass of gcc_cvx_test_Block_v1.  x_nhwc: (B, H, W, C) float32."""
    B, H, W, C = x_nhwc.shape
    M = B * H * W
    x = x_nhwc.reshape(M, C).astype(jnp.float32)      # free row-major reshape

    kernel = functools.partial(_block_kernel, B=B, H=H, W=W, C=C)
    bytes_accessed = (4 * (3 * M * C + (H + W + 8) * C + 4 * C)   # f32 arrays
                      + 2 * (8 * C * C))                          # bf16 weights
    flops = 16 * M * C * C + 2 * M * C * (H + W) + 32 * M * C + 12 * M * 4 * C
    out = pl.pallas_call(
        kernel,
        out_shape=jax.ShapeDtypeStruct((M, C), jnp.float32),
        in_specs=[pl.BlockSpec(memory_space=pltpu.MemorySpace.VMEM)] * 6,
        out_specs=pl.BlockSpec(memory_space=pltpu.MemorySpace.VMEM),
        cost_estimate=pl.CostEstimate(
            flops=int(flops),
            transcendentals=int(M * 4 * C + 2 * M),
            bytes_accessed=int(bytes_accessed)),
    )(x, packed['cst'], packed['pe'], packed['b1'], packed['w1'], packed['w2'])
    return out.reshape(B, H, W, C)


# ----------------------------- parameter init ---------------------------------
def init_params(key, dim, H, W):
    C = dim
    C2 = C // 2
    ks = jax.random.split(key, 14)
    n = lambda k, s, sc: sc * jax.random.normal(k, s, jnp.float32)
    return {
        # norm_t / norm_c (LayerNorm affine params)
        'ln_t_w': 1.0 + n(ks[0], (C,), 0.1), 'ln_t_b': n(ks[1], (C,), 0.1),
        'ln_c_w': 1.0 + n(ks[2], (C,), 0.1), 'ln_c_b': n(ks[3], (C,), 0.1),
        # gcc_Conv2d 'H' (first C//2 channels): meta kernel (H, C2), bias, PE
        'w_h': n(ks[4], (H, C2), 0.3), 'b_h': n(ks[5], (C2,), 0.5),
        'pe_h': n(ks[6], (H, C2), 0.5),
        # gcc_Conv2d 'W' (last C//2 channels): meta kernel (W, C2), bias, PE
        'w_w': n(ks[7], (W, C2), 0.3), 'b_w': n(ks[8], (C2,), 0.5),
        'pe_w': n(ks[9], (W, C2), 0.5),
        # MLP: pwconv1 (C -> 4C, applied as x @ w1 + b1) and pwconv2 (4C -> C)
        'w1': n(ks[10], (C, 4 * C), 0.1), 'b1': n(ks[11], (4 * C,), 0.1),
        'w2': n(ks[12], (4 * C, C), 0.1), 'b2': n(ks[13], (C,), 0.1),
        # layer scale (module: layer_scale_init_value * ones; 0.2 picked so the
        # correctness check is meaningful instead of being hidden by 1e-6).
        'gamma_t': 0.2 * jnp.ones((C,), jnp.float32),
        'gamma_c': 0.2 * jnp.ones((C,), jnp.float32),
    }


# --------------------------- pure-JAX reference --------------------------------
def reference_forward(x, p):
    """Faithful channels-last reference of gcc_cvx_test_Block_v1.forward."""
    B, H, W, C = x.shape
    C2 = C // 2
    hi = jax.lax.Precision.HIGHEST

    def ln(v, w, b):
        u = jnp.mean(v, axis=-1, keepdims=True)
        s = jnp.mean((v - u) ** 2, axis=-1, keepdims=True)
        return (v - u) / jnp.sqrt(s + LN_EPS) * w + b

    xt = ln(x, p['ln_t_w'], p['ln_t_b'])
    x1, x2 = xt[..., :C2], xt[..., C2:]

    xh = x1 + p['pe_h'][None, :, None, :]
    y1 = jnp.zeros_like(xh)
    for k in range(H):
        y1 = y1 + jnp.roll(xh, -k, axis=1) * p['w_h'][k][None, None, None, :]
    y1 = y1 + p['b_h']

    xw = x2 + p['pe_w'][None, None, :, :]
    y2 = jnp.zeros_like(xw)
    for k in range(W):
        y2 = y2 + jnp.roll(xw, -k, axis=2) * p['w_w'][k][None, None, None, :]
    y2 = y2 + p['b_w']

    xr = x + p['gamma_t'] * jnp.concatenate([y1, y2], axis=-1)

    xn = ln(xr, p['ln_c_w'], p['ln_c_b'])
    h = jnp.dot(xn, p['w1'], precision=hi) + p['b1']
    h = jax.nn.gelu(h, approximate=False)
    h = jnp.dot(h, p['w2'], precision=hi) + p['b2']
    return xr + p['gamma_c'] * h


# ------------------------------------ main -------------------------------------
if __name__ == "__main__":
    B, dim, H, W = 2, 32, 8, 8     # meta_kernel_size == H == W (instance_kernel_method=None)
    key = jax.random.PRNGKey(0)
    kx, kp = jax.random.split(key)

    x_nchw = jax.random.normal(kx, (B, dim, H, W), jnp.float32)   # PyTorch NCHW layout
    x = jnp.transpose(x_nchw, (0, 2, 3, 1))                       # NHWC for the kernel
    params = init_params(kp, dim, H, W)

    packed = jax.block_until_ready(prepare_params(params, B, H, W))  # one-time prep

    out_k = jax.block_until_ready(gcc_block_forward(x, packed))
    out_r = reference_forward(x, params)

    scale = float(jnp.max(jnp.abs(out_r)))
    err = float(jnp.max(jnp.abs(out_k - out_r)))
    assert err <= 3e-3 * scale + 1e-4, f"output mismatch: max err {err} (scale {scale})"
    print("KERNEL_OK")
</pallas_src>

<mosaic_0001>
module attributes {stable_mosaic.version = 11 : i64} {
  func.func @_block_kernel(%arg0: memref<128x32xf32, #tpu.memory_space<vmem>>, %arg1: memref<24x32xf32, #tpu.memory_space<vmem>>, %arg2: memref<128x32xf32, #tpu.memory_space<vmem>>, %arg3: memref<1x128xf32, #tpu.memory_space<vmem>>, %arg4: memref<32x128xbf16, #tpu.memory_space<vmem>>, %arg5: memref<128x32xbf16, #tpu.memory_space<vmem>>, %arg6: memref<128x32xf32, #tpu.memory_space<vmem>>) attributes {dimension_semantics = [], scalar_prefetch = 0 : i64, scratch_operands = 0 : i64, tpu.core_type = #tpu.core_type<tc>} {
    %c0 = arith.constant 0 : index
    %c0_0 = arith.constant 0 : index
    %0 = vector.load %arg0[%c0, %c0_0] : memref<128x32xf32, #tpu.memory_space<vmem>>, vector<128x32xf32>
    %c0_1 = arith.constant 0 : index
    %c0_2 = arith.constant 0 : index
    %1 = vector.load %arg1[%c0_1, %c0_2] : memref<24x32xf32, #tpu.memory_space<vmem>>, vector<24x32xf32>
    %2 = vector.extract_strided_slice %1 {offsets = [0, 0], sizes = [8, 32], strides = [1, 1]} : vector<24x32xf32> to vector<8x32xf32>
    %3 = vector.extract_strided_slice %1 {offsets = [8, 0], sizes = [8, 32], strides = [1, 1]} : vector<24x32xf32> to vector<8x32xf32>
    %4 = vector.extract_strided_slice %1 {offsets = [16, 0], sizes = [1, 32], strides = [1, 1]} : vector<24x32xf32> to vector<1x32xf32>
    %5 = vector.extract_strided_slice %1 {offsets = [17, 0], sizes = [1, 32], strides = [1, 1]} : vector<24x32xf32> to vector<1x32xf32>
    %6 = vector.extract_strided_slice %1 {offsets = [18, 0], sizes = [1, 32], strides = [1, 1]} : vector<24x32xf32> to vector<1x32xf32>
    %7 = vector.extract_strided_slice %1 {offsets = [19, 0], sizes = [1, 32], strides = [1, 1]} : vector<24x32xf32> to vector<1x32xf32>
    %8 = vector.extract_strided_slice %1 {offsets = [20, 0], sizes = [1, 32], strides = [1, 1]} : vector<24x32xf32> to vector<1x32xf32>
    %9 = vector.extract_strided_slice %1 {offsets = [21, 0], sizes = [1, 32], strides = [1, 1]} : vector<24x32xf32> to vector<1x32xf32>
    %10 = vector.extract_strided_slice %1 {offsets = [22, 0], sizes = [1, 32], strides = [1, 1]} : vector<24x32xf32> to vector<1x32xf32>
    %11 = vector.extract_strided_slice %1 {offsets = [23, 0], sizes = [1, 32], strides = [1, 1]} : vector<24x32xf32> to vector<1x32xf32>
    %cst = arith.constant dense<0.000000e+00> : vector<128xf32>
    %12 = vector.multi_reduction <add>, %0, %cst [1] : vector<128x32xf32> to vector<128xf32>
    %13 = vector.shape_cast %12 : vector<128xf32> to vector<128x1xf32>
    %cst_3 = arith.constant 3.200000e+01 : f32
    %14 = vector.broadcast %cst_3 : f32 to vector<128x1xf32>
    %15 = arith.divf %13, %14 : vector<128x1xf32>
    %16 = vector.broadcast %15 : vector<128x1xf32> to vector<128x32xf32>
    %17 = arith.subf %0, %16 : vector<128x32xf32>
    %18 = arith.mulf %17, %17 : vector<128x32xf32>
    %cst_4 = arith.constant dense<0.000000e+00> : vector<128xf32>
    %19 = vector.multi_reduction <add>, %18, %cst_4 [1] : vector<128x32xf32> to vector<128xf32>
    %20 = vector.shape_cast %19 : vector<128xf32> to vector<128x1xf32>
    %cst_5 = arith.constant 3.200000e+01 : f32
    %21 = vector.broadcast %cst_5 : f32 to vector<128x1xf32>
    %22 = arith.divf %20, %21 : vector<128x1xf32>
    %cst_6 = arith.constant 9.99999997E-7 : f32
    %23 = vector.broadcast %cst_6 : f32 to vector<128x1xf32>
    %24 = arith.addf %22, %23 : vector<128x1xf32>
    %25 = math.rsqrt %24 : vector<128x1xf32>
    %26 = vector.broadcast %25 : vector<128x1xf32> to vector<128x32xf32>
    %27 = arith.mulf %17, %26 : vector<128x32xf32>
    %28 = vector.broadcast %4 : vector<1x32xf32> to vector<128x32xf32>
    %29 = arith.mulf %27, %28 : vector<128x32xf32>
    %30 = vector.broadcast %5 : vector<1x32xf32> to vector<128x32xf32>
    %31 = arith.addf %29, %30 : vector<128x32xf32>
    %c0_7 = arith.constant 0 : index
    %c0_8 = arith.constant 0 : index
    %32 = vector.load %arg2[%c0_7, %c0_8] : memref<128x32xf32, #tpu.memory_space<vmem>>, vector<128x32xf32>
    %33 = arith.addf %31, %32 : vector<128x32xf32>
    %34 = vector.extract_strided_slice %2 {offsets = [0, 0], sizes = [1, 32], strides = [1, 1]} : vector<8x32xf32> to vector<1x32xf32>
    %35 = vector.extract_strided_slice %3 {offsets = [0, 0], sizes = [1, 32], strides = [1, 1]} : vector<8x32xf32> to vector<1x32xf32>
    %36 = arith.addf %34, %35 : vector<1x32xf32>
    %37 = vector.broadcast %36 : vector<1x32xf32> to vector<128x32xf32>
    %38 = arith.mulf %33, %37 : vector<128x32xf32>
    %39 = vector.extract_strided_slice %33 {offsets = [8, 0], sizes = [56, 32], strides = [1, 1]} : vector<128x32xf32> to vector<56x32xf32>
    %40 = vector.extract_strided_slice %33 {offsets = [0, 0], sizes = [8, 32], strides = [1, 1]} : vector<128x32xf32> to vector<8x32xf32>
    %41 = vector.extract_strided_slice %33 {offsets = [72, 0], sizes = [56, 32], strides = [1, 1]} : vector<128x32xf32> to vector<56x32xf32>
    %42 = vector.extract_strided_slice %33 {offsets = [64, 0], sizes = [8, 32], strides = [1, 1]} : vector<128x32xf32> to vector<8x32xf32>
    %43 = tpu.concatenate %39, %40, %41, %42 in 0 : vector<56x32xf32>, vector<8x32xf32>, vector<56x32xf32>, vector<8x32xf32> -> vector<128x32xf32>
    %44 = vector.extract_strided_slice %2 {offsets = [1, 0], sizes = [1, 32], strides = [1, 1]} : vector<8x32xf32> to vector<1x32xf32>
    %45 = vector.broadcast %44 : vector<1x32xf32> to vector<128x32xf32>
    %46 = arith.mulf %43, %45 : vector<128x32xf32>
    %47 = arith.addf %38, %46 : vector<128x32xf32>
    %48 = vector.extract_strided_slice %33 {offsets = [16, 0], sizes = [48, 32], strides = [1, 1]} : vector<128x32xf32> to vector<48x32xf32>
    %49 = vector.extract_strided_slice %33 {offsets = [0, 0], sizes = [16, 32], strides = [1, 1]} : vector<128x32xf32> to vector<16x32xf32>
    %50 = vector.extract_strided_slice %33 {offsets = [80, 0], sizes = [48, 32], strides = [1, 1]} : vector<128x32xf32> to vector<48x32xf32>
    %51 = vector.extract_strided_slice %33 {offsets = [64, 0], sizes = [16, 32], strides = [1, 1]} : vector<128x32xf32> to vector<16x32xf32>
    %52 = tpu.concatenate %48, %49, %50, %51 in 0 : vector<48x32xf32>, vector<16x32xf32>, vector<48x32xf32>, vector<16x32xf32> -> vector<128x32xf32>
    %53 = vector.extract_strided_slice %2 {offsets = [2, 0], sizes = [1, 32], strides = [1, 1]} : vector<8x32xf32> to vector<1x32xf32>
    %54 = vector.broadcast %53 : vector<1x32xf32> to vector<128x32xf32>
    %55 = arith.mulf %52, %54 : vector<128x32xf32>
    %56 = arith.addf %47, %55 : vector<128x32xf32>
    %57 = vector.extract_strided_slice %33 {offsets = [24, 0], sizes = [40, 32], strides = [1, 1]} : vector<128x32xf32> to vector<40x32xf32>
    %58 = vector.extract_strided_slice %33 {offsets = [0, 0], sizes = [24, 32], strides = [1, 1]} : vector<128x32xf32> to vector<24x32xf32>
    %59 = vector.extract_strided_slice %33 {offsets = [88, 0], sizes = [40, 32], strides = [1, 1]} : vector<128x32xf32> to vector<40x32xf32>
    %60 = vector.extract_strided_slice %33 {offsets = [64, 0], sizes = [24, 32], strides = [1, 1]} : vector<128x32xf32> to vector<24x32xf32>
    %61 = tpu.concatenate %57, %58, %59, %60 in 0 : vector<40x32xf32>, vector<24x32xf32>, vector<40x32xf32>, vector<24x32xf32> -> vector<128x32xf32>
    %62 = vector.extract_strided_slice %2 {offsets = [3, 0], sizes = [1, 32], strides = [1, 1]} : vector<8x32xf32> to vector<1x32xf32>
    %63 = vector.broadcast %62 : vector<1x32xf32> to vector<128x32xf32>
    %64 = arith.mulf %61, %63 : vector<128x32xf32>
    %65 = arith.addf %56, %64 : vector<128x32xf32>
    %66 = vector.extract_strided_slice %33 {offsets = [32, 0], sizes = [32, 32], strides = [1, 1]} : vector<128x32xf32> to vector<32x32xf32>
    %67 = vector.extract_strided_slice %33 {offsets = [0, 0], sizes = [32, 32], strides = [1, 1]} : vector<128x32xf32> to vector<32x32xf32>
    %68 = vector.extract_strided_slice %33 {offsets = [96, 0], sizes = [32, 32], strides = [1, 1]} : vector<128x32xf32> to vector<32x32xf32>
    %69 = vector.extract_strided_slice %33 {offsets = [64, 0], sizes = [32, 32], strides = [1, 1]} : vector<128x32xf32> to vector<32x32xf32>
    %70 = tpu.concatenate %66, %67, %68, %69 in 0 : vector<32x32xf32>, vector<32x32xf32>, vector<32x32xf32>, vector<32x32xf32> -> vector<128x32xf32>
    %71 = vector.extract_strided_slice %2 {offsets = [4, 0], sizes = [1, 32], strides = [1, 1]} : vector<8x32xf32> to vector<1x32xf32>
    %72 = vector.broadcast %71 : vector<1x32xf32> to vector<128x32xf32>
    %73 = arith.mulf %70, %72 : vector<128x32xf32>
    %74 = arith.addf %65, %73 : vector<128x32xf32>
    %75 = vector.extract_strided_slice %33 {offsets = [40, 0], sizes = [24, 32], strides = [1, 1]} : vector<128x32xf32> to vector<24x32xf32>
    %76 = vector.extract_strided_slice %33 {offsets = [0, 0], sizes = [40, 32], strides = [1, 1]} : vector<128x32xf32> to vector<40x32xf32>
    %77 = vector.extract_strided_slice %33 {offsets = [104, 0], sizes = [24, 32], strides = [1, 1]} : vector<128x32xf32> to vector<24x32xf32>
    %78 = vector.extract_strided_slice %33 {offsets = [64, 0], sizes = [40, 32], strides = [1, 1]} : vector<128x32xf32> to vector<40x32xf32>
    %79 = tpu.concatenate %75, %76, %77, %78 in 0 : vector<24x32xf32>, vector<40x32xf32>, vector<24x32xf32>, vector<40x32xf32> -> vector<128x32xf32>
    %80 = vector.extract_strided_slice %2 {offsets = [5, 0], sizes = [1, 32], strides = [1, 1]} : vector<8x32xf32> to vector<1x32xf32>
    %81 = vector.broadcast %80 : vector<1x32xf32> to vector<128x32xf32>
    %82 = arith.mulf %79, %81 : vector<128x32xf32>
    %83 = arith.addf %74, %82 : vector<128x32xf32>
    %84 = vector.extract_strided_slice %33 {offsets = [48, 0], sizes = [16, 32], strides = [1, 1]} : vector<128x32xf32> to vector<16x32xf32>
    %85 = vector.extract_strided_slice %33 {offsets = [0, 0], sizes = [48, 32], strides = [1, 1]} : vector<128x32xf32> to vector<48x32xf32>
    %86 = vector.extract_strided_slice %33 {offsets = [112, 0], sizes = [16, 32], strides = [1, 1]} : vector<128x32xf32> to vector<16x32xf32>
    %87 = vector.extract_strided_slice %33 {offsets = [64, 0], sizes = [48, 32], strides = [1, 1]} : vector<128x32xf32> to vector<48x32xf32>
    %88 = tpu.concatenate %84, %85, %86, %87 in 0 : vector<16x32xf32>, vector<48x32xf32>, vector<16x32xf32>, vector<48x32xf32> -> vector<128x32xf32>
    %89 = vector.extract_strided_slice %2 {offsets = [6, 0], sizes = [1, 32], strides = [1, 1]} : vector<8x32xf32> to vector<1x32xf32>
    %90 = vector.broadcast %89 : vector<1x32xf32> to vector<128x32xf32>
    %91 = arith.mulf %88, %90 : vector<128x32xf32>
    %92 = arith.addf %83, %91 : vector<128x32xf32>
    %93 = vector.extract_strided_slice %33 {offsets = [56, 0], sizes = [8, 32], strides = [1, 1]} : vector<128x32xf32> to vector<8x32xf32>
    %94 = vector.extract_strided_slice %33 {offsets = [0, 0], sizes = [56, 32], strides = [1, 1]} : vector<128x32xf32> to vector<56x32xf32>
    %95 = vector.extract_strided_slice %33 {offsets = [120, 0], sizes = [8, 32], strides = [1, 1]} : vector<128x32xf32> to vector<8x32xf32>
    %96 = vector.extract_strided_slice %33 {offsets = [64, 0], sizes = [56, 32], strides = [1, 1]} : vector<128x32xf32> to vector<56x32xf32>
    %97 = tpu.concatenate %93, %94, %95, %96 in 0 : vector<8x32xf32>, vector<56x32xf32>, vector<8x32xf32>, vector<56x32xf32> -> vector<128x32xf32>
    %98 = vector.extract_strided_slice %2 {offsets = [7, 0], sizes = [1, 32], strides = [1, 1]} : vector<8x32xf32> to vector<1x32xf32>
    %99 = vector.broadcast %98 : vector<1x32xf32> to vector<128x32xf32>
    %100 = arith.mulf %97, %99 : vector<128x32xf32>
    %101 = arith.addf %92, %100 : vector<128x32xf32>
    %102 = vector.extract_strided_slice %33 {offsets = [0, 0], sizes = [8, 32], strides = [1, 1]} : vector<128x32xf32> to vector<8x32xf32>
    %cst_9 = arith.constant 0.000000e+00 : f32
    %103 = vector.broadcast %cst_9 : f32 to vector<8x32xf32>
    %c7_i32 = arith.constant 7 : i32
    %104 = tpu.dynamic_rotate %102 by %c7_i32 dim 0 : vector<8x32xf32>, i32 -> vector<8x32xf32>
    %105 = vector.extract_strided_slice %3 {offsets = [1, 0], sizes = [1, 32], strides = [1, 1]} : vector<8x32xf32> to vector<1x32xf32>
    %106 = vector.broadcast %105 : vector<1x32xf32> to vector<8x32xf32>
    %107 = arith.mulf %104, %106 : vector<8x32xf32>
    %108 = arith.addf %103, %107 : vector<8x32xf32>
    %c6_i32 = arith.constant 6 : i32
    %109 = tpu.dynamic_rotate %102 by %c6_i32 dim 0 : vector<8x32xf32>, i32 -> vector<8x32xf32>
    %110 = vector.extract_strided_slice %3 {offsets = [2, 0], sizes = [1, 32], strides = [1, 1]} : vector<8x32xf32> to vector<1x32xf32>
    %111 = vector.broadcast %110 : vector<1x32xf32> to vector<8x32xf32>
    %112 = arith.mulf %109, %111 : vector<8x32xf32>
    %113 = arith.addf %108, %112 : vector<8x32xf32>
    %c5_i32 = arith.constant 5 : i32
    %114 = tpu.dynamic_rotate %102 by %c5_i32 dim 0 : vector<8x32xf32>, i32 -> vector<8x32xf32>
    %115 = vector.extract_strided_slice %3 {offsets = [3, 0], sizes = [1, 32], strides = [1, 1]} : vector<8x32xf32> to vector<1x32xf32>
    %116 = vector.broadcast %115 : vector<1x32xf32> to vector<8x32xf32>
    %117 = arith.mulf %114, %116 : vector<8x32xf32>
    %118 = arith.addf %113, %117 : vector<8x32xf32>
    %c4_i32 = arith.constant 4 : i32
    %119 = tpu.dynamic_rotate %102 by %c4_i32 dim 0 : vector<8x32xf32>, i32 -> vector<8x32xf32>
    %120 = vector.extract_strided_slice %3 {offsets = [4, 0], sizes = [1, 32], strides = [1, 1]} : vector<8x32xf32> to vector<1x32xf32>
    %121 = vector.broadcast %120 : vector<1x32xf32> to vector<8x32xf32>
    %122 = arith.mulf %119, %121 : vector<8x32xf32>
    %123 = arith.addf %118, %122 : vector<8x32xf32>
    %c3_i32 = arith.constant 3 : i32
    %124 = tpu.dynamic_rotate %102 by %c3_i32 dim 0 : vector<8x32xf32>, i32 -> vector<8x32xf32>
    %125 = vector.extract_strided_slice %3 {offsets = [5, 0], sizes = [1, 32], strides = [1, 1]} : vector<8x32xf32> to vector<1x32xf32>
    %126 = vector.broadcast %125 : vector<1x32xf32> to vector<8x32xf32>
    %127 = arith.mulf %124, %126 : vector<8x32xf32>
    %128 = arith.addf %123, %127 : vector<8x32xf32>
    %c2_i32 = arith.constant 2 : i32
    %129 = tpu.dynamic_rotate %102 by %c2_i32 dim 0 : vector<8x32xf32>, i32 -> vector<8x32xf32>
    %130 = vector.extract_strided_slice %3 {offsets = [6, 0], sizes = [1, 32], strides = [1, 1]} : vector<8x32xf32> to vector<1x32xf32>
    %131 = vector.broadcast %130 : vector<1x32xf32> to vector<8x32xf32>
    %132 = arith.mulf %129, %131 : vector<8x32xf32>
    %133 = arith.addf %128, %132 : vector<8x32xf32>
    %c1_i32 = arith.constant 1 : i32
    %134 = tpu.dynamic_rotate %102 by %c1_i32 dim 0 : vector<8x32xf32>, i32 -> vector<8x32xf32>
    %135 = vector.extract_strided_slice %3 {offsets = [7, 0], sizes = [1, 32], strides = [1, 1]} : vector<8x32xf32> to vector<1x32xf32>
    %136 = vector.broadcast %135 : vector<1x32xf32> to vector<8x32xf32>
    %137 = arith.mulf %134, %136 : vector<8x32xf32>
    %138 = arith.addf %133, %137 : vector<8x32xf32>
    %139 = vector.extract_strided_slice %33 {offsets = [8, 0], sizes = [8, 32], strides = [1, 1]} : vector<128x32xf32> to vector<8x32xf32>
    %cst_10 = arith.constant 0.000000e+00 : f32
    %140 = vector.broadcast %cst_10 : f32 to vector<8x32xf32>
    %c7_i32_11 = arith.constant 7 : i32
    %141 = tpu.dynamic_rotate %139 by %c7_i32_11 dim 0 : vector<8x32xf32>, i32 -> vector<8x32xf32>
    %142 = vector.extract_strided_slice %3 {offsets = [1, 0], sizes = [1, 32], strides = [1, 1]} : vector<8x32xf32> to vector<1x32xf32>
    %143 = vector.broadcast %142 : vector<1x32xf32> to vector<8x32xf32>
    %144 = arith.mulf %141, %143 : vector<8x32xf32>
    %145 = arith.addf %140, %144 : vector<8x32xf32>
    %c6_i32_12 = arith.constant 6 : i32
    %146 = tpu.dynamic_rotate %139 by %c6_i32_12 dim 0 : vector<8x32xf32>, i32 -> vector<8x32xf32>
    %147 = vector.extract_strided_slice %3 {offsets = [2, 0], sizes = [1, 32], strides = [1, 1]} : vector<8x32xf32> to vector<1x32xf32>
    %148 = vector.broadcast %147 : vector<1x32xf32> to vector<8x32xf32>
    %149 = arith.mulf %146, %148 : vector<8x32xf32>
    %150 = arith.addf %145, %149 : vector<8x32xf32>
    %c5_i32_13 = arith.constant 5 : i32
    %151 = tpu.dynamic_rotate %139 by %c5_i32_13 dim 0 : vector<8x32xf32>, i32 -> vector<8x32xf32>
    %152 = vector.extract_strided_slice %3 {offsets = [3, 0], sizes = [1, 32], strides = [1, 1]} : vector<8x32xf32> to vector<1x32xf32>
    %153 = vector.broadcast %152 : vector<1x32xf32> to vector<8x32xf32>
    %154 = arith.mulf %151, %153 : vector<8x32xf32>
    %155 = arith.addf %150, %154 : vector<8x32xf32>
    %c4_i32_14 = arith.constant 4 : i32
    %156 = tpu.dynamic_rotate %139 by %c4_i32_14 dim 0 : vector<8x32xf32>, i32 -> vector<8x32xf32>
    %157 = vector.extract_strided_slice %3 {offsets = [4, 0], sizes = [1, 32], strides = [1, 1]} : vector<8x32xf32> to vector<1x32xf32>
    %158 = vector.broadcast %157 : vector<1x32xf32> to vector<8x32xf32>
    %159 = arith.mulf %156, %158 : vector<8x32xf32>
    %160 = arith.addf %155, %159 : vector<8x32xf32>
    %c3_i32_15 = arith.constant 3 : i32
    %161 = tpu.dynamic_rotate %139 by %c3_i32_15 dim 0 : vector<8x32xf32>, i32 -> vector<8x32xf32>
    %162 = vector.extract_strided_slice %3 {offsets = [5, 0], sizes = [1, 32], strides = [1, 1]} : vector<8x32xf32> to vector<1x32xf32>
    %163 = vector.broadcast %162 : vector<1x32xf32> to vector<8x32xf32>
    %164 = arith.mulf %161, %163 : vector<8x32xf32>
    %165 = arith.addf %160, %164 : vector<8x32xf32>
    %c2_i32_16 = arith.constant 2 : i32
    %166 = tpu.dynamic_rotate %139 by %c2_i32_16 dim 0 : vector<8x32xf32>, i32 -> vector<8x32xf32>
    %167 = vector.extract_strided_slice %3 {offsets = [6, 0], sizes = [1, 32], strides = [1, 1]} : vector<8x32xf32> to vector<1x32xf32>
    %168 = vector.broadcast %167 : vector<1x32xf32> to vector<8x32xf32>
    %169 = arith.mulf %166, %168 : vector<8x32xf32>
    %170 = arith.addf %165, %169 : vector<8x32xf32>
    %c1_i32_17 = arith.constant 1 : i32
    %171 = tpu.dynamic_rotate %139 by %c1_i32_17 dim 0 : vector<8x32xf32>, i32 -> vector<8x32xf32>
    %172 = vector.extract_strided_slice %3 {offsets = [7, 0], sizes = [1, 32], strides = [1, 1]} : vector<8x32xf32> to vector<1x32xf32>
    %173 = vector.broadcast %172 : vector<1x32xf32> to vector<8x32xf32>
    %174 = arith.mulf %171, %173 : vector<8x32xf32>
    %175 = arith.addf %170, %174 : vector<8x32xf32>
    %176 = vector.extract_strided_slice %33 {offsets = [16, 0], sizes = [8, 32], strides = [1, 1]} : vector<128x32xf32> to vector<8x32xf32>
    %cst_18 = arith.constant 0.000000e+00 : f32
    %177 = vector.broadcast %cst_18 : f32 to vector<8x32xf32>
    %c7_i32_19 = arith.constant 7 : i32
    %178 = tpu.dynamic_rotate %176 by %c7_i32_19 dim 0 : vector<8x32xf32>, i32 -> vector<8x32xf32>
    %179 = vector.extract_strided_slice %3 {offsets = [1, 0], sizes = [1, 32], strides = [1, 1]} : vector<8x32xf32> to vector<1x32xf32>
    %180 = vector.broadcast %179 : vector<1x32xf32> to vector<8x32xf32>
    %181 = arith.mulf %178, %180 : vector<8x32xf32>
    %182 = arith.addf %177, %181 : vector<8x32xf32>
    %c6_i32_20 = arith.constant 6 : i32
    %183 = tpu.dynamic_rotate %176 by %c6_i32_20 dim 0 : vector<8x32xf32>, i32 -> vector<8x32xf32>
    %184 = vector.extract_strided_slice %3 {offsets = [2, 0], sizes = [1, 32], strides = [1, 1]} : vector<8x32xf32> to vector<1x32xf32>
    %185 = vector.broadcast %184 : vector<1x32xf32> to vector<8x32xf32>
    %186 = arith.mulf %183, %185 : vector<8x32xf32>
    %187 = arith.addf %182, %186 : vector<8x32xf32>
    %c5_i32_21 = arith.constant 5 : i32
    %188 = tpu.dynamic_rotate %176 by %c5_i32_21 dim 0 : vector<8x32xf32>, i32 -> vector<8x32xf32>
    %189 = vector.extract_strided_slice %3 {offsets = [3, 0], sizes = [1, 32], strides = [1, 1]} : vector<8x32xf32> to vector<1x32xf32>
    %190 = vector.broadcast %189 : vector<1x32xf32> to vector<8x32xf32>
    %191 = arith.mulf %188, %190 : vector<8x32xf32>
    %192 = arith.addf %187, %191 : vector<8x32xf32>
    %c4_i32_22 = arith.constant 4 : i32
    %193 = tpu.dynamic_rotate %176 by %c4_i32_22 dim 0 : vector<8x32xf32>, i32 -> vector<8x32xf32>
    %194 = vector.extract_strided_slice %3 {offsets = [4, 0], sizes = [1, 32], strides = [1, 1]} : vector<8x32xf32> to vector<1x32xf32>
    %195 = vector.broadcast %194 : vector<1x32xf32> to vector<8x32xf32>
    %196 = arith.mulf %193, %195 : vector<8x32xf32>
    %197 = arith.addf %192, %196 : vector<8x32xf32>
    %c3_i32_23 = arith.constant 3 : i32
    %198 = tpu.dynamic_rotate %176 by %c3_i32_23 dim 0 : vector<8x32xf32>, i32 -> vector<8x32xf32>
    %199 = vector.extract_strided_slice %3 {offsets = [5, 0], sizes = [1, 32], strides = [1, 1]} : vector<8x32xf32> to vector<1x32xf32>
    %200 = vector.broadcast %199 : vector<1x32xf32> to vector<8x32xf32>
    %201 = arith.mulf %198, %200 : vector<8x32xf32>
    %202 = arith.addf %197, %201 : vector<8x32xf32>
    %c2_i32_24 = arith.constant 2 : i32
    %203 = tpu.dynamic_rotate %176 by %c2_i32_24 dim 0 : vector<8x32xf32>, i32 -> vector<8x32xf32>
    %204 = vector.extract_strided_slice %3 {offsets = [6, 0], sizes = [1, 32], strides = [1, 1]} : vector<8x32xf32> to vector<1x32xf32>
    %205 = vector.broadcast %204 : vector<1x32xf32> to vector<8x32xf32>
    %206 = arith.mulf %203, %205 : vector<8x32xf32>
    %207 = arith.addf %202, %206 : vector<8x32xf32>
    %c1_i32_25 = arith.constant 1 : i32
    %208 = tpu.dynamic_rotate %176 by %c1_i32_25 dim 0 : vector<8x32xf32>, i32 -> vector<8x32xf32>
    %209 = vector.extract_strided_slice %3 {offsets = [7, 0], sizes = [1, 32], strides = [1, 1]} : vector<8x32xf32> to vector<1x32xf32>
    %210 = vector.broadcast %209 : vector<1x32xf32> to vector<8x32xf32>
    %211 = arith.mulf %208, %210 : vector<8x32xf32>
    %212 = arith.addf %207, %211 : vector<8x32xf32>
    %213 = vector.extract_strided_slice %33 {offsets = [24, 0], sizes = [8, 32], strides = [1, 1]} : vector<128x32xf32> to vector<8x32xf32>
    %cst_26 = arith.constant 0.000000e+00 : f32
    %214 = vector.broadcast %cst_26 : f32 to vector<8x32xf32>
    %c7_i32_27 = arith.constant 7 : i32
    %215 = tpu.dynamic_rotate %213 by %c7_i32_27 dim 0 : vector<8x32xf32>, i32 -> vector<8x32xf32>
    %216 = vector.extract_strided_slice %3 {offsets = [1, 0], sizes = [1, 32], strides = [1, 1]} : vector<8x32xf32> to vector<1x32xf32>
    %217 = vector.broadcast %216 : vector<1x32xf32> to vector<8x32xf32>
    %218 = arith.mulf %215, %217 : vector<8x32xf32>
    %219 = arith.addf %214, %218 : vector<8x32xf32>
    %c6_i32_28 = arith.constant 6 : i32
    %220 = tpu.dynamic_rotate %213 by %c6_i32_28 dim 0 : vector<8x32xf32>, i32 -> vector<8x32xf32>
    %221 = vector.extract_strided_slice %3 {offsets = [2, 0], sizes = [1, 32], strides = [1, 1]} : vector<8x32xf32> to vector<1x32xf32>
    %222 = vector.broadcast %221 : vector<1x32xf32> to vector<8x32xf32>
    %223 = arith.mulf %220, %222 : vector<8x32xf32>
    %224 = arith.addf %219, %223 : vector<8x32xf32>
    %c5_i32_29 = arith.constant 5 : i32
    %225 = tpu.dynamic_rotate %213 by %c5_i32_29 dim 0 : vector<8x32xf32>, i32 -> vector<8x32xf32>
    %226 = vector.extract_strided_slice %3 {offsets = [3, 0], sizes = [1, 32], strides = [1, 1]} : vector<8x32xf32> to vector<1x32xf32>
    %227 = vector.broadcast %226 : vector<1x32xf32> to vector<8x32xf32>
    %228 = arith.mulf %225, %227 : vector<8x32xf32>
    %229 = arith.addf %224, %228 : vector<8x32xf32>
    %c4_i32_30 = arith.constant 4 : i32
    %230 = tpu.dynamic_rotate %213 by %c4_i32_30 dim 0 : vector<8x32xf32>, i32 -> vector<8x32xf32>
    %231 = vector.extract_strided_slice %3 {offsets = [4, 0], sizes = [1, 32], strides = [1, 1]} : vector<8x32xf32> to vector<1x32xf32>
    %232 = vector.broadcast %231 : vector<1x32xf32> to vector<8x32xf32>
    %233 = arith.mulf %230, %232 : vector<8x32xf32>
    %234 = arith.addf %229, %233 : vector<8x32xf32>
    %c3_i32_31 = arith.constant 3 : i32
    %235 = tpu.dynamic_rotate %213 by %c3_i32_31 dim 0 : vector<8x32xf32>, i32 -> vector<8x32xf32>
    %236 = vector.extract_strided_slice %3 {offsets = [5, 0], sizes = [1, 32], strides = [1, 1]} : vector<8x32xf32> to vector<1x32xf32>
    %237 = vector.broadcast %236 : vector<1x32xf32> to vector<8x32xf32>
    %238 = arith.mulf %235, %237 : vector<8x32xf32>
    %239 = arith.addf %234, %238 : vector<8x32xf32>
    %c2_i32_32 = arith.constant 2 : i32
    %240 = tpu.dynamic_rotate %213 by %c2_i32_32 dim 0 : vector<8x32xf32>, i32 -> vector<8x32xf32>
    %241 = vector.extract_strided_slice %3 {offsets = [6, 0], sizes = [1, 32], strides = [1, 1]} : vector<8x32xf32> to vector<1x32xf32>
    %242 = vector.broadcast %241 : vector<1x32xf32> to vector<8x32xf32>
    %243 = arith.mulf %240, %242 : vector<8x32xf32>
    %244 = arith.addf %239, %243 : vector<8x32xf32>
    %c1_i32_33 = arith.constant 1 : i32
    %245 = tpu.dynamic_rotate %213 by %c1_i32_33 dim 0 : vector<8x32xf32>, i32 -> vector<8x32xf32>
    %246 = vector.extract_strided_slice %3 {offsets = [7, 0], sizes = [1, 32], strides = [1, 1]} : vector<8x32xf32> to vector<1x32xf32>
    %247 = vector.broadcast %246 : vector<1x32xf32> to vector<8x32xf32>
    %248 = arith.mulf %245, %247 : vector<8x32xf32>
    %249 = arith.addf %244, %248 : vector<8x32xf32>
    %250 = vector.extract_strided_slice %33 {offsets = [32, 0], sizes = [8, 32], strides = [1, 1]} : vector<128x32xf32> to vector<8x32xf32>
    %cst_34 = arith.constant 0.000000e+00 : f32
    %251 = vector.broadcast %cst_34 : f32 to vector<8x32xf32>
    %c7_i32_35 = arith.constant 7 : i32
    %252 = tpu.dynamic_rotate %250 by %c7_i32_35 dim 0 : vector<8x32xf32>, i32 -> vector<8x32xf32>
    %253 = vector.extract_strided_slice %3 {offsets = [1, 0], sizes = [1, 32], strides = [1, 1]} : vector<8x32xf32> to vector<1x32xf32>
    %254 = vector.broadcast %253 : vector<1x32xf32> to vector<8x32xf32>
    %255 = arith.mulf %252, %254 : vector<8x32xf32>
    %256 = arith.addf %251, %255 : vector<8x32xf32>
    %c6_i32_36 = arith.constant 6 : i32
    %257 = tpu.dynamic_rotate %250 by %c6_i32_36 dim 0 : vector<8x32xf32>, i32 -> vector<8x32xf32>
    %258 = vector.extract_strided_slice %3 {offsets = [2, 0], sizes = [1, 32], strides = [1, 1]} : vector<8x32xf32> to vector<1x32xf32>
    %259 = vector.broadcast %258 : vector<1x32xf32> to vector<8x32xf32>
    %260 = arith.mulf %257, %259 : vector<8x32xf32>
    %261 = arith.addf %256, %260 : vector<8x32xf32>
    %c5_i32_37 = arith.constant 5 : i32
    %262 = tpu.dynamic_rotate %250 by %c5_i32_37 dim 0 : vector<8x32xf32>, i32 -> vector<8x32xf32>
    %263 = vector.extract_strided_slice %3 {offsets = [3, 0], sizes = [1, 32], strides = [1, 1]} : vector<8x32xf32> to vector<1x32xf32>
    %264 = vector.broadcast %263 : vector<1x32xf32> to vector<8x32xf32>
    %265 = arith.mulf %262, %264 : vector<8x32xf32>
    %266 = arith.addf %261, %265 : vector<8x32xf32>
    %c4_i32_38 = arith.constant 4 : i32
    %267 = tpu.dynamic_rotate %250 by %c4_i32_38 dim 0 : vector<8x32xf32>, i32 -> vector<8x32xf32>
    %268 = vector.extract_strided_slice %3 {offsets = [4, 0], sizes = [1, 32], strides = [1, 1]} : vector<8x32xf32> to vector<1x32xf32>
    %269 = vector.broadcast %268 : vector<1x32xf32> to vector<8x32xf32>
    %270 = arith.mulf %267, %269 : vector<8x32xf32>
    %271 = arith.addf %266, %270 : vector<8x32xf32>
    %c3_i32_39 = arith.constant 3 : i32
    %272 = tpu.dynamic_rotate %250 by %c3_i32_39 dim 0 : vector<8x32xf32>, i32 -> vector<8x32xf32>
    %273 = vector.extract_strided_slice %3 {offsets = [5, 0], sizes = [1, 32], strides = [1, 1]} : vector<8x32xf32> to vector<1x32xf32>
    %274 = vector.broadcast %273 : vector<1x32xf32> to vector<8x32xf32>
    %275 = arith.mulf %272, %274 : vector<8x32xf32>
    %276 = arith.addf %271, %275 : vector<8x32xf32>
    %c2_i32_40 = arith.constant 2 : i32
    %277 = tpu.dynamic_rotate %250 by %c2_i32_40 dim 0 : vector<8x32xf32>, i32 -> vector<8x32xf32>
    %278 = vector.extract_strided_slice %3 {offsets = [6, 0], sizes = [1, 32], strides = [1, 1]} : vector<8x32xf32> to vector<1x32xf32>
    %279 = vector.broadcast %278 : vector<1x32xf32> to vector<8x32xf32>
    %280 = arith.mulf %277, %279 : vector<8x32xf32>
    %281 = arith.addf %276, %280 : vector<8x32xf32>
    %c1_i32_41 = arith.constant 1 : i32
    %282 = tpu.dynamic_rotate %250 by %c1_i32_41 dim 0 : vector<8x32xf32>, i32 -> vector<8x32xf32>
    %283 = vector.extract_strided_slice %3 {offsets = [7, 0], sizes = [1, 32], strides = [1, 1]} : vector<8x32xf32> to vector<1x32xf32>
    %284 = vector.broadcast %283 : vector<1x32xf32> to vector<8x32xf32>
    %285 = arith.mulf %282, %284 : vector<8x32xf32>
    %286 = arith.addf %281, %285 : vector<8x32xf32>
    %287 = vector.extract_strided_slice %33 {offsets = [40, 0], sizes = [8, 32], strides = [1, 1]} : vector<128x32xf32> to vector<8x32xf32>
    %cst_42 = arith.constant 0.000000e+00 : f32
    %288 = vector.broadcast %cst_42 : f32 to vector<8x32xf32>
    %c7_i32_43 = arith.constant 7 : i32
    %289 = tpu.dynamic_rotate %287 by %c7_i32_43 dim 0 : vector<8x32xf32>, i32 -> vector<8x32xf32>
    %290 = vector.extract_strided_slice %3 {offsets = [1, 0], sizes = [1, 32], strides = [1, 1]} : vector<8x32xf32> to vector<1x32xf32>
    %291 = vector.broadcast %290 : vector<1x32xf32> to vector<8x32xf32>
    %292 = arith.mulf %289, %291 : vector<8x32xf32>
    %293 = arith.addf %288, %292 : vector<8x32xf32>
    %c6_i32_44 = arith.constant 6 : i32
    %294 = tpu.dynamic_rotate %287 by %c6_i32_44 dim 0 : vector<8x32xf32>, i32 -> vector<8x32xf32>
    %295 = vector.extract_strided_slice %3 {offsets = [2, 0], sizes = [1, 32], strides = [1, 1]} : vector<8x32xf32> to vector<1x32xf32>
    %296 = vector.broadcast %295 : vector<1x32xf32> to vector<8x32xf32>
    %297 = arith.mulf %294, %296 : vector<8x32xf32>
    %298 = arith.addf %293, %297 : vector<8x32xf32>
    %c5_i32_45 = arith.constant 5 : i32
    %299 = tpu.dynamic_rotate %287 by %c5_i32_45 dim 0 : vector<8x32xf32>, i32 -> vector<8x32xf32>
    %300 = vector.extract_strided_slice %3 {offsets = [3, 0], sizes = [1, 32], strides = [1, 1]} : vector<8x32xf32> to vector<1x32xf32>
    %301 = vector.broadcast %300 : vector<1x32xf32> to vector<8x32xf32>
    %302 = arith.mulf %299, %301 : vector<8x32xf32>
    %303 = arith.addf %298, %302 : vector<8x32xf32>
    %c4_i32_46 = arith.constant 4 : i32
    %304 = tpu.dynamic_rotate %287 by %c4_i32_46 dim 0 : vector<8x32xf32>, i32 -> vector<8x32xf32>
    %305 = vector.extract_strided_slice %3 {offsets = [4, 0], sizes = [1, 32], strides = [1, 1]} : vector<8x32xf32> to vector<1x32xf32>
    %306 = vector.broadcast %305 : vector<1x32xf32> to vector<8x32xf32>
    %307 = arith.mulf %304, %306 : vector<8x32xf32>
    %308 = arith.addf %303, %307 : vector<8x32xf32>
    %c3_i32_47 = arith.constant 3 : i32
    %309 = tpu.dynamic_rotate %287 by %c3_i32_47 dim 0 : vector<8x32xf32>, i32 -> vector<8x32xf32>
    %310 = vector.extract_strided_slice %3 {offsets = [5, 0], sizes = [1, 32], strides = [1, 1]} : vector<8x32xf32> to vector<1x32xf32>
    %311 = vector.broadcast %310 : vector<1x32xf32> to vector<8x32xf32>
    %312 = arith.mulf %309, %311 : vector<8x32xf32>
    %313 = arith.addf %308, %312 : vector<8x32xf32>
    %c2_i32_48 = arith.constant 2 : i32
    %314 = tpu.dynamic_rotate %287 by %c2_i32_48 dim 0 : vector<8x32xf32>, i32 -> vector<8x32xf32>
    %315 = vector.extract_strided_slice %3 {offsets = [6, 0], sizes = [1, 32], strides = [1, 1]} : vector<8x32xf32> to vector<1x32xf32>
    %316 = vector.broadcast %315 : vector<1x32xf32> to vector<8x32xf32>
    %317 = arith.mulf %314, %316 : vector<8x32xf32>
    %318 = arith.addf %313, %317 : vector<8x32xf32>
    %c1_i32_49 = arith.constant 1 : i32
    %319 = tpu.dynamic_rotate %287 by %c1_i32_49 dim 0 : vector<8x32xf32>, i32 -> vector<8x32xf32>
    %320 = vector.extract_strided_slice %3 {offsets = [7, 0], sizes = [1, 32], strides = [1, 1]} : vector<8x32xf32> to vector<1x32xf32>
    %321 = vector.broadcast %320 : vector<1x32xf32> to vector<8x32xf32>
    %322 = arith.mulf %319, %321 : vector<8x32xf32>
    %323 = arith.addf %318, %322 : vector<8x32xf32>
    %324 = vector.extract_strided_slice %33 {offsets = [48, 0], sizes = [8, 32], strides = [1, 1]} : vector<128x32xf32> to vector<8x32xf32>
    %cst_50 = arith.constant 0.000000e+00 : f32
    %325 = vector.broadcast %cst_50 : f32 to vector<8x32xf32>
    %c7_i32_51 = arith.constant 7 : i32
    %326 = tpu.dynamic_rotate %324 by %c7_i32_51 dim 0 : vector<8x32xf32>, i32 -> vector<8x32xf32>
    %327 = vector.extract_strided_slice %3 {offsets = [1, 0], sizes = [1, 32], strides = [1, 1]} : vector<8x32xf32> to vector<1x32xf32>
    %328 = vector.broadcast %327 : vector<1x32xf32> to vector<8x32xf32>
    %329 = arith.mulf %326, %328 : vector<8x32xf32>
    %330 = arith.addf %325, %329 : vector<8x32xf32>
    %c6_i32_52 = arith.constant 6 : i32
    %331 = tpu.dynamic_rotate %324 by %c6_i32_52 dim 0 : vector<8x32xf32>, i32 -> vector<8x32xf32>
    %332 = vector.extract_strided_slice %3 {offsets = [2, 0], sizes = [1, 32], strides = [1, 1]} : vector<8x32xf32> to vector<1x32xf32>
    %333 = vector.broadcast %332 : vector<1x32xf32> to vector<8x32xf32>
    %334 = arith.mulf %331, %333 : vector<8x32xf32>
    %335 = arith.addf %330, %334 : vector<8x32xf32>
    %c5_i32_53 = arith.constant 5 : i32
    %336 = tpu.dynamic_rotate %324 by %c5_i32_53 dim 0 : vector<8x32xf32>, i32 -> vector<8x32xf32>
    %337 = vector.extract_strided_slice %3 {offsets = [3, 0], sizes = [1, 32], strides = [1, 1]} : vector<8x32xf32> to vector<1x32xf32>
    %338 = vector.broadcast %337 : vector<1x32xf32> to vector<8x32xf32>
    %339 = arith.mulf %336, %338 : vector<8x32xf32>
    %340 = arith.addf %335, %339 : vector<8x32xf32>
    %c4_i32_54 = arith.constant 4 : i32
    %341 = tpu.dynamic_rotate %324 by %c4_i32_54 dim 0 : vector<8x32xf32>, i32 -> vector<8x32xf32>
    %342 = vector.extract_strided_slice %3 {offsets = [4, 0], sizes = [1, 32], strides = [1, 1]} : vector<8x32xf32> to vector<1x32xf32>
    %343 = vector.broadcast %342 : vector<1x32xf32> to vector<8x32xf32>
    %344 = arith.mulf %341, %343 : vector<8x32xf32>
    %345 = arith.addf %340, %344 : vector<8x32xf32>
    %c3_i32_55 = arith.constant 3 : i32
    %346 = tpu.dynamic_rotate %324 by %c3_i32_55 dim 0 : vector<8x32xf32>, i32 -> vector<8x32xf32>
    %347 = vector.extract_strided_slice %3 {offsets = [5, 0], sizes = [1, 32], strides = [1, 1]} : vector<8x32xf32> to vector<1x32xf32>
    %348 = vector.broadcast %347 : vector<1x32xf32> to vector<8x32xf32>
    %349 = arith.mulf %346, %348 : vector<8x32xf32>
    %350 = arith.addf %345, %349 : vector<8x32xf32>
    %c2_i32_56 = arith.constant 2 : i32
    %351 = tpu.dynamic_rotate %324 by %c2_i32_56 dim 0 : vector<8x32xf32>, i32 -> vector<8x32xf32>
    %352 = vector.extract_strided_slice %3 {offsets = [6, 0], sizes = [1, 32], strides = [1, 1]} : vector<8x32xf32> to vector<1x32xf32>
    %353 = vector.broadcast %352 : vector<1x32xf32> to vector<8x32xf32>
    %354 = arith.mulf %351, %353 : vector<8x32xf32>
    %355 = arith.addf %350, %354 : vector<8x32xf32>
    %c1_i32_57 = arith.constant 1 : i32
    %356 = tpu.dynamic_rotate %324 by %c1_i32_57 dim 0 : vector<8x32xf32>, i32 -> vector<8x32xf32>
    %357 = vector.extract_strided_slice %3 {offsets = [7, 0], sizes = [1, 32], strides = [1, 1]} : vector<8x32xf32> to vector<1x32xf32>
    %358 = vector.broadcast %357 : vector<1x32xf32> to vector<8x32xf32>
    %359 = arith.mulf %356, %358 : vector<8x32xf32>
    %360 = arith.addf %355, %359 : vector<8x32xf32>
    %361 = vector.extract_strided_slice %33 {offsets = [56, 0], sizes = [8, 32], strides = [1, 1]} : vector<128x32xf32> to vector<8x32xf32>
    %cst_58 = arith.constant 0.000000e+00 : f32
    %362 = vector.broadcast %cst_58 : f32 to vector<8x32xf32>
    %c7_i32_59 = arith.constant 7 : i32
    %363 = tpu.dynamic_rotate %361 by %c7_i32_59 dim 0 : vector<8x32xf32>, i32 -> vector<8x32xf32>
    %364 = vector.extract_strided_slice %3 {offsets = [1, 0], sizes = [1, 32], strides = [1, 1]} : vector<8x32xf32> to vector<1x32xf32>
    %365 = vector.broadcast %364 : vector<1x32xf32> to vector<8x32xf32>
    %366 = arith.mulf %363, %365 : vector<8x32xf32>
    %367 = arith.addf %362, %366 : vector<8x32xf32>
    %c6_i32_60 = arith.constant 6 : i32
    %368 = tpu.dynamic_rotate %361 by %c6_i32_60 dim 0 : vector<8x32xf32>, i32 -> vector<8x32xf32>
    %369 = vector.extract_strided_slice %3 {offsets = [2, 0], sizes = [1, 32], strides = [1, 1]} : vector<8x32xf32> to vector<1x32xf32>
    %370 = vector.broadcast %369 : vector<1x32xf32> to vector<8x32xf32>
    %371 = arith.mulf %368, %370 : vector<8x32xf32>
    %372 = arith.addf %367, %371 : vector<8x32xf32>
    %c5_i32_61 = arith.constant 5 : i32
    %373 = tpu.dynamic_rotate %361 by %c5_i32_61 dim 0 : vector<8x32xf32>, i32 -> vector<8x32xf32>
    %374 = vector.extract_strided_slice %3 {offsets = [3, 0], sizes = [1, 32], strides = [1, 1]} : vector<8x32xf32> to vector<1x32xf32>
    %375 = vector.broadcast %374 : vector<1x32xf32> to vector<8x32xf32>
    %376 = arith.mulf %373, %375 : vector<8x32xf32>
    %377 = arith.addf %372, %376 : vector<8x32xf32>
    %c4_i32_62 = arith.constant 4 : i32
    %378 = tpu.dynamic_rotate %361 by %c4_i32_62 dim 0 : vector<8x32xf32>, i32 -> vector<8x32xf32>
    %379 = vector.extract_strided_slice %3 {offsets = [4, 0], sizes = [1, 32], strides = [1, 1]} : vector<8x32xf32> to vector<1x32xf32>
    %380 = vector.broadcast %379 : vector<1x32xf32> to vector<8x32xf32>
    %381 = arith.mulf %378, %380 : vector<8x32xf32>
    %382 = arith.addf %377, %381 : vector<8x32xf32>
    %c3_i32_63 = arith.constant 3 : i32
    %383 = tpu.dynamic_rotate %361 by %c3_i32_63 dim 0 : vector<8x32xf32>, i32 -> vector<8x32xf32>
    %384 = vector.extract_strided_slice %3 {offsets = [5, 0], sizes = [1, 32], strides = [1, 1]} : vector<8x32xf32> to vector<1x32xf32>
    %385 = vector.broadcast %384 : vector<1x32xf32> to vector<8x32xf32>
    %386 = arith.mulf %383, %385 : vector<8x32xf32>
    %387 = arith.addf %382, %386 : vector<8x32xf32>
    %c2_i32_64 = arith.constant 2 : i32
    %388 = tpu.dynamic_rotate %361 by %c2_i32_64 dim 0 : vector<8x32xf32>, i32 -> vector<8x32xf32>
    %389 = vector.extract_strided_slice %3 {offsets = [6, 0], sizes = [1, 32], strides = [1, 1]} : vector<8x32xf32> to vector<1x32xf32>
    %390 = vector.broadcast %389 : vector<1x32xf32> to vector<8x32xf32>
    %391 = arith.mulf %388, %390 : vector<8x32xf32>
    %392 = arith.addf %387, %391 : vector<8x32xf32>
    %c1_i32_65 = arith.constant 1 : i32
    %393 = tpu.dynamic_rotate %361 by %c1_i32_65 dim 0 : vector<8x32xf32>, i32 -> vector<8x32xf32>
    %394 = vector.extract_strided_slice %3 {offsets = [7, 0], sizes = [1, 32], strides = [1, 1]} : vector<8x32xf32> to vector<1x32xf32>
    %395 = vector.broadcast %394 : vector<1x32xf32> to vector<8x32xf32>
    %396 = arith.mulf %393, %395 : vector<8x32xf32>
    %397 = arith.addf %392, %396 : vector<8x32xf32>
    %398 = vector.extract_strided_slice %33 {offsets = [64, 0], sizes = [8, 32], strides = [1, 1]} : vector<128x32xf32> to vector<8x32xf32>
    %cst_66 = arith.constant 0.000000e+00 : f32
    %399 = vector.broadcast %cst_66 : f32 to vector<8x32xf32>
    %c7_i32_67 = arith.constant 7 : i32
    %400 = tpu.dynamic_rotate %398 by %c7_i32_67 dim 0 : vector<8x32xf32>, i32 -> vector<8x32xf32>
    %401 = vector.extract_strided_slice %3 {offsets = [1, 0], sizes = [1, 32], strides = [1, 1]} : vector<8x32xf32> to vector<1x32xf32>
    %402 = vector.broadcast %401 : vector<1x32xf32> to vector<8x32xf32>
    %403 = arith.mulf %400, %402 : vector<8x32xf32>
    %404 = arith.addf %399, %403 : vector<8x32xf32>
    %c6_i32_68 = arith.constant 6 : i32
    %405 = tpu.dynamic_rotate %398 by %c6_i32_68 dim 0 : vector<8x32xf32>, i32 -> vector<8x32xf32>
    %406 = vector.extract_strided_slice %3 {offsets = [2, 0], sizes = [1, 32], strides = [1, 1]} : vector<8x32xf32> to vector<1x32xf32>
    %407 = vector.broadcast %406 : vector<1x32xf32> to vector<8x32xf32>
    %408 = arith.mulf %405, %407 : vector<8x32xf32>
    %409 = arith.addf %404, %408 : vector<8x32xf32>
    %c5_i32_69 = arith.constant 5 : i32
    %410 = tpu.dynamic_rotate %398 by %c5_i32_69 dim 0 : vector<8x32xf32>, i32 -> vector<8x32xf32>
    %411 = vector.extract_strided_slice %3 {offsets = [3, 0], sizes = [1, 32], strides = [1, 1]} : vector<8x32xf32> to vector<1x32xf32>
    %412 = vector.broadcast %411 : vector<1x32xf32> to vector<8x32xf32>
    %413 = arith.mulf %410, %412 : vector<8x32xf32>
    %414 = arith.addf %409, %413 : vector<8x32xf32>
    %c4_i32_70 = arith.constant 4 : i32
    %415 = tpu.dynamic_rotate %398 by %c4_i32_70 dim 0 : vector<8x32xf32>, i32 -> vector<8x32xf32>
    %416 = vector.extract_strided_slice %3 {offsets = [4, 0], sizes = [1, 32], strides = [1, 1]} : vector<8x32xf32> to vector<1x32xf32>
    %417 = vector.broadcast %416 : vector<1x32xf32> to vector<8x32xf32>
    %418 = arith.mulf %415, %417 : vector<8x32xf32>
    %419 = arith.addf %414, %418 : vector<8x32xf32>
    %c3_i32_71 = arith.constant 3 : i32
    %420 = tpu.dynamic_rotate %398 by %c3_i32_71 dim 0 : vector<8x32xf32>, i32 -> vector<8x32xf32>
    %421 = vector.extract_strided_slice %3 {offsets = [5, 0], sizes = [1, 32], strides = [1, 1]} : vector<8x32xf32> to vector<1x32xf32>
    %422 = vector.broadcast %421 : vector<1x32xf32> to vector<8x32xf32>
    %423 = arith.mulf %420, %422 : vector<8x32xf32>
    %424 = arith.addf %419, %423 : vector<8x32xf32>
    %c2_i32_72 = arith.constant 2 : i32
    %425 = tpu.dynamic_rotate %398 by %c2_i32_72 dim 0 : vector<8x32xf32>, i32 -> vector<8x32xf32>
    %426 = vector.extract_strided_slice %3 {offsets = [6, 0], sizes = [1, 32], strides = [1, 1]} : vector<8x32xf32> to vector<1x32xf32>
    %427 = vector.broadcast %426 : vector<1x32xf32> to vector<8x32xf32>
    %428 = arith.mulf %425, %427 : vector<8x32xf32>
    %429 = arith.addf %424, %428 : vector<8x32xf32>
    %c1_i32_73 = arith.constant 1 : i32
    %430 = tpu.dynamic_rotate %398 by %c1_i32_73 dim 0 : vector<8x32xf32>, i32 -> vector<8x32xf32>
    %431 = vector.extract_strided_slice %3 {offsets = [7, 0], sizes = [1, 32], strides = [1, 1]} : vector<8x32xf32> to vector<1x32xf32>
    %432 = vector.broadcast %431 : vector<1x32xf32> to vector<8x32xf32>
    %433 = arith.mulf %430, %432 : vector<8x32xf32>
    %434 = arith.addf %429, %433 : vector<8x32xf32>
    %435 = vector.extract_strided_slice %33 {offsets = [72, 0], sizes = [8, 32], strides = [1, 1]} : vector<128x32xf32> to vector<8x32xf32>
    %cst_74 = arith.constant 0.000000e+00 : f32
    %436 = vector.broadcast %cst_74 : f32 to vector<8x32xf32>
    %c7_i32_75 = arith.constant 7 : i32
    %437 = tpu.dynamic_rotate %435 by %c7_i32_75 dim 0 : vector<8x32xf32>, i32 -> vector<8x32xf32>
    %438 = vector.extract_strided_slice %3 {offsets = [1, 0], sizes = [1, 32], strides = [1, 1]} : vector<8x32xf32> to vector<1x32xf32>
    %439 = vector.broadcast %438 : vector<1x32xf32> to vector<8x32xf32>
    %440 = arith.mulf %437, %439 : vector<8x32xf32>
    %441 = arith.addf %436, %440 : vector<8x32xf32>
    %c6_i32_76 = arith.constant 6 : i32
    %442 = tpu.dynamic_rotate %435 by %c6_i32_76 dim 0 : vector<8x32xf32>, i32 -> vector<8x32xf32>
    %443 = vector.extract_strided_slice %3 {offsets = [2, 0], sizes = [1, 32], strides = [1, 1]} : vector<8x32xf32> to vector<1x32xf32>
    %444 = vector.broadcast %443 : vector<1x32xf32> to vector<8x32xf32>
    %445 = arith.mulf %442, %444 : vector<8x32xf32>
    %446 = arith.addf %441, %445 : vector<8x32xf32>
    %c5_i32_77 = arith.constant 5 : i32
    %447 = tpu.dynamic_rotate %435 by %c5_i32_77 dim 0 : vector<8x32xf32>, i32 -> vector<8x32xf32>
    %448 = vector.extract_strided_slice %3 {offsets = [3, 0], sizes = [1, 32], strides = [1, 1]} : vector<8x32xf32> to vector<1x32xf32>
    %449 = vector.broadcast %448 : vector<1x32xf32> to vector<8x32xf32>
    %450 = arith.mulf %447, %449 : vector<8x32xf32>
    %451 = arith.addf %446, %450 : vector<8x32xf32>
    %c4_i32_78 = arith.constant 4 : i32
    %452 = tpu.dynamic_rotate %435 by %c4_i32_78 dim 0 : vector<8x32xf32>, i32 -> vector<8x32xf32>
    %453 = vector.extract_strided_slice %3 {offsets = [4, 0], sizes = [1, 32], strides = [1, 1]} : vector<8x32xf32> to vector<1x32xf32>
    %454 = vector.broadcast %453 : vector<1x32xf32> to vector<8x32xf32>
    %455 = arith.mulf %452, %454 : vector<8x32xf32>
    %456 = arith.addf %451, %455 : vector<8x32xf32>
    %c3_i32_79 = arith.constant 3 : i32
    %457 = tpu.dynamic_rotate %435 by %c3_i32_79 dim 0 : vector<8x32xf32>, i32 -> vector<8x32xf32>
    %458 = vector.extract_strided_slice %3 {offsets = [5, 0], sizes = [1, 32], strides = [1, 1]} : vector<8x32xf32> to vector<1x32xf32>
    %459 = vector.broadcast %458 : vector<1x32xf32> to vector<8x32xf32>
    %460 = arith.mulf %457, %459 : vector<8x32xf32>
    %461 = arith.addf %456, %460 : vector<8x32xf32>
    %c2_i32_80 = arith.constant 2 : i32
    %462 = tpu.dynamic_rotate %435 by %c2_i32_80 dim 0 : vector<8x32xf32>, i32 -> vector<8x32xf32>
    %463 = vector.extract_strided_slice %3 {offsets = [6, 0], sizes = [1, 32], strides = [1, 1]} : vector<8x32xf32> to vector<1x32xf32>
    %464 = vector.broadcast %463 : vector<1x32xf32> to vector<8x32xf32>
    %465 = arith.mulf %462, %464 : vector<8x32xf32>
    %466 = arith.addf %461, %465 : vector<8x32xf32>
    %c1_i32_81 = arith.constant 1 : i32
    %467 = tpu.dynamic_rotate %435 by %c1_i32_81 dim 0 : vector<8x32xf32>, i32 -> vector<8x32xf32>
    %468 = vector.extract_strided_slice %3 {offsets = [7, 0], sizes = [1, 32], strides = [1, 1]} : vector<8x32xf32> to vector<1x32xf32>
    %469 = vector.broadcast %468 : vector<1x32xf32> to vector<8x32xf32>
    %470 = arith.mulf %467, %469 : vector<8x32xf32>
    %471 = arith.addf %466, %470 : vector<8x32xf32>
    %472 = vector.extract_strided_slice %33 {offsets = [80, 0], sizes = [8, 32], strides = [1, 1]} : vector<128x32xf32> to vector<8x32xf32>
    %cst_82 = arith.constant 0.000000e+00 : f32
    %473 = vector.broadcast %cst_82 : f32 to vector<8x32xf32>
    %c7_i32_83 = arith.constant 7 : i32
    %474 = tpu.dynamic_rotate %472 by %c7_i32_83 dim 0 : vector<8x32xf32>, i32 -> vector<8x32xf32>
    %475 = vector.extract_strided_slice %3 {offsets = [1, 0], sizes = [1, 32], strides = [1, 1]} : vector<8x32xf32> to vector<1x32xf32>
    %476 = vector.broadcast %475 : vector<1x32xf32> to vector<8x32xf32>
    %477 = arith.mulf %474, %476 : vector<8x32xf32>
    %478 = arith.addf %473, %477 : vector<8x32xf32>
    %c6_i32_84 = arith.constant 6 : i32
    %479 = tpu.dynamic_rotate %472 by %c6_i32_84 dim 0 : vector<8x32xf32>, i32 -> vector<8x32xf32>
    %480 = vector.extract_strided_slice %3 {offsets = [2, 0], sizes = [1, 32], strides = [1, 1]} : vector<8x32xf32> to vector<1x32xf32>
    %481 = vector.broadcast %480 : vector<1x32xf32> to vector<8x32xf32>
    %482 = arith.mulf %479, %481 : vector<8x32xf32>
    %483 = arith.addf %478, %482 : vector<8x32xf32>
    %c5_i32_85 = arith.constant 5 : i32
    %484 = tpu.dynamic_rotate %472 by %c5_i32_85 dim 0 : vector<8x32xf32>, i32 -> vector<8x32xf32>
    %485 = vector.extract_strided_slice %3 {offsets = [3, 0], sizes = [1, 32], strides = [1, 1]} : vector<8x32xf32> to vector<1x32xf32>
    %486 = vector.broadcast %485 : vector<1x32xf32> to vector<8x32xf32>
    %487 = arith.mulf %484, %486 : vector<8x32xf32>
    %488 = arith.addf %483, %487 : vector<8x32xf32>
    %c4_i32_86 = arith.constant 4 : i32
    %489 = tpu.dynamic_rotate %472 by %c4_i32_86 dim 0 : vector<8x32xf32>, i32 -> vector<8x32xf32>
    %490 = vector.extract_strided_slice %3 {offsets = [4, 0], sizes = [1, 32], strides = [1, 1]} : vector<8x32xf32> to vector<1x32xf32>
    %491 = vector.broadcast %490 : vector<1x32xf32> to vector<8x32xf32>
    %492 = arith.mulf %489, %491 : vector<8x32xf32>
    %493 = arith.addf %488, %492 : vector<8x32xf32>
    %c3_i32_87 = arith.constant 3 : i32
    %494 = tpu.dynamic_rotate %472 by %c3_i32_87 dim 0 : vector<8x32xf32>, i32 -> vector<8x32xf32>
    %495 = vector.extract_strided_slice %3 {offsets = [5, 0], sizes = [1, 32], strides = [1, 1]} : vector<8x32xf32> to vector<1x32xf32>
    %496 = vector.broadcast %495 : vector<1x32xf32> to vector<8x32xf32>
    %497 = arith.mulf %494, %496 : vector<8x32xf32>
    %498 = arith.addf %493, %497 : vector<8x32xf32>
    %c2_i32_88 = arith.constant 2 : i32
    %499 = tpu.dynamic_rotate %472 by %c2_i32_88 dim 0 : vector<8x32xf32>, i32 -> vector<8x32xf32>
    %500 = vector.extract_strided_slice %3 {offsets = [6, 0], sizes = [1, 32], strides = [1, 1]} : vector<8x32xf32> to vector<1x32xf32>
    %501 = vector.broadcast %500 : vector<1x32xf32> to vector<8x32xf32>
    %502 = arith.mulf %499, %501 : vector<8x32xf32>
    %503 = arith.addf %498, %502 : vector<8x32xf32>
    %c1_i32_89 = arith.constant 1 : i32
    %504 = tpu.dynamic_rotate %472 by %c1_i32_89 dim 0 : vector<8x32xf32>, i32 -> vector<8x32xf32>
    %505 = vector.extract_strided_slice %3 {offsets = [7, 0], sizes = [1, 32], strides = [1, 1]} : vector<8x32xf32> to vector<1x32xf32>
    %506 = vector.broadcast %505 : vector<1x32xf32> to vector<8x32xf32>
    %507 = arith.mulf %504, %506 : vector<8x32xf32>
    %508 = arith.addf %503, %507 : vector<8x32xf32>
    %509 = vector.extract_strided_slice %33 {offsets = [88, 0], sizes = [8, 32], strides = [1, 1]} : vector<128x32xf32> to vector<8x32xf32>
    %cst_90 = arith.constant 0.000000e+00 : f32
    %510 = vector.broadcast %cst_90 : f32 to vector<8x32xf32>
    %c7_i32_91 = arith.constant 7 : i32
    %511 = tpu.dynamic_rotate %509 by %c7_i32_91 dim 0 : vector<8x32xf32>, i32 -> vector<8x32xf32>
    %512 = vector.extract_strided_slice %3 {offsets = [1, 0], sizes = [1, 32], strides = [1, 1]} : vector<8x32xf32> to vector<1x32xf32>
    %513 = vector.broadcast %512 : vector<1x32xf32> to vector<8x32xf32>
    %514 = arith.mulf %511, %513 : vector<8x32xf32>
    %515 = arith.addf %510, %514 : vector<8x32xf32>
    %c6_i32_92 = arith.constant 6 : i32
    %516 = tpu.dynamic_rotate %509 by %c6_i32_92 dim 0 : vector<8x32xf32>, i32 -> vector<8x32xf32>
    %517 = vector.extract_strided_slice %3 {offsets = [2, 0], sizes = [1, 32], strides = [1, 1]} : vector<8x32xf32> to vector<1x32xf32>
    %518 = vector.broadcast %517 : vector<1x32xf32> to vector<8x32xf32>
    %519 = arith.mulf %516, %518 : vector<8x32xf32>
    %520 = arith.addf %515, %519 : vector<8x32xf32>
    %c5_i32_93 = arith.constant 5 : i32
    %521 = tpu.dynamic_rotate %509 by %c5_i32_93 dim 0 : vector<8x32xf32>, i32 -> vector<8x32xf32>
    %522 = vector.extract_strided_slice %3 {offsets = [3, 0], sizes = [1, 32], strides = [1, 1]} : vector<8x32xf32> to vector<1x32xf32>
    %523 = vector.broadcast %522 : vector<1x32xf32> to vector<8x32xf32>
    %524 = arith.mulf %521, %523 : vector<8x32xf32>
    %525 = arith.addf %520, %524 : vector<8x32xf32>
    %c4_i32_94 = arith.constant 4 : i32
    %526 = tpu.dynamic_rotate %509 by %c4_i32_94 dim 0 : vector<8x32xf32>, i32 -> vector<8x32xf32>
    %527 = vector.extract_strided_slice %3 {offsets = [4, 0], sizes = [1, 32], strides = [1, 1]} : vector<8x32xf32> to vector<1x32xf32>
    %528 = vector.broadcast %527 : vector<1x32xf32> to vector<8x32xf32>
    %529 = arith.mulf %526, %528 : vector<8x32xf32>
    %530 = arith.addf %525, %529 : vector<8x32xf32>
    %c3_i32_95 = arith.constant 3 : i32
    %531 = tpu.dynamic_rotate %509 by %c3_i32_95 dim 0 : vector<8x32xf32>, i32 -> vector<8x32xf32>
    %532 = vector.extract_strided_slice %3 {offsets = [5, 0], sizes = [1, 32], strides = [1, 1]} : vector<8x32xf32> to vector<1x32xf32>
    %533 = vector.broadcast %532 : vector<1x32xf32> to vector<8x32xf32>
    %534 = arith.mulf %531, %533 : vector<8x32xf32>
    %535 = arith.addf %530, %534 : vector<8x32xf32>
    %c2_i32_96 = arith.constant 2 : i32
    %536 = tpu.dynamic_rotate %509 by %c2_i32_96 dim 0 : vector<8x32xf32>, i32 -> vector<8x32xf32>
    %537 = vector.extract_strided_slice %3 {offsets = [6, 0], sizes = [1, 32], strides = [1, 1]} : vector<8x32xf32> to vector<1x32xf32>
    %538 = vector.broadcast %537 : vector<1x32xf32> to vector<8x32xf32>
    %539 = arith.mulf %536, %538 : vector<8x32xf32>
    %540 = arith.addf %535, %539 : vector<8x32xf32>
    %c1_i32_97 = arith.constant 1 : i32
    %541 = tpu.dynamic_rotate %509 by %c1_i32_97 dim 0 : vector<8x32xf32>, i32 -> vector<8x32xf32>
    %542 = vector.extract_strided_slice %3 {offsets = [7, 0], sizes = [1, 32], strides = [1, 1]} : vector<8x32xf32> to vector<1x32xf32>
    %543 = vector.broadcast %542 : vector<1x32xf32> to vector<8x32xf32>
    %544 = arith.mulf %541, %543 : vector<8x32xf32>
    %545 = arith.addf %540, %544 : vector<8x32xf32>
    %546 = vector.extract_strided_slice %33 {offsets = [96, 0], sizes = [8, 32], strides = [1, 1]} : vector<128x32xf32> to vector<8x32xf32>
    %cst_98 = arith.constant 0.000000e+00 : f32
    %547 = vector.broadcast %cst_98 : f32 to vector<8x32xf32>
    %c7_i32_99 = arith.constant 7 : i32
    %548 = tpu.dynamic_rotate %546 by %c7_i32_99 dim 0 : vector<8x32xf32>, i32 -> vector<8x32xf32>
    %549 = vector.extract_strided_slice %3 {offsets = [1, 0], sizes = [1, 32], strides = [1, 1]} : vector<8x32xf32> to vector<1x32xf32>
    %550 = vector.broadcast %549 : vector<1x32xf32> to vector<8x32xf32>
    %551 = arith.mulf %548, %550 : vector<8x32xf32>
    %552 = arith.addf %547, %551 : vector<8x32xf32>
    %c6_i32_100 = arith.constant 6 : i32
    %553 = tpu.dynamic_rotate %546 by %c6_i32_100 dim 0 : vector<8x32xf32>, i32 -> vector<8x32xf32>
    %554 = vector.extract_strided_slice %3 {offsets = [2, 0], sizes = [1, 32], strides = [1, 1]} : vector<8x32xf32> to vector<1x32xf32>
    %555 = vector.broadcast %554 : vector<1x32xf32> to vector<8x32xf32>
    %556 = arith.mulf %553, %555 : vector<8x32xf32>
    %557 = arith.addf %552, %556 : vector<8x32xf32>
    %c5_i32_101 = arith.constant 5 : i32
    %558 = tpu.dynamic_rotate %546 by %c5_i32_101 dim 0 : vector<8x32xf32>, i32 -> vector<8x32xf32>
    %559 = vector.extract_strided_slice %3 {offsets = [3, 0], sizes = [1, 32], strides = [1, 1]} : vector<8x32xf32> to vector<1x32xf32>
    %560 = vector.broadcast %559 : vector<1x32xf32> to vector<8x32xf32>
    %561 = arith.mulf %558, %560 : vector<8x32xf32>
    %562 = arith.addf %557, %561 : vector<8x32xf32>
    %c4_i32_102 = arith.constant 4 : i32
    %563 = tpu.dynamic_rotate %546 by %c4_i32_102 dim 0 : vector<8x32xf32>, i32 -> vector<8x32xf32>
    %564 = vector.extract_strided_slice %3 {offsets = [4, 0], sizes = [1, 32], strides = [1, 1]} : vector<8x32xf32> to vector<1x32xf32>
    %565 = vector.broadcast %564 : vector<1x32xf32> to vector<8x32xf32>
    %566 = arith.mulf %563, %565 : vector<8x32xf32>
    %567 = arith.addf %562, %566 : vector<8x32xf32>
    %c3_i32_103 = arith.constant 3 : i32
    %568 = tpu.dynamic_rotate %546 by %c3_i32_103 dim 0 : vector<8x32xf32>, i32 -> vector<8x32xf32>
    %569 = vector.extract_strided_slice %3 {offsets = [5, 0], sizes = [1, 32], strides = [1, 1]} : vector<8x32xf32> to vector<1x32xf32>
    %570 = vector.broadcast %569 : vector<1x32xf32> to vector<8x32xf32>
    %571 = arith.mulf %568, %570 : vector<8x32xf32>
    %572 = arith.addf %567, %571 : vector<8x32xf32>
    %c2_i32_104 = arith.constant 2 : i32
    %573 = tpu.dynamic_rotate %546 by %c2_i32_104 dim 0 : vector<8x32xf32>, i32 -> vector<8x32xf32>
    %574 = vector.extract_strided_slice %3 {offsets = [6, 0], sizes = [1, 32], strides = [1, 1]} : vector<8x32xf32> to vector<1x32xf32>
    %575 = vector.broadcast %574 : vector<1x32xf32> to vector<8x32xf32>
    %576 = arith.mulf %573, %575 : vector<8x32xf32>
    %577 = arith.addf %572, %576 : vector<8x32xf32>
    %c1_i32_105 = arith.constant 1 : i32
    %578 = tpu.dynamic_rotate %546 by %c1_i32_105 dim 0 : vector<8x32xf32>, i32 -> vector<8x32xf32>
    %579 = vector.extract_strided_slice %3 {offsets = [7, 0], sizes = [1, 32], strides = [1, 1]} : vector<8x32xf32> to vector<1x32xf32>
    %580 = vector.broadcast %579 : vector<1x32xf32> to vector<8x32xf32>
    %581 = arith.mulf %578, %580 : vector<8x32xf32>
    %582 = arith.addf %577, %581 : vector<8x32xf32>
    %583 = vector.extract_strided_slice %33 {offsets = [104, 0], sizes = [8, 32], strides = [1, 1]} : vector<128x32xf32> to vector<8x32xf32>
    %cst_106 = arith.constant 0.000000e+00 : f32
    %584 = vector.broadcast %cst_106 : f32 to vector<8x32xf32>
    %c7_i32_107 = arith.constant 7 : i32
    %585 = tpu.dynamic_rotate %583 by %c7_i32_107 dim 0 : vector<8x32xf32>, i32 -> vector<8x32xf32>
    %586 = vector.extract_strided_slice %3 {offsets = [1, 0], sizes = [1, 32], strides = [1, 1]} : vector<8x32xf32> to vector<1x32xf32>
    %587 = vector.broadcast %586 : vector<1x32xf32> to vector<8x32xf32>
    %588 = arith.mulf %585, %587 : vector<8x32xf32>
    %589 = arith.addf %584, %588 : vector<8x32xf32>
    %c6_i32_108 = arith.constant 6 : i32
    %590 = tpu.dynamic_rotate %583 by %c6_i32_108 dim 0 : vector<8x32xf32>, i32 -> vector<8x32xf32>
    %591 = vector.extract_strided_slice %3 {offsets = [2, 0], sizes = [1, 32], strides = [1, 1]} : vector<8x32xf32> to vector<1x32xf32>
    %592 = vector.broadcast %591 : vector<1x32xf32> to vector<8x32xf32>
    %593 = arith.mulf %590, %592 : vector<8x32xf32>
    %594 = arith.addf %589, %593 : vector<8x32xf32>
    %c5_i32_109 = arith.constant 5 : i32
    %595 = tpu.dynamic_rotate %583 by %c5_i32_109 dim 0 : vector<8x32xf32>, i32 -> vector<8x32xf32>
    %596 = vector.extract_strided_slice %3 {offsets = [3, 0], sizes = [1, 32], strides = [1, 1]} : vector<8x32xf32> to vector<1x32xf32>
    %597 = vector.broadcast %596 : vector<1x32xf32> to vector<8x32xf32>
    %598 = arith.mulf %595, %597 : vector<8x32xf32>
    %599 = arith.addf %594, %598 : vector<8x32xf32>
    %c4_i32_110 = arith.constant 4 : i32
    %600 = tpu.dynamic_rotate %583 by %c4_i32_110 dim 0 : vector<8x32xf32>, i32 -> vector<8x32xf32>
    %601 = vector.extract_strided_slice %3 {offsets = [4, 0], sizes = [1, 32], strides = [1, 1]} : vector<8x32xf32> to vector<1x32xf32>
    %602 = vector.broadcast %601 : vector<1x32xf32> to vector<8x32xf32>
    %603 = arith.mulf %600, %602 : vector<8x32xf32>
    %604 = arith.addf %599, %603 : vector<8x32xf32>
    %c3_i32_111 = arith.constant 3 : i32
    %605 = tpu.dynamic_rotate %583 by %c3_i32_111 dim 0 : vector<8x32xf32>, i32 -> vector<8x32xf32>
    %606 = vector.extract_strided_slice %3 {offsets = [5, 0], sizes = [1, 32], strides = [1, 1]} : vector<8x32xf32> to vector<1x32xf32>
    %607 = vector.broadcast %606 : vector<1x32xf32> to vector<8x32xf32>
    %608 = arith.mulf %605, %607 : vector<8x32xf32>
    %609 = arith.addf %604, %608 : vector<8x32xf32>
    %c2_i32_112 = arith.constant 2 : i32
    %610 = tpu.dynamic_rotate %583 by %c2_i32_112 dim 0 : vector<8x32xf32>, i32 -> vector<8x32xf32>
    %611 = vector.extract_strided_slice %3 {offsets = [6, 0], sizes = [1, 32], strides = [1, 1]} : vector<8x32xf32> to vector<1x32xf32>
    %612 = vector.broadcast %611 : vector<1x32xf32> to vector<8x32xf32>
    %613 = arith.mulf %610, %612 : vector<8x32xf32>
    %614 = arith.addf %609, %613 : vector<8x32xf32>
    %c1_i32_113 = arith.constant 1 : i32
    %615 = tpu.dynamic_rotate %583 by %c1_i32_113 dim 0 : vector<8x32xf32>, i32 -> vector<8x32xf32>
    %616 = vector.extract_strided_slice %3 {offsets = [7, 0], sizes = [1, 32], strides = [1, 1]} : vector<8x32xf32> to vector<1x32xf32>
    %617 = vector.broadcast %616 : vector<1x32xf32> to vector<8x32xf32>
    %618 = arith.mulf %615, %617 : vector<8x32xf32>
    %619 = arith.addf %614, %618 : vector<8x32xf32>
    %620 = vector.extract_strided_slice %33 {offsets = [112, 0], sizes = [8, 32], strides = [1, 1]} : vector<128x32xf32> to vector<8x32xf32>
    %cst_114 = arith.constant 0.000000e+00 : f32
    %621 = vector.broadcast %cst_114 : f32 to vector<8x32xf32>
    %c7_i32_115 = arith.constant 7 : i32
    %622 = tpu.dynamic_rotate %620 by %c7_i32_115 dim 0 : vector<8x32xf32>, i32 -> vector<8x32xf32>
    %623 = vector.extract_strided_slice %3 {offsets = [1, 0], sizes = [1, 32], strides = [1, 1]} : vector<8x32xf32> to vector<1x32xf32>
    %624 = vector.broadcast %623 : vector<1x32xf32> to vector<8x32xf32>
    %625 = arith.mulf %622, %624 : vector<8x32xf32>
    %626 = arith.addf %621, %625 : vector<8x32xf32>
    %c6_i32_116 = arith.constant 6 : i32
    %627 = tpu.dynamic_rotate %620 by %c6_i32_116 dim 0 : vector<8x32xf32>, i32 -> vector<8x32xf32>
    %628 = vector.extract_strided_slice %3 {offsets = [2, 0], sizes = [1, 32], strides = [1, 1]} : vector<8x32xf32> to vector<1x32xf32>
    %629 = vector.broadcast %628 : vector<1x32xf32> to vector<8x32xf32>
    %630 = arith.mulf %627, %629 : vector<8x32xf32>
    %631 = arith.addf %626, %630 : vector<8x32xf32>
    %c5_i32_117 = arith.constant 5 : i32
    %632 = tpu.dynamic_rotate %620 by %c5_i32_117 dim 0 : vector<8x32xf32>, i32 -> vector<8x32xf32>
    %633 = vector.extract_strided_slice %3 {offsets = [3, 0], sizes = [1, 32], strides = [1, 1]} : vector<8x32xf32> to vector<1x32xf32>
    %634 = vector.broadcast %633 : vector<1x32xf32> to vector<8x32xf32>
    %635 = arith.mulf %632, %634 : vector<8x32xf32>
    %636 = arith.addf %631, %635 : vector<8x32xf32>
    %c4_i32_118 = arith.constant 4 : i32
    %637 = tpu.dynamic_rotate %620 by %c4_i32_118 dim 0 : vector<8x32xf32>, i32 -> vector<8x32xf32>
    %638 = vector.extract_strided_slice %3 {offsets = [4, 0], sizes = [1, 32], strides = [1, 1]} : vector<8x32xf32> to vector<1x32xf32>
    %639 = vector.broadcast %638 : vector<1x32xf32> to vector<8x32xf32>
    %640 = arith.mulf %637, %639 : vector<8x32xf32>
    %641 = arith.addf %636, %640 : vector<8x32xf32>
    %c3_i32_119 = arith.constant 3 : i32
    %642 = tpu.dynamic_rotate %620 by %c3_i32_119 dim 0 : vector<8x32xf32>, i32 -> vector<8x32xf32>
    %643 = vector.extract_strided_slice %3 {offsets = [5, 0], sizes = [1, 32], strides = [1, 1]} : vector<8x32xf32> to vector<1x32xf32>
    %644 = vector.broadcast %643 : vector<1x32xf32> to vector<8x32xf32>
    %645 = arith.mulf %642, %644 : vector<8x32xf32>
    %646 = arith.addf %641, %645 : vector<8x32xf32>
    %c2_i32_120 = arith.constant 2 : i32
    %647 = tpu.dynamic_rotate %620 by %c2_i32_120 dim 0 : vector<8x32xf32>, i32 -> vector<8x32xf32>
    %648 = vector.extract_strided_slice %3 {offsets = [6, 0], sizes = [1, 32], strides = [1, 1]} : vector<8x32xf32> to vector<1x32xf32>
    %649 = vector.broadcast %648 : vector<1x32xf32> to vector<8x32xf32>
    %650 = arith.mulf %647, %649 : vector<8x32xf32>
    %651 = arith.addf %646, %650 : vector<8x32xf32>
    %c1_i32_121 = arith.constant 1 : i32
    %652 = tpu.dynamic_rotate %620 by %c1_i32_121 dim 0 : vector<8x32xf32>, i32 -> vector<8x32xf32>
    %653 = vector.extract_strided_slice %3 {offsets = [7, 0], sizes = [1, 32], strides = [1, 1]} : vector<8x32xf32> to vector<1x32xf32>
    %654 = vector.broadcast %653 : vector<1x32xf32> to vector<8x32xf32>
    %655 = arith.mulf %652, %654 : vector<8x32xf32>
    %656 = arith.addf %651, %655 : vector<8x32xf32>
    %657 = vector.extract_strided_slice %33 {offsets = [120, 0], sizes = [8, 32], strides = [1, 1]} : vector<128x32xf32> to vector<8x32xf32>
    %cst_122 = arith.constant 0.000000e+00 : f32
    %658 = vector.broadcast %cst_122 : f32 to vector<8x32xf32>
    %c7_i32_123 = arith.constant 7 : i32
    %659 = tpu.dynamic_rotate %657 by %c7_i32_123 dim 0 : vector<8x32xf32>, i32 -> vector<8x32xf32>
    %660 = vector.extract_strided_slice %3 {offsets = [1, 0], sizes = [1, 32], strides = [1, 1]} : vector<8x32xf32> to vector<1x32xf32>
    %661 = vector.broadcast %660 : vector<1x32xf32> to vector<8x32xf32>
    %662 = arith.mulf %659, %661 : vector<8x32xf32>
    %663 = arith.addf %658, %662 : vector<8x32xf32>
    %c6_i32_124 = arith.constant 6 : i32
    %664 = tpu.dynamic_rotate %657 by %c6_i32_124 dim 0 : vector<8x32xf32>, i32 -> vector<8x32xf32>
    %665 = vector.extract_strided_slice %3 {offsets = [2, 0], sizes = [1, 32], strides = [1, 1]} : vector<8x32xf32> to vector<1x32xf32>
    %666 = vector.broadcast %665 : vector<1x32xf32> to vector<8x32xf32>
    %667 = arith.mulf %664, %666 : vector<8x32xf32>
    %668 = arith.addf %663, %667 : vector<8x32xf32>
    %c5_i32_125 = arith.constant 5 : i32
    %669 = tpu.dynamic_rotate %657 by %c5_i32_125 dim 0 : vector<8x32xf32>, i32 -> vector<8x32xf32>
    %670 = vector.extract_strided_slice %3 {offsets = [3, 0], sizes = [1, 32], strides = [1, 1]} : vector<8x32xf32> to vector<1x32xf32>
    %671 = vector.broadcast %670 : vector<1x32xf32> to vector<8x32xf32>
    %672 = arith.mulf %669, %671 : vector<8x32xf32>
    %673 = arith.addf %668, %672 : vector<8x32xf32>
    %c4_i32_126 = arith.constant 4 : i32
    %674 = tpu.dynamic_rotate %657 by %c4_i32_126 dim 0 : vector<8x32xf32>, i32 -> vector<8x32xf32>
    %675 = vector.extract_strided_slice %3 {offsets = [4, 0], sizes = [1, 32], strides = [1, 1]} : vector<8x32xf32> to vector<1x32xf32>
    %676 = vector.broadcast %675 : vector<1x32xf32> to vector<8x32xf32>
    %677 = arith.mulf %674, %676 : vector<8x32xf32>
    %678 = arith.addf %673, %677 : vector<8x32xf32>
    %c3_i32_127 = arith.constant 3 : i32
    %679 = tpu.dynamic_rotate %657 by %c3_i32_127 dim 0 : vector<8x32xf32>, i32 -> vector<8x32xf32>
    %680 = vector.extract_strided_slice %3 {offsets = [5, 0], sizes = [1, 32], strides = [1, 1]} : vector<8x32xf32> to vector<1x32xf32>
    %681 = vector.broadcast %680 : vector<1x32xf32> to vector<8x32xf32>
    %682 = arith.mulf %679, %681 : vector<8x32xf32>
    %683 = arith.addf %678, %682 : vector<8x32xf32>
    %c2_i32_128 = arith.constant 2 : i32
    %684 = tpu.dynamic_rotate %657 by %c2_i32_128 dim 0 : vector<8x32xf32>, i32 -> vector<8x32xf32>
    %685 = vector.extract_strided_slice %3 {offsets = [6, 0], sizes = [1, 32], strides = [1, 1]} : vector<8x32xf32> to vector<1x32xf32>
    %686 = vector.broadcast %685 : vector<1x32xf32> to vector<8x32xf32>
    %687 = arith.mulf %684, %686 : vector<8x32xf32>
    %688 = arith.addf %683, %687 : vector<8x32xf32>
    %c1_i32_129 = arith.constant 1 : i32
    %689 = tpu.dynamic_rotate %657 by %c1_i32_129 dim 0 : vector<8x32xf32>, i32 -> vector<8x32xf32>
    %690 = vector.extract_strided_slice %3 {offsets = [7, 0], sizes = [1, 32], strides = [1, 1]} : vector<8x32xf32> to vector<1x32xf32>
    %691 = vector.broadcast %690 : vector<1x32xf32> to vector<8x32xf32>
    %692 = arith.mulf %689, %691 : vector<8x32xf32>
    %693 = arith.addf %688, %692 : vector<8x32xf32>
    %694 = tpu.concatenate %138, %175, %212, %249, %286, %323, %360, %397, %434, %471, %508, %545, %582, %619, %656, %693 in 0 : vector<8x32xf32>, vector<8x32xf32>, vector<8x32xf32>, vector<8x32xf32>, vector<8x32xf32>, vector<8x32xf32>, vector<8x32xf32>, vector<8x32xf32>, vector<8x32xf32>, vector<8x32xf32>, vector<8x32xf32>, vector<8x32xf32>, vector<8x32xf32>, vector<8x32xf32>, vector<8x32xf32>, vector<8x32xf32> -> vector<128x32xf32>
    %695 = arith.addf %101, %694 : vector<128x32xf32>
    %696 = vector.broadcast %10 : vector<1x32xf32> to vector<128x32xf32>
    %697 = arith.addf %695, %696 : vector<128x32xf32>
    %698 = vector.broadcast %8 : vector<1x32xf32> to vector<128x32xf32>
    %699 = arith.mulf %698, %697 : vector<128x32xf32>
    %700 = arith.addf %0, %699 : vector<128x32xf32>
    %cst_130 = arith.constant dense<0.000000e+00> : vector<128xf32>
    %701 = vector.multi_reduction <add>, %700, %cst_130 [1] : vector<128x32xf32> to vector<128xf32>
    %702 = vector.shape_cast %701 : vector<128xf32> to vector<128x1xf32>
    %cst_131 = arith.constant 3.200000e+01 : f32
    %703 = vector.broadcast %cst_131 : f32 to vector<128x1xf32>
    %704 = arith.divf %702, %703 : vector<128x1xf32>
    %705 = vector.broadcast %704 : vector<128x1xf32> to vector<128x32xf32>
    %706 = arith.subf %700, %705 : vector<128x32xf32>
    %707 = arith.mulf %706, %706 : vector<128x32xf32>
    %cst_132 = arith.constant dense<0.000000e+00> : vector<128xf32>
    %708 = vector.multi_reduction <add>, %707, %cst_132 [1] : vector<128x32xf32> to vector<128xf32>
    %709 = vector.shape_cast %708 : vector<128xf32> to vector<128x1xf32>
    %cst_133 = arith.constant 3.200000e+01 : f32
    %710 = vector.broadcast %cst_133 : f32 to vector<128x1xf32>
    %711 = arith.divf %709, %710 : vector<128x1xf32>
    %cst_134 = arith.constant 9.99999997E-7 : f32
    %712 = vector.broadcast %cst_134 : f32 to vector<128x1xf32>
    %713 = arith.addf %711, %712 : vector<128x1xf32>
    %714 = math.rsqrt %713 : vector<128x1xf32>
    %715 = vector.broadcast %714 : vector<128x1xf32> to vector<128x32xf32>
    %716 = arith.mulf %706, %715 : vector<128x32xf32>
    %717 = vector.broadcast %6 : vector<1x32xf32> to vector<128x32xf32>
    %718 = arith.mulf %716, %717 : vector<128x32xf32>
    %719 = vector.broadcast %7 : vector<1x32xf32> to vector<128x32xf32>
    %720 = arith.addf %718, %719 : vector<128x32xf32>
    %721 = arith.truncf %720 : vector<128x32xf32> to vector<128x32xbf16>
    %c0_135 = arith.constant 0 : index
    %c0_136 = arith.constant 0 : index
    %722 = vector.load %arg4[%c0_135, %c0_136] : memref<32x128xbf16, #tpu.memory_space<vmem>>, vector<32x128xbf16>
    %cst_137 = arith.constant dense<0.000000e+00> : vector<128x128xf32>
    %723 = tpu.matmul %721, %722, %cst_137 {dimension_numbers = #tpu.dot_dimension_numbers<[1], [0], [0], [1], [0, 0, 1, 1], [], []>} : vector<128x32xbf16>, vector<32x128xbf16>, vector<128x128xf32> -> vector<128x128xf32>
    %c0_138 = arith.constant 0 : index
    %c0_139 = arith.constant 0 : index
    %724 = vector.load %arg3[%c0_138, %c0_139] : memref<1x128xf32, #tpu.memory_space<vmem>>, vector<1x128xf32>
    %725 = vector.broadcast %724 : vector<1x128xf32> to vector<128x128xf32>
    %726 = arith.addf %723, %725 : vector<128x128xf32>
    %cst_140 = arith.constant 5.000000e-01 : f32
    %727 = vector.broadcast %cst_140 : f32 to vector<128x128xf32>
    %728 = arith.mulf %727, %726 : vector<128x128xf32>
    %cst_141 = arith.constant 0.707106769 : f32
    %729 = vector.broadcast %cst_141 : f32 to vector<128x128xf32>
    %730 = arith.mulf %726, %729 : vector<128x128xf32>
    %731 = math.absf %730 : vector<128x128xf32>
    %cst_142 = arith.constant 0.327591091 : f32
    %732 = vector.broadcast %cst_142 : f32 to vector<128x128xf32>
    %733 = arith.mulf %732, %731 : vector<128x128xf32>
    %cst_143 = arith.constant 1.000000e+00 : f32
    %734 = vector.broadcast %cst_143 : f32 to vector<128x128xf32>
    %735 = arith.addf %734, %733 : vector<128x128xf32>
    %cst_144 = arith.constant 1.000000e+00 : f32
    %736 = vector.broadcast %cst_144 : f32 to vector<128x128xf32>
    %737 = arith.divf %736, %735 : vector<128x128xf32>
    %cst_145 = arith.constant 1.06140542 : f32
    %738 = vector.broadcast %cst_145 : f32 to vector<128x128xf32>
    %739 = arith.mulf %738, %737 : vector<128x128xf32>
    %cst_146 = arith.constant -1.45315206 : f32
    %740 = vector.broadcast %cst_146 : f32 to vector<128x128xf32>
    %741 = arith.addf %739, %740 : vector<128x128xf32>
    %742 = arith.mulf %741, %737 : vector<128x128xf32>
    %cst_147 = arith.constant 1.42141378 : f32
    %743 = vector.broadcast %cst_147 : f32 to vector<128x128xf32>
    %744 = arith.addf %742, %743 : vector<128x128xf32>
    %745 = arith.mulf %744, %737 : vector<128x128xf32>
    %cst_148 = arith.constant -0.284496725 : f32
    %746 = vector.broadcast %cst_148 : f32 to vector<128x128xf32>
    %747 = arith.addf %745, %746 : vector<128x128xf32>
    %748 = arith.mulf %747, %737 : vector<128x128xf32>
    %cst_149 = arith.constant 0.254829586 : f32
    %749 = vector.broadcast %cst_149 : f32 to vector<128x128xf32>
    %750 = arith.addf %748, %749 : vector<128x128xf32>
    %751 = arith.mulf %750, %737 : vector<128x128xf32>
    %cst_150 = arith.constant 0.000000e+00 : f32
    %752 = vector.broadcast %cst_150 : f32 to vector<128x128xf32>
    %753 = arith.subf %752, %731 : vector<128x128xf32>
    %754 = arith.mulf %753, %731 : vector<128x128xf32>
    %755 = math.exp %754 : vector<128x128xf32>
    %756 = arith.mulf %751, %755 : vector<128x128xf32>
    %cst_151 = arith.constant 1.000000e+00 : f32
    %757 = vector.broadcast %cst_151 : f32 to vector<128x128xf32>
    %758 = arith.subf %757, %756 : vector<128x128xf32>
    %cst_152 = arith.constant 0.000000e+00 : f32
    %759 = vector.broadcast %cst_152 : f32 to vector<128x128xf32>
    %760 = arith.cmpf oge, %730, %759 : vector<128x128xf32>
    %cst_153 = arith.constant 0.000000e+00 : f32
    %761 = vector.broadcast %cst_153 : f32 to vector<128x128xf32>
    %762 = arith.subf %761, %758 : vector<128x128xf32>
    %763 = arith.select %760, %758, %762 : vector<128x128xi1>, vector<128x128xf32>
    %cst_154 = arith.constant 1.000000e+00 : f32
    %764 = vector.broadcast %cst_154 : f32 to vector<128x128xf32>
    %765 = arith.addf %764, %763 : vector<128x128xf32>
    %766 = arith.mulf %728, %765 : vector<128x128xf32>
    %767 = arith.truncf %766 : vector<128x128xf32> to vector<128x128xbf16>
    %c0_155 = arith.constant 0 : index
    %c0_156 = arith.constant 0 : index
    %768 = vector.load %arg5[%c0_155, %c0_156] : memref<128x32xbf16, #tpu.memory_space<vmem>>, vector<128x32xbf16>
    %cst_157 = arith.constant dense<0.000000e+00> : vector<128x32xf32>
    %769 = tpu.matmul %767, %768, %cst_157 {dimension_numbers = #tpu.dot_dimension_numbers<[1], [0], [0], [1], [0, 0, 1, 1], [], []>} : vector<128x128xbf16>, vector<128x32xbf16>, vector<128x32xf32> -> vector<128x32xf32>
    %770 = vector.broadcast %11 : vector<1x32xf32> to vector<128x32xf32>
    %771 = arith.addf %769, %770 : vector<128x32xf32>
    %772 = vector.broadcast %9 : vector<1x32xf32> to vector<128x32xf32>
    %773 = arith.mulf %772, %771 : vector<128x32xf32>
    %774 = arith.addf %700, %773 : vector<128x32xf32>
    %c0_158 = arith.constant 0 : index
    %c0_159 = arith.constant 0 : index
    %775 = vector.load %arg6[%c0_158, %c0_159] : memref<128x32xf32, #tpu.memory_space<vmem>>, vector<128x32xf32>
    tpu.vector_store %arg6[%c0_158, %c0_159], %774 {strides = array<i32>} : memref<128x32xf32, #tpu.memory_space<vmem>>, vector<128x32xf32>,
    return
  }
}

</mosaic_0001>

<bundles_post_ra>
// kernel: gcc_block_forward.1
= control target key start
LH: loop header
LB: loop body
LE: loop exit
PB: predicated region body
PF: predicated region fallthrough
CT: control target
= control target key end

     0   :  { %vm44_vm0 = vcmask 261120   ;;  %s3950_s0 = inlined_call_operand.vmem [shape: f32[128,32], index: 0, kind: input, shape index: {}]   ;;  %s3951_s1 = inlined_call_operand.vmem [shape: f32[24,32], index: 1, kind: input, shape index: {}]   ;;  %s3952_s2 = inlined_call_operand.vmem [shape: f32[128,32], index: 2, kind: input, shape index: {}]   ;;  %s3953_s3 = inlined_call_operand.vmem [shape: f32[1,128], index: 3, kind: input, shape index: {}]   ;;  %s3954_s4 = inlined_call_operand.vmem [shape: bf16[32,128], index: 4, kind: input, shape index: {}]   ;;  %s3955_s5 = inlined_call_operand.vmem [shape: bf16[128,32], index: 5, kind: input, shape index: {}]   ;;  %s3956_s6 = inlined_call_operand.hbm [shape: f32[128,32], index: 6, kind: output, shape index: {}]  }
   0x1   :  { %v2443_v0 = vld [vmem:[%s3950_s0] sm:$0xff]  ;;  %v27_v1 = vld [vmem:[%s3950_s0 + $0x10] sm:$0xff]  ;;  %v2451_v2 = vld [vmem:[%s3950_s0 + $0x8] sm:$0xff] }
   0x2   :  { %v45_v3 = vsel %vm44_vm0, %v2443_v0, 0.0  ;;  %v51_v4 = vsel %vm44_vm0, %v27_v1, 0.0  ;;  %v28_v5 = vld [vmem:[%s3950_s0 + $0x18] sm:$0xff]  ;;  %v2462_v6 = vld [vmem:[%s3950_s0 + $0x20] sm:$0xff]  ;;  %v2467_v7 = vld [vmem:[%s3950_s0 + $0x28] sm:$0xff]  ;;  %v48_v8 = vsel %vm44_vm0, %v2451_v2, 0.0 }
   0x3   :  { %46 = vadd.xlane.f32.xlu0 %v45_v3  ;;  %52 = vadd.xlane.f32.xlu1 %v51_v4  ;;  %v54_v9 = vsel %vm44_vm0, %v28_v5, 0.0  ;;  %v2475_v10 = vld [vmem:[%s3950_s0 + $0x30] sm:$0xff]  ;;  %v2480_v11 = vld [vmem:[%s3950_s0 + $0x38] sm:$0xff]  ;;  %v57_v12 = vsel %vm44_vm0, %v2462_v6, 0.0  ;;  %v60_v13 = vsel %vm44_vm0, %v2467_v7, 0.0  ;;  %v2493_v16 = vld [vmem:[%s3950_s0 + $0x40] sm:$0xff] }
   0x4   :  { %v63_v14 = vsel %vm44_vm0, %v2475_v10, 0.0  ;;  %v66_v15 = vsel %vm44_vm0, %v2480_v11, 0.0  ;;  %v2498_v17 = vld [vmem:[%s3950_s0 + $0x48] sm:$0xff] }
   0x7   :  { %49 = vadd.xlane.f32.xlu0 %v48_v8  ;;  %55 = vadd.xlane.f32.xlu1 %v54_v9 }
   0xb   :  { %58 = vadd.xlane.f32.xlu0 %v57_v12  ;;  %61 = vadd.xlane.f32.xlu1 %v60_v13 }
   0xc   :  { %11 = vsyncpa [#allocation3], 0  ;;  %v69_v18 = vsel %vm44_vm0, %v2493_v16, 0.0  ;;  %v72_v19 = vsel %vm44_vm0, %v2498_v17, 0.0  ;;  %v2507_v20 = vld [vmem:[%s3950_s0 + $0x50] sm:$0xff]  ;;  %v2512_v21 = vld [vmem:[%s3950_s0 + $0x58] sm:$0xff] }
   0xd   :  { %v75_v22 = vsel %vm44_vm0, %v2507_v20, 0.0  ;;  %v78_v23 = vsel %vm44_vm0, %v2512_v21, 0.0  ;;  %v2521_v24 = vld [vmem:[%s3950_s0 + $0x60] sm:$0xff]  ;;  %v2526_v25 = vld [vmem:[%s3950_s0 + $0x68] sm:$0xff]  ;;  %v2535_v28 = vld [vmem:[%s3950_s0 + $0x70] sm:$0xff] }
   0xe   :  { %v81_v26 = vsel %vm44_vm0, %v2521_v24, 0.0  ;;  %v84_v27 = vsel %vm44_vm0, %v2526_v25, 0.0  ;;  %v2540_v29 = vld [vmem:[%s3950_s0 + $0x78] sm:$0xff]  ;;  %v87_v30 = vsel %vm44_vm0, %v2535_v28, 0.0 }
   0xf   :  { %64 = vadd.xlane.f32.xlu0 %v63_v14  ;;  %67 = vadd.xlane.f32.xlu1 %v66_v15  ;;  %v90_v31 = vsel %vm44_vm0, %v2540_v29, 0.0 }
  0x13   :  { %70 = vadd.xlane.f32.xlu0 %v69_v18  ;;  %73 = vadd.xlane.f32.xlu1 %v72_v19 }
  0x17   :  { %76 = vadd.xlane.f32.xlu0 %v75_v22  ;;  %79 = vadd.xlane.f32.xlu1 %v78_v23 }
  0x1b   :  { %82 = vadd.xlane.f32.xlu0 %v81_v26  ;;  %85 = vadd.xlane.f32.xlu1 %v84_v27 }
  0x1f   :  { %88 = vadd.xlane.f32.xlu0 %v87_v30  ;;  %91 = vadd.xlane.f32.xlu1 %v90_v31 }
  0x90   :  { %v47_v32 = vpop.xlane.xlu0 %46  ;;  %v53_v33 = vpop.xlane.xlu1 %52 }
  0x91   :  { %v94_v34 = vmul.f32 0.03125, %v47_v32  ;;  %v96_v35 = vmul.f32 0.03125, %v53_v33 }
  0x93   :  { %v2547_v36 = vsub.f32 %v2443_v0, %v94_v34  ;;  %v2549_v37 = vsub.f32 %v27_v1, %v96_v35 }
  0x94   :  { %v50_v38 = vpop.xlane.xlu0 %49  ;;  %v56_v39 = vpop.xlane.xlu1 %55 }
  0x95   :  { %v95_v40 = vmul.f32 0.03125, %v50_v38  ;;  %v97_v41 = vmul.f32 0.03125, %v56_v39  ;;  %v126_v42 = vmul.f32 %v2547_v36, %v2547_v36  ;;  %v128_v43 = vmul.f32 %v2549_v37, %v2549_v37 }
  0x97   :  { %v2556_v44 = vsub.f32 %v2451_v2, %v95_v40  ;;  %v2558_v45 = vsub.f32 %v28_v5, %v97_v41  ;;  %v142_v46 = vsel %vm44_vm0, %v126_v42, 0.0  ;;  %v148_v49 = vsel %vm44_vm0, %v128_v43, 0.0 }
  0x98   :  { %143 = vadd.xlane.f32.xlu0 %v142_v46  ;;  %v59_v47 = vpop.xlane.xlu0 %58  ;;  %v62_v48 = vpop.xlane.xlu1 %61 }
  0x99   :  { %v98_v50 = vmul.f32 0.03125, %v59_v47  ;;  %v99_v51 = vmul.f32 0.03125, %v62_v48  ;;  %v127_v52 = vmul.f32 %v2556_v44, %v2556_v44  ;;  %v129_v53 = vmul.f32 %v2558_v45, %v2558_v45 }
  0x9b   :  { %v2567_v54 = vsub.f32 %v2462_v6, %v98_v50  ;;  %v2570_v55 = vsub.f32 %v2467_v7, %v99_v51  ;;  %v145_v56 = vsel %vm44_vm0, %v127_v52, 0.0  ;;  %v151_v59 = vsel %vm44_vm0, %v129_v53, 0.0 }
  0x9c   :  { %149 = vadd.xlane.f32.xlu0 %v148_v49  ;;  %146 = vadd.xlane.f32.xlu1 %v145_v56  ;;  %v65_v57 = vpop.xlane.xlu0 %64  ;;  %v68_v58 = vpop.xlane.xlu1 %67 }
  0x9d   :  { %v100_v60 = vmul.f32 0.03125, %v65_v57  ;;  %v101_v61 = vmul.f32 0.03125, %v68_v58  ;;  %v130_v62 = vmul.f32 %v2567_v54, %v2567_v54  ;;  %v131_v63 = vmul.f32 %v2570_v55, %v2570_v55 }
  0x9f   :  { %v2579_v1 = vsub.f32 %v2475_v10, %v100_v60  ;;  %v2582_v3 = vsub.f32 %v2480_v11, %v101_v61  ;;  %v154_v4 = vsel %vm44_vm0, %v130_v62, 0.0  ;;  %v157_v7 = vsel %vm44_vm0, %v131_v63, 0.0 }
  0xa0   :  { %152 = vadd.xlane.f32.xlu1 %v151_v59  ;;  %155 = vadd.xlane.f32.xlu0 %v154_v4  ;;  %v71_v5 = vpop.xlane.xlu0 %70  ;;  %v74_v6 = vpop.xlane.xlu1 %73 }
  0xa1   :  { %v102_v8 = vmul.f32 0.03125, %v71_v5  ;;  %v103_v9 = vmul.f32 0.03125, %v74_v6  ;;  %v132_v12 = vmul.f32 %v2579_v1, %v2579_v1  ;;  %v133_v10 = vmul.f32 %v2582_v3, %v2582_v3 }
  0xa3   :  { %v2591_v13 = vsub.f32 %v2493_v16, %v102_v8  ;;  %v2594_v11 = vsub.f32 %v2498_v17, %v103_v9  ;;  %v160_v14 = vsel %vm44_vm0, %v132_v12, 0.0  ;;  %v163_v19 = vsel %vm44_vm0, %v133_v10, 0.0  ;;  %v2646_v8 = vld [vmem:[%s3951_s1 + $0x8] sm:$0xff] }
  0xa4   :  { %158 = vadd.xlane.f32.xlu1 %v157_v7  ;;  %161 = vadd.xlane.f32.xlu0 %v160_v14  ;;  %v77_v15 = vpop.xlane.xlu0 %76  ;;  %v80_v18 = vpop.xlane.xlu1 %79  ;;  %v41_v7 = vld [vmem:[%s3951_s1] sm:$0xff]  ;;  %v2651_v14 = vld [vmem:[%s3951_s1 + $0x10] sm:$0xff] }
  0xa5   :  { %v104_v22 = vmul.f32 0.03125, %v77_v15  ;;  %v105_v23 = vmul.f32 0.03125, %v80_v18  ;;  %v134_v26 = vmul.f32 %v2591_v13, %v2591_v13  ;;  %v135_v16 = vmul.f32 %v2594_v11, %v2594_v11 }
  0xa7   :  { %v2603_v27 = vsub.f32 %v2507_v20, %v104_v22  ;;  %v2606_v17 = vsub.f32 %v2512_v21, %v105_v23  ;;  %v166_v30 = vsel %vm44_vm0, %v134_v26, 0.0  ;;  %v169_v33 = vsel %vm44_vm0, %v135_v16, 0.0 }
  0xa8   :  { %164 = vadd.xlane.f32.xlu1 %v163_v19  ;;  %167 = vadd.xlane.f32.xlu0 %v166_v30  ;;  %v83_v31 = vpop.xlane.xlu0 %82  ;;  %v86_v32 = vpop.xlane.xlu1 %85  ;;  %v326_v22 = vadd.f32 %v2646_v8, %v41_v7 }
  0xa9   :  { %v106_v34 = vmul.f32 0.03125, %v83_v31  ;;  %v107_v35 = vmul.f32 0.03125, %v86_v32  ;;  %v136_v38 = vmul.f32 %v2603_v27, %v2603_v27  ;;  %v137_v20 = vmul.f32 %v2606_v17, %v2606_v17 }
  0xab   :  { %v2615_v39 = vsub.f32 %v2521_v24, %v106_v34  ;;  %v2618_v21 = vsub.f32 %v2526_v25, %v107_v35  ;;  %v172_v40 = vsel %vm44_vm0, %v136_v38, 0.0  ;;  %v175_v43 = vsel %vm44_vm0, %v137_v20, 0.0 }
  0xac   :  { %170 = vadd.xlane.f32.xlu1 %v169_v33  ;;  %173 = vadd.xlane.f32.xlu0 %v172_v40  ;;  %v89_v41 = vpop.xlane.xlu0 %88  ;;  %v92_v42 = vpop.xlane.xlu1 %91 }
  0xad   :  { %v108_v46 = vmul.f32 0.03125, %v89_v41  ;;  %v109_v47 = vmul.f32 0.03125, %v92_v42  ;;  %v138_v48 = vmul.f32 %v2615_v39, %v2615_v39  ;;  %v139_v24 = vmul.f32 %v2618_v21, %v2618_v21 }
  0xaf   :  { %v2627_v49 = vsub.f32 %v2535_v28, %v108_v46  ;;  %v2630_v25 = vsub.f32 %v2540_v29, %v109_v47  ;;  %v178_v50 = vsel %vm44_vm0, %v138_v48, 0.0  ;;  %v181_v51 = vsel %vm44_vm0, %v139_v24, 0.0 }
  0xb0   :  { %176 = vadd.xlane.f32.xlu1 %v175_v43  ;;  %179 = vadd.xlane.f32.xlu0 %v178_v50  ;;  %v254_v29 = vlaneseq }
  0xb1   :  { %v140_v52 = vmul.f32 %v2627_v49, %v2627_v49  ;;  %v141_v53 = vmul.f32 %v2630_v25, %v2630_v25 }
  0xb2   :  { %v255_v60 = vshrl.u32 %v254_v29, 7 }
  0xb3   :  { %v184_v56 = vsel %vm44_vm0, %v140_v52, 0.0  ;;  %v187_v28 = vsel %vm44_vm0, %v141_v53, 0.0 }
  0xb4   :  { %182 = vadd.xlane.f32.xlu1 %v181_v51  ;;  %185 = vadd.xlane.f32.xlu0 %v184_v56  ;;  %v256_v9 = vsub.s32 0, %v255_v60  ;;  %v276_v19 = vsub.s32 1, %v255_v60  ;;  %v2657_v32 = vsub.s32 2, %v255_v60  ;;  %v2659_v33 = vsub.s32 3, %v255_v60 }
  0xb5   :  { %v2661_v34 = vsub.s32 4, %v255_v60  ;;  %v2663_v20 = vsub.s32 5, %v255_v60  ;;  %v2668_v41 = vsub.s32 6, %v255_v60  ;;  %v2670_v42 = vsub.s32 7, %v255_v60 }
  0xb6   :  { %v2655_v16 = vrot.slane %v2651_v14, %v256_v9  ;;  %3961 = vst [vmem:[#allocation5_spill] sm:$0xff] %v2657_v32  ;;  %3962 = vst [vmem:[#allocation6_spill] sm:$0xff] %v2659_v33  ;;  %v2666_v40 = vrot.slane %v2651_v14, %v276_v19  ;;  %v2672_v46 = vrot.slane %v326_v22, %v256_v9 }
  0xb7   :  { %3963 = vst [vmem:[#allocation7_spill] sm:$0xff] %v2663_v20  ;;  %3964 = vst [vmem:[#allocation8_spill] sm:$0xff] %v2670_v42  ;;  %v2674_v47 = vrot.slane %v41_v7, %v276_v19  ;;  %v2678_v53 = vrot.slane %v41_v7, %v2657_v32  ;;  %v2681_v56 = vrot.slane %v41_v7, %v2659_v33 }
  0xb8   :  { %188 = vadd.xlane.f32.xlu1 %v187_v28  ;;  %v2684_v28 = vrot.slane %v41_v7, %v2661_v34  ;;  %v2694_v60 = vrot.slane %v41_v7, %v2670_v42  ;;  %v2714_v22 = vrot.slane %v2646_v8, %v2661_v34 }
 0x125   :  { %v144_v57 = vpop.xlane.xlu0 %143 }
 0x126   :  { %v190_v58 = vmul.f32 0.03125, %v144_v57 }
 0x128   :  { %v206_v59 = vadd.f32 1e-06, %v190_v58  ;;  %v2687_v58 = vrot.slane %v41_v7, %v2663_v20 }
 0x129   :  { %v147_v61 = vpop.xlane.xlu1 %146  ;;  %v150_v62 = vpop.xlane.xlu0 %149 }
 0x12a   :  { %2234 = vrsqrt.f32 %v206_v59  ;;  %v191_v63 = vmul.f32 0.03125, %v147_v61  ;;  %v192_v4 = vmul.f32 0.03125, %v150_v62  ;;  %v294_v62 = vld [vmem:[%s3952_s2] sm:$0xff] }
 0x12c   :  { %v207_v5 = vadd.f32 1e-06, %v191_v63  ;;  %v208_v6 = vadd.f32 1e-06, %v192_v4 }
 0x12d   :  { %v153_v12 = vpop.xlane.xlu1 %152  ;;  %v156_v10 = vpop.xlane.xlu0 %155 }
 0x12e   :  { %2236 = vrsqrt.f32 %v207_v5  ;;  %v193_v15 = vmul.f32 0.03125, %v153_v12  ;;  %v194_v18 = vmul.f32 0.03125, %v156_v10  ;;  %v2700_v5 = vrot.slane %v2646_v8, %v276_v19 }
 0x12f   :  { %2238 = vrsqrt.f32 %v208_v6  ;;  %v2704_v6 = vrot.slane %v2646_v8, %v2657_v32 }
 0x130   :  { %v209_v23 = vadd.f32 1e-06, %v193_v15  ;;  %v210_v26 = vadd.f32 1e-06, %v194_v18  ;;  %v2710_v18 = vrot.slane %v2646_v8, %v2659_v33 }
 0x131   :  { %v159_v30 = vpop.xlane.xlu1 %158  ;;  %v162_v31 = vpop.xlane.xlu0 %161 }
 0x132   :  { %2240 = vrsqrt.f32 %v209_v23  ;;  %v195_v35 = vmul.f32 0.03125, %v159_v30  ;;  %v196_v38 = vmul.f32 0.03125, %v162_v31 }
 0x133   :  { %2242 = vrsqrt.f32 %v210_v26 }
 0x134   :  { %v2235_v43 = vpop.eup %2234  ;;  %v211_v48 = vadd.f32 1e-06, %v195_v35  ;;  %v212_v24 = vadd.f32 1e-06, %v196_v38  ;;  %v295_v38 = vld [vmem:[%s3952_s2 + $0x8] sm:$0xff] }
 0x135   :  { %v238_v50 = vmul.f32 %v2235_v43, %v2547_v36  ;;  %v165_v51 = vpop.xlane.xlu1 %164  ;;  %v168_v52 = vpop.xlane.xlu0 %167  ;;  %v2691_v36 = vrot.slane %v41_v7, %v2668_v41 }
 0x136   :  { %2244 = vrsqrt.f32 %v211_v48  ;;  %v197_v29 = vmul.f32 0.03125, %v165_v51  ;;  %v198_v57 = vmul.f32 0.03125, %v168_v52  ;;  %v296_v52 = vld [vmem:[%s3952_s2 + $0x10] sm:$0xff] }
 0x137   :  { %v258_v59 = vmul.f32 %v2655_v16, %v238_v50  ;;  %2246 = vrsqrt.f32 %v212_v24  ;;  %v2730_v24 = vrot.slane %v2646_v8, %v2668_v41 }
 0x138   :  { %v2237_v61 = vpop.eup %2236  ;;  %v213_v63 = vadd.f32 1e-06, %v197_v29  ;;  %v214_v4 = vadd.f32 1e-06, %v198_v57 }
 0x139   :  { %v2239_v9 = vpop.eup %2238  ;;  %v278_v12 = vadd.f32 %v2666_v40, %v258_v59  ;;  %v239_v7 = vmul.f32 %v2237_v61, %v2556_v44  ;;  %v171_v10 = vpop.xlane.xlu1 %170  ;;  %v2722_v44 = vrot.slane %v2646_v8, %v2663_v20 }
 0x13a   :  { %v174_v15 = vpop.xlane.xlu0 %173  ;;  %v240_v19 = vmul.f32 %v2239_v9, %v2549_v37  ;;  %2248 = vrsqrt.f32 %v213_v63  ;;  %v199_v23 = vmul.f32 0.03125, %v171_v10 }
 0x13b   :  { %v200_v26 = vmul.f32 0.03125, %v174_v15  ;;  %v2717_v30 = vadd.f32 %v294_v62, %v278_v12  ;;  %v259_v31 = vmul.f32 %v2655_v16, %v239_v7  ;;  %2250 = vrsqrt.f32 %v214_v4 }
 0x13c   :  { %v2241_v35 = vpop.eup %2240  ;;  %v260_v43 = vmul.f32 %v2655_v16, %v240_v19  ;;  %v215_v37 = vadd.f32 1e-06, %v199_v23  ;;  %v2741_v62 = vrot.slane %v2646_v8, %v2670_v42  ;;  %v297_v8 = vld [vmem:[%s3952_s2 + $0x18] sm:$0xff] }
 0x13d   :  { %v216_v48 = vadd.f32 1e-06, %v200_v26  ;;  %v2243_v50 = vpop.eup %2242  ;;  %v279_v51 = vadd.f32 %v2666_v40, %v259_v31  ;;  %v241_v29 = vmul.f32 %v2241_v35, %v2558_v45  ;;  %v177_v57 = vpop.xlane.xlu1 %176  ;;  %v331_v61 = vmul.f32 %v2672_v46, %v2717_v30  ;;  %v298_v35 = vld [vmem:[%s3952_s2 + $0x20] sm:$0xff] }
 0x13e   :  { %v180_v59 = vpop.xlane.xlu0 %179  ;;  %v280_v63 = vadd.f32 %v2666_v40, %v260_v43  ;;  %v242_v4 = vmul.f32 %v2243_v50, %v2567_v54  ;;  %2252 = vrsqrt.f32 %v215_v37  ;;  %v201_v9 = vmul.f32 0.03125, %v177_v57 }
 0x13f   :  { %v2745_v12 = vadd.f32 %v295_v38, %v279_v51  ;;  %v261_v7 = vmul.f32 %v2655_v16, %v241_v29  ;;  %2254 = vrsqrt.f32 %v216_v48  ;;  %v202_v45 = vmul.f32 0.03125, %v180_v59 }
 0x140   :  { %v2245_v10 = vpop.eup %2244  ;;  %v2748_v15 = vadd.f32 %v296_v52, %v280_v63  ;;  %v262_v19 = vmul.f32 %v2655_v16, %v242_v4  ;;  %v217_v23 = vadd.f32 1e-06, %v201_v9  ;;  %v599_v54 = vrot.slane %v2717_v30, 1  ;;  %v299_v9 = vld [vmem:[%s3952_s2 + $0x28] sm:$0xff] }
 0x141   :  { %v2247_v26 = vpop.eup %2246  ;;  %v281_v31 = vadd.f32 %v2666_v40, %v261_v7  ;;  %v243_v38 = vmul.f32 %v2245_v10, %v2570_v55  ;;  %v218_v43 = vadd.f32 1e-06, %v202_v45  ;;  %v183_v37 = vpop.xlane.xlu1 %182  ;;  %v351_v50 = vmul.f32 %v2674_v47, %v2745_v12 }
 0x142   :  { %v186_v48 = vpop.xlane.xlu0 %185  ;;  %v282_v51 = vadd.f32 %v2666_v40, %v262_v19  ;;  %v244_v52 = vmul.f32 %v2247_v26, %v2579_v1  ;;  %2256 = vrsqrt.f32 %v217_v23  ;;  %v203_v29 = vmul.f32 0.03125, %v183_v37 }
 0x143   :  { %v2764_v57 = vadd.f32 %v297_v8, %v281_v31  ;;  %v263_v59 = vmul.f32 %v2655_v16, %v243_v38  ;;  %2258 = vrsqrt.f32 %v218_v43  ;;  %v204_v63 = vmul.f32 0.03125, %v186_v48  ;;  %v300_v8 = vld [vmem:[%s3952_s2 + $0x30] sm:$0xff] }
 0x144   :  { %v2249_v4 = vpop.eup %2248  ;;  %v2767_v55 = vadd.f32 %v298_v35, %v282_v51  ;;  %v264_v7 = vmul.f32 %v2655_v16, %v244_v52  ;;  %v219_v45 = vadd.f32 1e-06, %v203_v29  ;;  %v367_v10 = vadd.f32 %v351_v50, %v331_v61 }
 0x145   :  { %v2251_v1 = vpop.eup %2250  ;;  %v283_v19 = vadd.f32 %v2666_v40, %v263_v59  ;;  %v245_v23 = vmul.f32 %v2249_v4, %v2582_v3  ;;  %v220_v26 = vadd.f32 1e-06, %v204_v63  ;;  %v189_v31 = vpop.xlane.xlu1 %188  ;;  %v387_v35 = vmul.f32 %v2678_v53, %v2748_v15 }
 0x146   :  { %v284_v38 = vadd.f32 %v2666_v40, %v264_v7  ;;  %v246_v43 = vmul.f32 %v2251_v1, %v2591_v13  ;;  %2260 = vrsqrt.f32 %v219_v45  ;;  %v205_v61 = vmul.f32 0.03125, %v189_v31  ;;  %v301_v13 = vld [vmem:[%s3952_s2 + $0x38] sm:$0xff] }
 0x147   :  { %v2782_v37 = vadd.f32 %v299_v9, %v283_v19  ;;  %v265_v48 = vmul.f32 %v2655_v16, %v245_v23  ;;  %2262 = vrsqrt.f32 %v220_v26  ;;  %v403_v50 = vadd.f32 %v387_v35, %v367_v10 }
 0x148   :  { %v2253_v51 = vpop.eup %2252  ;;  %v2785_v52 = vadd.f32 %v300_v8, %v284_v38  ;;  %v266_v3 = vmul.f32 %v2655_v16, %v246_v43  ;;  %v221_v29 = vadd.f32 1e-06, %v205_v61  ;;  %v423_v59 = vmul.f32 %v2681_v56, %v2764_v57 }
 0x149   :  { %v2255_v63 = vpop.eup %2254  ;;  %v285_v4 = vadd.f32 %v2666_v40, %v265_v48  ;;  %v247_v9 = vmul.f32 %v2253_v51, %v2594_v11  ;;  %v459_v7 = vmul.f32 %v2684_v28, %v2767_v55  ;;  %v495_v45 = vmul.f32 %v2687_v58, %v2782_v37  ;;  %v302_v48 = vld [vmem:[%s3952_s2 + $0x40] sm:$0xff] }
 0x14a   :  { %v286_v10 = vadd.f32 %v2666_v40, %v266_v3  ;;  %v248_v1 = vmul.f32 %v2255_v63, %v2603_v27  ;;  %2264 = vrsqrt.f32 %v221_v29  ;;  %v439_v19 = vadd.f32 %v423_v59, %v403_v50 }
 0x14b   :  { %v267_v8 = vmul.f32 %v2655_v16, %v247_v9  ;;  %v604_v23 = vmul.f32 %v2700_v5, %v599_v54  ;;  %v606_v26 = vrot.slane %v2717_v30, 2  ;;  %v2806_v11 = vrot.slane %v2651_v14, %v2668_v41 }
 0x14c   :  { %v2257_v31 = vpop.eup %2256  ;;  %v2808_v35 = vadd.f32 %v301_v13, %v285_v4  ;;  %v268_v38 = vmul.f32 %v2655_v16, %v248_v1  ;;  %v475_v43 = vadd.f32 %v459_v7, %v439_v19  ;;  %v613_v27 = vrot.slane %v2717_v30, 3  ;;  %v303_v13 = vld [vmem:[%s3952_s2 + $0x48] sm:$0xff] }
 0x14d   :  { %v2259_v61 = vpop.eup %2258  ;;  %v287_v54 = vadd.f32 %v2666_v40, %v267_v8  ;;  %v249_v50 = vmul.f32 %v2257_v31, %v2606_v17  ;;  %v611_v41 = vmul.f32 %v2704_v6, %v606_v26  ;;  %v2820_v51 = vrot.slane %v2651_v14, %v2661_v34  ;;  %v304_v8 = vld [vmem:[%s3952_s2 + $0x50] sm:$0xff] }
 0x14e   :  { %v288_v3 = vadd.f32 %v2666_v40, %v268_v38  ;;  %v250_v29 = vmul.f32 %v2259_v61, %v2615_v39  ;;  %v511_v59 = vadd.f32 %v495_v45, %v475_v43  ;;  %v531_v63 = vmul.f32 %v2691_v36, %v2785_v52 }
 0x14f   :  { %v269_v17 = vmul.f32 %v2655_v16, %v249_v50  ;;  %v612_v4 = vadd.f32 %v611_v41, %v604_v23  ;;  %v618_v9 = vmul.f32 %v2710_v18, %v613_v27  ;;  %v620_v14 = vrot.slane %v2717_v30, 4 }
 0x150   :  { %v2261_v34 = vpop.eup %2260  ;;  %v2832_v7 = vadd.f32 %v302_v48, %v286_v10  ;;  %v270_v39 = vmul.f32 %v2655_v16, %v250_v29  ;;  %v567_v45 = vmul.f32 %v2694_v60, %v2808_v35  ;;  %v627_v1 = vrot.slane %v2717_v30, 5 }
 0x151   :  { %v2263_v19 = vpop.eup %2262  ;;  %v289_v23 = vadd.f32 %v2666_v40, %v269_v17  ;;  %v251_v26 = vmul.f32 %v2261_v34, %v2618_v21  ;;  %v619_v31 = vadd.f32 %v618_v9, %v612_v4  ;;  %v625_v10 = vmul.f32 %v2714_v22, %v620_v14  ;;  %v305_v21 = vld [vmem:[%s3952_s2 + $0x58] sm:$0xff]  ;;  %v308_v34 = vld [vmem:[%s3952_s2 + $0x70] sm:$0xff] }
 0x152   :  { %v2844_v38 = vadd.f32 %v303_v13, %v287_v54  ;;  %v290_v43 = vadd.f32 %v2666_v40, %v270_v39  ;;  %v252_v27 = vmul.f32 %v2263_v19, %v2627_v49  ;;  %v547_v61 = vadd.f32 %v531_v63, %v511_v59  ;;  %v306_v59 = vld [vmem:[%s3952_s2 + $0x60] sm:$0xff] }
 0x153   :  { %v271_v48 = vmul.f32 %v2655_v16, %v251_v26  ;;  %v626_v50 = vadd.f32 %v625_v10, %v619_v31  ;;  %v632_v41 = vmul.f32 %v2722_v44, %v627_v1  ;;  %v634_v29 = vrot.slane %v2717_v30, 6 }
 0x154   :  { %v2265_v17 = vpop.eup %2264  ;;  %v2851_v20 = vadd.f32 %v304_v8, %v288_v3  ;;  %v272_v54 = vmul.f32 %v2655_v16, %v252_v27  ;;  %v641_v13 = vrot.slane %v2717_v30, 7  ;;  %v332_v49 = vmul.f32 %v2672_v46, %v2745_v12  ;;  %v307_v3 = vld [vmem:[%s3952_s2 + $0x68] sm:$0xff] }
 0x155   :  { %v291_v63 = vadd.f32 %v2666_v40, %v271_v48  ;;  %v253_v4 = vmul.f32 %v2265_v17, %v2630_v25  ;;  %v633_v9 = vadd.f32 %v632_v41, %v626_v50  ;;  %v639_v14 = vmul.f32 %v2730_v24, %v634_v29 }
 0x156   :  { %v292_v39 = vadd.f32 %v2666_v40, %v272_v54  ;;  %v583_v1 = vadd.f32 %v567_v45, %v547_v61  ;;  %v352_v19 = vmul.f32 %v2674_v47, %v2748_v15  ;;  %v388_v8 = vmul.f32 %v2678_v53, %v2764_v57 }
 0x157   :  { %v2877_v26 = vadd.f32 %v305_v21, %v289_v23  ;;  %v273_v25 = vmul.f32 %v2655_v16, %v253_v4  ;;  %v640_v31 = vadd.f32 %v639_v14, %v633_v9  ;;  %v646_v10 = vmul.f32 %v2741_v62, %v641_v13  ;;  %v309_v16 = vld [vmem:[%s3952_s2 + $0x78] sm:$0xff] }
 0x158   :  { %v2881_v27 = vadd.f32 %v306_v59, %v290_v43  ;;  %v2883_v48 = vadd.f32 %v307_v3, %v291_v63  ;;  %v368_v50 = vadd.f32 %v352_v19, %v332_v49  ;;  %v424_v45 = vmul.f32 %v2681_v56, %v2767_v55 }
 0x159   :  { %v2887_v61 = vadd.f32 %v308_v34, %v292_v39  ;;  %v293_v41 = vadd.f32 %v2666_v40, %v273_v25  ;;  %v647_v29 = vadd.f32 %v646_v10, %v640_v31  ;;  %v460_v23 = vmul.f32 %v2684_v28, %v2782_v37 }
 0x15a   :  { %v404_v43 = vadd.f32 %v388_v8, %v368_v50  ;;  %v648_v17 = vrot.slane %v2745_v12, 1  ;;  %v651_v21 = vrot.slane %v2745_v12, 2  ;;  %v654_v54 = vrot.slane %v2745_v12, 3 }
 0x15b   :  { %v963_v13 = vadd.f32 %v647_v29, %v583_v1  ;;  %v496_v49 = vmul.f32 %v2687_v58, %v2785_v52  ;;  %v532_v40 = vmul.f32 %v2691_v36, %v2808_v35  ;;  %v657_v59 = vrot.slane %v2745_v12, 4 }
 0x15c   :  { %v440_v3 = vadd.f32 %v424_v45, %v404_v43  ;;  %v649_v63 = vmul.f32 %v648_v17, %v2700_v5  ;;  %v652_v4 = vmul.f32 %v651_v21, %v2704_v6  ;;  %v660_v9 = vrot.slane %v2745_v12, 5 }
 0x15d   :  { %v2906_v14 = vadd.f32 %v309_v16, %v293_v41  ;;  %v983_v34 = vadd.f32 %v2806_v11, %v963_v13  ;;  %v568_v39 = vmul.f32 %v2694_v60, %v2717_v30  ;;  %v663_v1 = vrot.slane %v2745_v12, 6 }
 0x15e   :  { %v476_v19 = vadd.f32 %v460_v23, %v440_v3  ;;  %v653_v8 = vadd.f32 %v652_v4, %v649_v63  ;;  %v655_v25 = vmul.f32 %v654_v54, %v2710_v18  ;;  %v666_v31 = vrot.slane %v2745_v12, 7 }
 0x15f   :  { %v1003_v10 = vmul.f32 %v2820_v51, %v983_v34  ;;  %v658_v50 = vmul.f32 %v657_v59, %v2714_v22  ;;  %v333_v45 = vmul.f32 %v2672_v46, %v2748_v15  ;;  %v353_v41 = vmul.f32 %v2674_v47, %v2764_v57 }
 0x160   :  { %v512_v29 = vadd.f32 %v496_v49, %v476_v19  ;;  %v656_v16 = vadd.f32 %v655_v25, %v653_v8  ;;  %v661_v43 = vmul.f32 %v660_v9, %v2722_v44  ;;  %v664_v23 = vmul.f32 %v663_v1, %v2730_v24 }
 0x161   :  { %v2923_v17 = vadd.f32 %v1003_v10, %v2443_v0  ;;  %v369_v21 = vadd.f32 %v353_v41, %v333_v45  ;;  %v389_v54 = vmul.f32 %v2678_v53, %v2767_v55  ;;  %v425_v13 = vmul.f32 %v2681_v56, %v2782_v37 }
 0x162   :  { %v548_v59 = vadd.f32 %v532_v40, %v512_v29  ;;  %v659_v3 = vadd.f32 %v658_v50, %v656_v16  ;;  %v667_v63 = vmul.f32 %v666_v31, %v2741_v62  ;;  %v461_v49 = vmul.f32 %v2684_v28, %v2785_v52 }
 0x163   :  { %v1035_v4 = vsel %vm44_vm0, %v2923_v17, 0.0  ;;  %v405_v9 = vadd.f32 %v389_v54, %v369_v21  ;;  %v669_v0 = vrot.slane %v2748_v15, 1  ;;  %v672_v34 = vrot.slane %v2748_v15, 2 }
 0x164   :  { %1036 = vadd.xlane.f32.xlu0 %v1035_v4  ;;  %v662_v1 = vadd.f32 %v661_v43, %v659_v3  ;;  %v497_v19 = vmul.f32 %v2687_v58, %v2808_v35  ;;  %v533_v40 = vmul.f32 %v2691_v36, %v2717_v30  ;;  %v675_v8 = vrot.slane %v2748_v15, 3 }
 0x165   :  { %v441_v25 = vadd.f32 %v425_v13, %v405_v9  ;;  %v670_v31 = vmul.f32 %v669_v0, %v2700_v5  ;;  %v673_v10 = vmul.f32 %v672_v34, %v2704_v6  ;;  %v678_v50 = vrot.slane %v2748_v15, 4 }
 0x166   :  { %v584_v45 = vadd.f32 %v568_v39, %v548_v59  ;;  %v665_v41 = vadd.f32 %v664_v23, %v662_v1  ;;  %v681_v29 = vrot.slane %v2748_v15, 5  ;;  %v684_v16 = vrot.slane %v2748_v15, 6 }
 0x167   :  { %v477_v43 = vadd.f32 %v461_v49, %v441_v25  ;;  %v674_v21 = vadd.f32 %v673_v10, %v670_v31  ;;  %v676_v54 = vmul.f32 %v675_v8, %v2710_v18  ;;  %v687_v3 = vrot.slane %v2748_v15, 7 }
 0x168   :  { %v668_v4 = vadd.f32 %v667_v63, %v665_v41  ;;  %v569_v13 = vmul.f32 %v2694_v60, %v2745_v12  ;;  %v334_v9 = vmul.f32 %v2672_v46, %v2764_v57  ;;  %v354_v39 = vmul.f32 %v2674_v47, %v2767_v55 }
 0x169   :  { %v513_v23 = vadd.f32 %v497_v19, %v477_v43  ;;  %v677_v59 = vadd.f32 %v676_v54, %v674_v21  ;;  %v679_v0 = vmul.f32 %v678_v50, %v2714_v22  ;;  %v390_v49 = vmul.f32 %v2678_v53, %v2782_v37 }
 0x16a   :  { %v964_v34 = vadd.f32 %v668_v4, %v584_v45  ;;  %v682_v1 = vmul.f32 %v681_v29, %v2722_v44  ;;  %v685_v63 = vmul.f32 %v684_v16, %v2730_v24  ;;  %v370_v8 = vadd.f32 %v354_v39, %v334_v9 }
 0x16b   :  { %v549_v25 = vadd.f32 %v533_v40, %v513_v23  ;;  %v680_v31 = vadd.f32 %v679_v0, %v677_v59  ;;  %v688_v10 = vmul.f32 %v687_v3, %v2741_v62  ;;  %v426_v41 = vmul.f32 %v2681_v56, %v2785_v52 }
 0x16c   :  { %v984_v19 = vadd.f32 %v2806_v11, %v964_v34  ;;  %v406_v43 = vadd.f32 %v390_v49, %v370_v8  ;;  %v462_v50 = vmul.f32 %v2684_v28, %v2808_v35  ;;  %v690_v45 = vrot.slane %v2764_v57, 1 }
 0x16d   :  { %v683_v21 = vadd.f32 %v682_v1, %v680_v31  ;;  %v498_v29 = vmul.f32 %v2687_v58, %v2717_v30  ;;  %v693_v40 = vrot.slane %v2764_v57, 2  ;;  %v696_v16 = vrot.slane %v2764_v57, 3 }
 0x16e   :  { %v1004_v54 = vmul.f32 %v2820_v51, %v984_v19  ;;  %v442_v3 = vadd.f32 %v426_v41, %v406_v43  ;;  %v691_v4 = vmul.f32 %v690_v45, %v2700_v5  ;;  %v699_v9 = vrot.slane %v2764_v57, 4 }
 0x16f   :  { %v585_v39 = vadd.f32 %v569_v13, %v549_v25  ;;  %v686_v23 = vadd.f32 %v685_v63, %v683_v21  ;;  %v534_v59 = vmul.f32 %v2691_v36, %v2745_v12  ;;  %v694_v0 = vmul.f32 %v693_v40, %v2704_v6 }
 0x170   :  { %v2977_v49 = vadd.f32 %v1004_v54, %v2451_v2  ;;  %v478_v34 = vadd.f32 %v462_v50, %v442_v3  ;;  %v702_v1 = vrot.slane %v2764_v57, 5  ;;  %v705_v8 = vrot.slane %v2764_v57, 6 }
 0x171   :  { %v689_v31 = vadd.f32 %v688_v10, %v686_v23  ;;  %v570_v41 = vmul.f32 %v2694_v60, %v2748_v15  ;;  %v695_v19 = vadd.f32 %v694_v0, %v691_v4  ;;  %v697_v13 = vmul.f32 %v696_v16, %v2710_v18 }
 0x172   :  { %v1038_v63 = vsel %vm44_vm0, %v2977_v49, 0.0  ;;  %v514_v25 = vadd.f32 %v498_v29, %v478_v34  ;;  %v700_v43 = vmul.f32 %v699_v9, %v2714_v22  ;;  %v708_v2 = vrot.slane %v2764_v57, 7 }
 0x173   :  { %1039 = vadd.xlane.f32.xlu1 %v1038_v63  ;;  %v965_v50 = vadd.f32 %v689_v31, %v585_v39  ;;  %v698_v45 = vadd.f32 %v697_v13, %v695_v19  ;;  %v335_v10 = vmul.f32 %v2672_v46, %v2767_v55  ;;  %v355_v21 = vmul.f32 %v2674_v47, %v2782_v37 }
 0x174   :  { %v550_v40 = vadd.f32 %v534_v59, %v514_v25  ;;  %v703_v16 = vmul.f32 %v702_v1, %v2722_v44  ;;  %v706_v54 = vmul.f32 %v705_v8, %v2730_v24  ;;  %v391_v29 = vmul.f32 %v2678_v53, %v2785_v52 }
 0x175   :  { %v985_v3 = vadd.f32 %v2806_v11, %v965_v50  ;;  %v701_v4 = vadd.f32 %v700_v43, %v698_v45  ;;  %v371_v9 = vadd.f32 %v355_v21, %v335_v10  ;;  %v427_v39 = vmul.f32 %v2681_v56, %v2808_v35 }
 0x176   :  { %v709_v23 = vmul.f32 %v708_v2, %v2741_v62  ;;  %v463_v0 = vmul.f32 %v2684_v28, %v2717_v30  ;;  %v499_v59 = vmul.f32 %v2687_v58, %v2745_v12  ;;  %v711_v34 = vrot.slane %v2767_v55, 1  ;;  %v2362_v2 = vld [vmem:[%s3950_s0 + $0x10] sm:$0xff] }
 0x177   :  { %v1005_v1 = vmul.f32 %v2820_v51, %v985_v3  ;;  %v704_v8 = vadd.f32 %v703_v16, %v701_v4  ;;  %v407_v31 = vadd.f32 %v391_v29, %v371_v9  ;;  %v714_v19 = vrot.slane %v2767_v55, 2 }
 0x178   :  { %v586_v13 = vadd.f32 %v570_v41, %v550_v40  ;;  %v712_v63 = vmul.f32 %v711_v34, %v2700_v5  ;;  %v717_v25 = vrot.slane %v2767_v55, 3  ;;  %v720_v43 = vrot.slane %v2767_v55, 4 }
 0x179   :  { %v3013_v50 = vadd.f32 %v2362_v2, %v1005_v1  ;;  %v707_v45 = vadd.f32 %v706_v54, %v704_v8  ;;  %v443_v10 = vadd.f32 %v427_v39, %v407_v31  ;;  %v715_v21 = vmul.f32 %v714_v19, %v2704_v6 }
 0x17a   :  { %v535_v16 = vmul.f32 %v2691_v36, %v2748_v15  ;;  %v718_v41 = vmul.f32 %v717_v25, %v2710_v18  ;;  %v723_v40 = vrot.slane %v2767_v55, 5  ;;  %v726_v29 = vrot.slane %v2767_v55, 6 }
 0x17b   :  { %v1041_v3 = vsel %vm44_vm0, %v3013_v50, 0.0  ;;  %v710_v4 = vadd.f32 %v709_v23, %v707_v45  ;;  %v479_v9 = vadd.f32 %v463_v0, %v443_v10  ;;  %v716_v34 = vadd.f32 %v715_v21, %v712_v63 }
 0x17c   :  { %1042 = vadd.xlane.f32.xlu0 %v1041_v3  ;;  %v721_v54 = vmul.f32 %v720_v43, %v2714_v22  ;;  %v729_v39 = vrot.slane %v2767_v55, 7  ;;  %v336_v1 = vmul.f32 %v2672_v46, %v2782_v37  ;;  %v356_v8 = vmul.f32 %v2674_v47, %v2785_v52 }
 0x17d   :  { %v966_v31 = vadd.f32 %v710_v4, %v586_v13  ;;  %v515_v19 = vadd.f32 %v499_v59, %v479_v9  ;;  %v719_v25 = vadd.f32 %v718_v41, %v716_v34  ;;  %v392_v2 = vmul.f32 %v2678_v53, %v2808_v35 }
 0x17e   :  { %v571_v23 = vmul.f32 %v2694_v60, %v2764_v57  ;;  %v724_v0 = vmul.f32 %v723_v40, %v2722_v44  ;;  %v727_v63 = vmul.f32 %v726_v29, %v2730_v24  ;;  %v372_v43 = vadd.f32 %v356_v8, %v336_v1  ;;  %v2363_v8 = vld [vmem:[%s3950_s0 + $0x18] sm:$0xff] }
 0x17f   :  { %v986_v45 = vadd.f32 %v2806_v11, %v966_v31  ;;  %v551_v10 = vadd.f32 %v535_v16, %v515_v19  ;;  %v722_v21 = vadd.f32 %v721_v54, %v719_v25  ;;  %v730_v3 = vmul.f32 %v729_v39, %v2741_v62 }
 0x180   :  { %v408_v13 = vadd.f32 %v392_v2, %v372_v43  ;;  %v428_v59 = vmul.f32 %v2681_v56, %v2717_v30  ;;  %v464_v41 = vmul.f32 %v2684_v28, %v2745_v12  ;;  %v732_v4 = vrot.slane %v2782_v37, 1 }
 0x181   :  { %v1006_v40 = vmul.f32 %v2820_v51, %v986_v45  ;;  %v725_v9 = vadd.f32 %v724_v0, %v722_v21  ;;  %v500_v29 = vmul.f32 %v2687_v58, %v2748_v15  ;;  %v735_v16 = vrot.slane %v2782_v37, 2 }
 0x182   :  { %v444_v34 = vadd.f32 %v428_v59, %v408_v13  ;;  %v733_v54 = vmul.f32 %v732_v4, %v2700_v5  ;;  %v738_v39 = vrot.slane %v2782_v37, 3  ;;  %v741_v1 = vrot.slane %v2782_v37, 4 }
 0x183   :  { %v3052_v31 = vadd.f32 %v2363_v8, %v1006_v40  ;;  %v587_v19 = vadd.f32 %v571_v23, %v551_v10  ;;  %v728_v25 = vadd.f32 %v727_v63, %v725_v9  ;;  %v736_v2 = vmul.f32 %v735_v16, %v2704_v6 }
 0x184   :  { %v480_v0 = vadd.f32 %v464_v41, %v444_v34  ;;  %v536_v43 = vmul.f32 %v2691_v36, %v2764_v57  ;;  %v744_v45 = vrot.slane %v2782_v37, 5  ;;  %v747_v21 = vrot.slane %v2782_v37, 6 }
 0x185   :  { %v1044_v13 = vsel %vm44_vm0, %v3052_v31, 0.0  ;;  %v731_v59 = vadd.f32 %v730_v3, %v728_v25  ;;  %v737_v4 = vadd.f32 %v736_v2, %v733_v54  ;;  %v739_v40 = vmul.f32 %v738_v39, %v2710_v18 }
 0x186   :  { %1045 = vadd.xlane.f32.xlu1 %v1044_v13  ;;  %v516_v23 = vadd.f32 %v500_v29, %v480_v0  ;;  %v572_v63 = vmul.f32 %v2694_v60, %v2767_v55  ;;  %v742_v10 = vmul.f32 %v741_v1, %v2714_v22  ;;  %v750_v41 = vrot.slane %v2782_v37, 7 }
 0x187   :  { %v967_v9 = vadd.f32 %v731_v59, %v587_v19  ;;  %v740_v16 = vadd.f32 %v739_v40, %v737_v4  ;;  %v337_v34 = vmul.f32 %v2672_v46, %v2785_v52  ;;  %v357_v3 = vmul.f32 %v2674_v47, %v2808_v35 }
 0x188   :  { %v552_v54 = vadd.f32 %v536_v43, %v516_v23  ;;  %v745_v39 = vmul.f32 %v744_v45, %v2722_v44  ;;  %v748_v29 = vmul.f32 %v747_v21, %v2730_v24  ;;  %v393_v8 = vmul.f32 %v2678_v53, %v2717_v30 }
 0x189   :  { %v987_v1 = vadd.f32 %v2806_v11, %v967_v9  ;;  %v743_v25 = vadd.f32 %v742_v10, %v740_v16  ;;  %v751_v19 = vmul.f32 %v750_v41, %v2741_v62  ;;  %v373_v2 = vadd.f32 %v357_v3, %v337_v34  ;;  %v2364_v16 = vld [vmem:[%s3950_s0 + $0x20] sm:$0xff] }
 0x18a   :  { %v429_v0 = vmul.f32 %v2681_v56, %v2745_v12  ;;  %v465_v13 = vmul.f32 %v2684_v28, %v2748_v15  ;;  %v501_v43 = vmul.f32 %v2687_v58, %v2764_v57  ;;  %v753_v45 = vrot.slane %v2785_v52, 1 }
 0x18b   :  { %v1007_v21 = vmul.f32 %v2820_v51, %v987_v1  ;;  %v746_v59 = vadd.f32 %v745_v39, %v743_v25  ;;  %v409_v4 = vadd.f32 %v393_v8, %v373_v2  ;;  %v756_v40 = vrot.slane %v2785_v52, 2 }
 0x18c   :  { %v588_v23 = vadd.f32 %v572_v63, %v552_v54  ;;  %v754_v10 = vmul.f32 %v753_v45, %v2700_v5  ;;  %v759_v41 = vrot.slane %v2785_v52, 3  ;;  %v762_v9 = vrot.slane %v2785_v52, 4 }
 0x18d   :  { %v3091_v34 = vadd.f32 %v2364_v16, %v1007_v21  ;;  %v749_v3 = vadd.f32 %v748_v29, %v746_v59  ;;  %v445_v42 = vadd.f32 %v429_v0, %v409_v4  ;;  %v757_v39 = vmul.f32 %v756_v40, %v2704_v6 }
 0x18e   :  { %v537_v8 = vmul.f32 %v2691_v36, %v2767_v55  ;;  %v760_v63 = vmul.f32 %v759_v41, %v2710_v18  ;;  %v765_v54 = vrot.slane %v2785_v52, 5  ;;  %v768_v1 = vrot.slane %v2785_v52, 6 }
 0x18f   :  { %v1047_v25 = vsel %vm44_vm0, %v3091_v34, 0.0  ;;  %v752_v2 = vadd.f32 %v751_v19, %v749_v3  ;;  %v481_v45 = vadd.f32 %v465_v13, %v445_v42  ;;  %v758_v21 = vadd.f32 %v757_v39, %v754_v10 }
 0x190   :  { %1048 = vadd.xlane.f32.xlu0 %v1047_v25  ;;  %v573_v29 = vmul.f32 %v2694_v60, %v2782_v37  ;;  %v771_v0 = vrot.slane %v2785_v52, 7  ;;  %v338_v59 = vmul.f32 %v2672_v46, %v2808_v35  ;;  %v358_v4 = vmul.f32 %v2674_v47, %v2717_v30 }
 0x191   :  { %v968_v40 = vadd.f32 %v752_v2, %v588_v23  ;;  %v517_v41 = vadd.f32 %v501_v43, %v481_v45  ;;  %v761_v16 = vadd.f32 %v760_v63, %v758_v21  ;;  %v763_v33 = vmul.f32 %v762_v9, %v2714_v22 }
 0x192   :  { %v766_v42 = vmul.f32 %v765_v54, %v2722_v44  ;;  %v769_v19 = vmul.f32 %v768_v1, %v2730_v24  ;;  %v374_v13 = vadd.f32 %v358_v4, %v338_v59  ;;  %v394_v10 = vmul.f32 %v2678_v53, %v2745_v12 }
 0x193   :  { %v988_v3 = vadd.f32 %v2806_v11, %v968_v40  ;;  %v553_v39 = vadd.f32 %v537_v8, %v517_v41  ;;  %v764_v25 = vadd.f32 %v763_v33, %v761_v16  ;;  %v772_v32 = vmul.f32 %v771_v0, %v2741_v62 }
 0x194   :  { %v410_v30 = vadd.f32 %v394_v10, %v374_v13  ;;  %v430_v43 = vmul.f32 %v2681_v56, %v2748_v15  ;;  %v466_v23 = vmul.f32 %v2684_v28, %v2764_v57  ;;  %v774_v9 = vrot.slane %v2808_v35, 1  ;;  %v2365_v57 = vld [vmem:[%s3950_s0 + $0x28] sm:$0xff] }
 0x195   :  { %v1008_v63 = vmul.f32 %v2820_v51, %v988_v3  ;;  %v767_v54 = vadd.f32 %v766_v42, %v764_v25  ;;  %v502_v12 = vmul.f32 %v2687_v58, %v2767_v55  ;;  %v777_v8 = vrot.slane %v2808_v35, 2 }
 0x196   :  { %v446_v33 = vadd.f32 %v430_v43, %v410_v30  ;;  %v775_v1 = vmul.f32 %v774_v9, %v2700_v5  ;;  %v780_v2 = vrot.slane %v2808_v35, 3  ;;  %v783_v15 = vrot.slane %v2808_v35, 4 }
 0x197   :  { %v3130_v45 = vadd.f32 %v2365_v57, %v1008_v63  ;;  %v589_v21 = vadd.f32 %v573_v29, %v553_v39  ;;  %v770_v0 = vadd.f32 %v769_v19, %v767_v54  ;;  %v778_v59 = vmul.f32 %v777_v8, %v2704_v6 }
 0x198   :  { %v482_v55 = vadd.f32 %v466_v23, %v446_v33  ;;  %v538_v4 = vmul.f32 %v2691_v36, %v2782_v37  ;;  %v786_v40 = vrot.slane %v2808_v35, 5  ;;  %v789_v41 = vrot.slane %v2808_v35, 6 }
 0x199   :  { %v1050_v16 = vsel %vm44_vm0, %v3130_v45, 0.0  ;;  %v773_v42 = vadd.f32 %v772_v32, %v770_v0  ;;  %v779_v13 = vadd.f32 %v778_v59, %v775_v1  ;;  %v781_v10 = vmul.f32 %v780_v2, %v2710_v18 }
 0x19a   :  { %1051 = vadd.xlane.f32.xlu1 %v1050_v16  ;;  %v518_v29 = vadd.f32 %v502_v12, %v482_v55  ;;  %v574_v19 = vmul.f32 %v2694_v60, %v2785_v52  ;;  %v784_v3 = vmul.f32 %v783_v15, %v2714_v22  ;;  %v792_v37 = vrot.slane %v2808_v35, 7 }
 0x19b   :  { %v969_v39 = vadd.f32 %v773_v42, %v589_v21  ;;  %v782_v25 = vadd.f32 %v781_v10, %v779_v13  ;;  %v339_v30 = vmul.f32 %v2672_v46, %v2832_v7  ;;  %v359_v32 = vmul.f32 %v2674_v47, %v2844_v38 }
 0x19c   :  { %v554_v43 = vadd.f32 %v538_v4, %v518_v29  ;;  %v787_v23 = vmul.f32 %v786_v40, %v2722_v44  ;;  %v790_v9 = vmul.f32 %v789_v41, %v2730_v24  ;;  %v395_v52 = vmul.f32 %v2678_v53, %v2851_v20  ;;  %v2366_v41 = vld [vmem:[%s3950_s0 + $0x30] sm:$0xff] }
 0x19d   :  { %v989_v63 = vadd.f32 %v2806_v11, %v969_v39  ;;  %v785_v54 = vadd.f32 %v784_v3, %v782_v25  ;;  %v375_v35 = vadd.f32 %v359_v32, %v339_v30  ;;  %v431_v12 = vmul.f32 %v2681_v56, %v2877_v26 }
 0x19e   :  { %v793_v8 = vmul.f32 %v792_v37, %v2741_v62  ;;  %v467_v33 = vmul.f32 %v2684_v28, %v2881_v27  ;;  %v503_v1 = vmul.f32 %v2687_v58, %v2883_v48  ;;  %v795_v2 = vrot.slane %v2832_v7, 1 }
 0x19f   :  { %v1009_v15 = vmul.f32 %v2820_v51, %v989_v63  ;;  %v788_v57 = vadd.f32 %v787_v23, %v785_v54  ;;  %v411_v21 = vadd.f32 %v395_v52, %v375_v35  ;;  %v798_v0 = vrot.slane %v2832_v7, 2 }
 0x1a0   :  { %v590_v59 = vadd.f32 %v574_v19, %v554_v43  ;;  %v796_v55 = vmul.f32 %v795_v2, %v2700_v5  ;;  %v801_v4 = vrot.slane %v2832_v7, 3  ;;  %v804_v40 = vrot.slane %v2832_v7, 4 }
 0x1a1   :  { %v3169_v16 = vadd.f32 %v2366_v41, %v1009_v15  ;;  %v791_v42 = vadd.f32 %v790_v9, %v788_v57  ;;  %v447_v13 = vadd.f32 %v431_v12, %v411_v21  ;;  %v799_v10 = vmul.f32 %v798_v0, %v2704_v6 }
 0x1a2   :  { %v539_v29 = vmul.f32 %v2691_v36, %v2887_v61  ;;  %v802_v19 = vmul.f32 %v801_v4, %v2710_v18  ;;  %v807_v3 = vrot.slane %v2832_v7, 5  ;;  %v810_v37 = vrot.slane %v2832_v7, 6 }
 0x1a3   :  { %v1053_v39 = vsel %vm44_vm0, %v3169_v16, 0.0  ;;  %v794_v25 = vadd.f32 %v793_v8, %v791_v42  ;;  %v483_v30 = vadd.f32 %v467_v33, %v447_v13  ;;  %v800_v32 = vadd.f32 %v799_v10, %v796_v55 }
 0x1a4   :  { %1054 = vadd.xlane.f32.xlu0 %v1053_v39  ;;  %v805_v43 = vmul.f32 %v804_v40, %v2714_v22  ;;  %v813_v23 = vrot.slane %v2832_v7, 7  ;;  %v340_v9 = vmul.f32 %v2672_v46, %v2844_v38  ;;  %v360_v52 = vmul.f32 %v2674_v47, %v2851_v20  ;;  %v2367_v39 = vld [vmem:[%s3950_s0 + $0x38] sm:$0xff] }
 0x1a5   :  { %v970_v63 = vadd.f32 %v794_v25, %v590_v59  ;;  %v519_v54 = vadd.f32 %v503_v1, %v483_v30  ;;  %v803_v35 = vadd.f32 %v802_v19, %v800_v32  ;;  %v396_v12 = vmul.f32 %v2678_v53, %v2877_v26 }
 0x1a6   :  { %v575_v8 = vmul.f32 %v2694_v60, %v2906_v14  ;;  %v808_v33 = vmul.f32 %v807_v3, %v2722_v44  ;;  %v811_v2 = vmul.f32 %v810_v37, %v2730_v24  ;;  %v376_v15 = vadd.f32 %v360_v52, %v340_v9 }
 0x1a7   :  { %v990_v57 = vadd.f32 %v2806_v11, %v970_v63  ;;  %v555_v21 = vadd.f32 %v539_v29, %v519_v54  ;;  %v806_v0 = vadd.f32 %v805_v43, %v803_v35  ;;  %v814_v55 = vmul.f32 %v813_v23, %v2741_v62 }
 0x1a8   :  { %v412_v59 = vadd.f32 %v396_v12, %v376_v15  ;;  %v432_v1 = vmul.f32 %v2681_v56, %v2881_v27  ;;  %v468_v4 = vmul.f32 %v2684_v28, %v2883_v48  ;;  %v816_v40 = vrot.slane %v2844_v38, 1 }
 0x1a9   :  { %v1010_v41 = vmul.f32 %v2820_v51, %v990_v57  ;;  %v809_v42 = vadd.f32 %v808_v33, %v806_v0  ;;  %v504_v13 = vmul.f32 %v2687_v58, %v2887_v61  ;;  %v819_v10 = vrot.slane %v2844_v38, 2 }
 0x1aa   :  { %v448_v29 = vadd.f32 %v432_v1, %v412_v59  ;;  %v817_v19 = vmul.f32 %v816_v40, %v2700_v5  ;;  %v822_v3 = vrot.slane %v2844_v38, 3  ;;  %v825_v37 = vrot.slane %v2844_v38, 4 }
 0x1ab   :  { %v3208_v25 = vadd.f32 %v2367_v39, %v1010_v41  ;;  %v591_v30 = vadd.f32 %v575_v8, %v555_v21  ;;  %v812_v32 = vadd.f32 %v811_v2, %v809_v42  ;;  %v820_v43 = vmul.f32 %v819_v10, %v2704_v6 }
 0x1ac   :  { %v484_v23 = vadd.f32 %v468_v4, %v448_v29  ;;  %v540_v9 = vmul.f32 %v2691_v36, %v2906_v14  ;;  %v828_v52 = vrot.slane %v2844_v38, 5  ;;  %v831_v63 = vrot.slane %v2844_v38, 6 }
 0x1ad   :  { %v1056_v54 = vsel %vm44_vm0, %v3208_v25, 0.0  ;;  %v815_v35 = vadd.f32 %v814_v55, %v812_v32  ;;  %v821_v12 = vadd.f32 %v820_v43, %v817_v19  ;;  %v823_v33 = vmul.f32 %v822_v3, %v2710_v18 }
 0x1ae   :  { %1057 = vadd.xlane.f32.xlu1 %v1056_v54  ;;  %v520_v8 = vadd.f32 %v504_v13, %v484_v23  ;;  %v576_v2 = vmul.f32 %v2694_v60, %v2832_v7  ;;  %v826_v15 = vmul.f32 %v825_v37, %v2714_v22  ;;  %v834_v57 = vrot.slane %v2844_v38, 7 }
 0x1af   :  { %v971_v21 = vadd.f32 %v815_v35, %v591_v30  ;;  %v824_v0 = vadd.f32 %v823_v33, %v821_v12  ;;  %v341_v59 = vmul.f32 %v2672_v46, %v2851_v20  ;;  %v361_v55 = vmul.f32 %v2674_v47, %v2877_v26  ;;  %v2368_v35 = vld [vmem:[%s3950_s0 + $0x40] sm:$0xff] }
 0x1b0   :  { %v556_v1 = vadd.f32 %v540_v9, %v520_v8  ;;  %v829_v4 = vmul.f32 %v828_v52, %v2722_v44  ;;  %v832_v40 = vmul.f32 %v831_v63, %v2730_v24  ;;  %v397_v41 = vmul.f32 %v2678_v53, %v2881_v27 }
 0x1b1   :  { %v991_v42 = vadd.f32 %v2806_v11, %v971_v21  ;;  %v827_v13 = vadd.f32 %v826_v15, %v824_v0  ;;  %v377_v10 = vadd.f32 %v361_v55, %v341_v59  ;;  %v433_v29 = vmul.f32 %v2681_v56, %v2883_v48 }
 0x1b2   :  { %v835_v19 = vmul.f32 %v834_v57, %v2741_v62  ;;  %v469_v3 = vmul.f32 %v2684_v28, %v2887_v61  ;;  %v505_v37 = vmul.f32 %v2687_v58, %v2906_v14  ;;  %v837_v39 = vrot.slane %v2851_v20, 1 }
 0x1b3   :  { %v1011_v30 = vmul.f32 %v2820_v51, %v991_v42  ;;  %v830_v32 = vadd.f32 %v829_v4, %v827_v13  ;;  %v413_v43 = vadd.f32 %v397_v41, %v377_v10  ;;  %v840_v23 = vrot.slane %v2851_v20, 2 }
 0x1b4   :  { %v592_v9 = vadd.f32 %v576_v2, %v556_v1  ;;  %v838_v52 = vmul.f32 %v837_v39, %v2700_v5  ;;  %v843_v63 = vrot.slane %v2851_v20, 3  ;;  %v846_v54 = vrot.slane %v2851_v20, 4 }
 0x1b5   :  { %v3247_v12 = vadd.f32 %v2368_v35, %v1011_v30  ;;  %v833_v33 = vadd.f32 %v832_v40, %v830_v32  ;;  %v449_v8 = vadd.f32 %v433_v29, %v413_v43  ;;  %v841_v15 = vmul.f32 %v840_v23, %v2704_v6 }
 0x1b6   :  { %v541_v57 = vmul.f32 %v2691_v36, %v2832_v7  ;;  %v844_v2 = vmul.f32 %v843_v63, %v2710_v18  ;;  %v849_v21 = vrot.slane %v2851_v20, 5  ;;  %v852_v0 = vrot.slane %v2851_v20, 6 }
 0x1b7   :  { %v1059_v59 = vsel %vm44_vm0, %v3247_v12, 0.0  ;;  %v836_v55 = vadd.f32 %v835_v19, %v833_v33  ;;  %v485_v1 = vadd.f32 %v469_v3, %v449_v8  ;;  %v842_v4 = vadd.f32 %v841_v15, %v838_v52 }
 0x1b8   :  { %1060 = vadd.xlane.f32.xlu0 %v1059_v59  ;;  %v847_v40 = vmul.f32 %v846_v54, %v2714_v22  ;;  %v855_v41 = vrot.slane %v2851_v20, 7  ;;  %v342_v42 = vmul.f32 %v2672_v46, %v2877_v26  ;;  %v362_v13 = vmul.f32 %v2674_v47, %v2881_v27 }
 0x1b9   :  { %v972_v10 = vadd.f32 %v836_v55, %v592_v9  ;;  %v521_v29 = vadd.f32 %v505_v37, %v485_v1  ;;  %v845_v39 = vadd.f32 %v844_v2, %v842_v4  ;;  %v398_v30 = vmul.f32 %v2678_v53, %v2883_v48  ;;  %v2369_v1 = vld [vmem:[%s3950_s0 + $0x48] sm:$0xff] }
 0x1ba   :  { %v577_v19 = vmul.f32 %v2694_v60, %v2844_v38  ;;  %v850_v3 = vmul.f32 %v849_v21, %v2722_v44  ;;  %v853_v32 = vmul.f32 %v852_v0, %v2730_v24  ;;  %v378_v43 = vadd.f32 %v362_v13, %v342_v42 }
 0x1bb   :  { %v992_v23 = vadd.f32 %v2806_v11, %v972_v10  ;;  %v557_v52 = vadd.f32 %v541_v57, %v521_v29  ;;  %v848_v63 = vadd.f32 %v847_v40, %v845_v39  ;;  %v856_v54 = vmul.f32 %v855_v41, %v2741_v62 }
 0x1bc   :  { %v414_v9 = vadd.f32 %v398_v30, %v378_v43  ;;  %v434_v37 = vmul.f32 %v2681_v56, %v2887_v61  ;;  %v470_v35 = vmul.f32 %v2684_v28, %v2906_v14  ;;  %v858_v33 = vrot.slane %v2877_v26, 1 }
 0x1bd   :  { %v1012_v8 = vmul.f32 %v2820_v51, %v992_v23  ;;  %v851_v15 = vadd.f32 %v850_v3, %v848_v63  ;;  %v506_v2 = vmul.f32 %v2687_v58, %v2832_v7  ;;  %v861_v57 = vrot.slane %v2877_v26, 2 }
 0x1be   :  { %v450_v21 = vadd.f32 %v434_v37, %v414_v9  ;;  %v859_v0 = vmul.f32 %v858_v33, %v2700_v5  ;;  %v864_v59 = vrot.slane %v2877_v26, 3  ;;  %v867_v55 = vrot.slane %v2877_v26, 4 }
 0x1bf   :  { %v3286_v4 = vadd.f32 %v2369_v1, %v1012_v8  ;;  %v593_v40 = vadd.f32 %v577_v19, %v557_v52  ;;  %v854_v41 = vadd.f32 %v853_v32, %v851_v15  ;;  %v862_v42 = vmul.f32 %v861_v57, %v2704_v6 }
 0x1c0   :  { %v486_v13 = vadd.f32 %v470_v35, %v450_v21  ;;  %v542_v10 = vmul.f32 %v2691_v36, %v2844_v38  ;;  %v870_v29 = vrot.slane %v2877_v26, 5  ;;  %v873_v39 = vrot.slane %v2877_v26, 6 }
 0x1c1   :  { %v1062_v30 = vsel %vm44_vm0, %v3286_v4, 0.0  ;;  %v857_v3 = vadd.f32 %v856_v54, %v854_v41  ;;  %v863_v43 = vadd.f32 %v862_v42, %v859_v0  ;;  %v865_v23 = vmul.f32 %v864_v59, %v2710_v18 }
 0x1c2   :  { %1063 = vadd.xlane.f32.xlu1 %v1062_v30  ;;  %v522_v19 = vadd.f32 %v506_v2, %v486_v13  ;;  %v578_v32 = vmul.f32 %v2694_v60, %v2851_v20  ;;  %v868_v52 = vmul.f32 %v867_v55, %v2714_v22  ;;  %v876_v63 = vrot.slane %v2877_v26, 7 }
 0x1c3   :  { %v973_v9 = vadd.f32 %v857_v3, %v593_v40  ;;  %v866_v37 = vadd.f32 %v865_v23, %v863_v43  ;;  %v343_v35 = vmul.f32 %v2672_v46, %v2881_v27  ;;  %v363_v54 = vmul.f32 %v2674_v47, %v2883_v48  ;;  %v2370_v23 = vld [vmem:[%s3950_s0 + $0x50] sm:$0xff] }
 0x1c4   :  { %v558_v33 = vadd.f32 %v542_v10, %v522_v19  ;;  %v871_v8 = vmul.f32 %v870_v29, %v2722_v44  ;;  %v874_v15 = vmul.f32 %v873_v39, %v2730_v24  ;;  %v399_v2 = vmul.f32 %v2678_v53, %v2887_v61 }
 0x1c5   :  { %v993_v57 = vadd.f32 %v2806_v11, %v973_v9  ;;  %v869_v21 = vadd.f32 %v868_v52, %v866_v37  ;;  %v379_v0 = vadd.f32 %v363_v54, %v343_v35  ;;  %v435_v59 = vmul.f32 %v2681_v56, %v2906_v14 }
 0x1c6   :  { %v877_v55 = vmul.f32 %v876_v63, %v2741_v62  ;;  %v471_v1 = vmul.f32 %v2684_v28, %v2832_v7  ;;  %v507_v40 = vmul.f32 %v2687_v58, %v2844_v38  ;;  %v879_v41 = vrot.slane %v2881_v27, 1 }
 0x1c7   :  { %v1013_v42 = vmul.f32 %v2820_v51, %v993_v57  ;;  %v872_v13 = vadd.f32 %v871_v8, %v869_v21  ;;  %v415_v10 = vadd.f32 %v399_v2, %v379_v0  ;;  %v882_v29 = vrot.slane %v2881_v27, 2 }
 0x1c8   :  { %v594_v39 = vadd.f32 %v578_v32, %v558_v33  ;;  %v880_v30 = vmul.f32 %v879_v41, %v2700_v5  ;;  %v885_v3 = vrot.slane %v2881_v27, 3  ;;  %v888_v43 = vrot.slane %v2881_v27, 4 }
 0x1c9   :  { %v3325_v19 = vadd.f32 %v2370_v23, %v1013_v42  ;;  %v875_v52 = vadd.f32 %v874_v15, %v872_v13  ;;  %v451_v63 = vadd.f32 %v435_v59, %v415_v10  ;;  %v883_v9 = vmul.f32 %v882_v29, %v2704_v6 }
 0x1ca   :  { %v543_v37 = vmul.f32 %v2691_v36, %v2851_v20  ;;  %v886_v32 = vmul.f32 %v885_v3, %v2710_v18  ;;  %v891_v35 = vrot.slane %v2881_v27, 5  ;;  %v894_v54 = vrot.slane %v2881_v27, 6 }
 0x1cb   :  { %v1065_v33 = vsel %vm44_vm0, %v3325_v19, 0.0  ;;  %v878_v8 = vadd.f32 %v877_v55, %v875_v52  ;;  %v487_v2 = vadd.f32 %v471_v1, %v451_v63  ;;  %v884_v57 = vadd.f32 %v883_v9, %v880_v30 }
 0x1cc   :  { %1066 = vadd.xlane.f32.xlu0 %v1065_v33  ;;  %v889_v15 = vmul.f32 %v888_v43, %v2714_v22  ;;  %v897_v21 = vrot.slane %v2881_v27, 7  ;;  %v344_v0 = vmul.f32 %v2672_v46, %v2883_v48  ;;  %v364_v59 = vmul.f32 %v2674_v47, %v2887_v61 }
 0x1cd   :  { %v974_v41 = vadd.f32 %v878_v8, %v594_v39  ;;  %v523_v42 = vadd.f32 %v507_v40, %v487_v2  ;;  %v887_v13 = vadd.f32 %v886_v32, %v884_v57  ;;  %v400_v10 = vmul.f32 %v2678_v53, %v2906_v14  ;;  %v2371_v57 = vld [vmem:[%s3950_s0 + $0x58] sm:$0xff] }
 0x1ce   :  { %v579_v55 = vmul.f32 %v2694_v60, %v2877_v26  ;;  %v892_v1 = vmul.f32 %v891_v35, %v2722_v44  ;;  %v380_v29 = vadd.f32 %v364_v59, %v344_v0  ;;  %v895_v23 = vmul.f32 %v894_v54, %v2730_v24 }
 0x1cf   :  { %v994_v30 = vadd.f32 %v2806_v11, %v974_v41  ;;  %v559_v3 = vadd.f32 %v543_v37, %v523_v42  ;;  %v890_v43 = vadd.f32 %v889_v15, %v887_v13  ;;  %v898_v52 = vmul.f32 %v897_v21, %v2741_v62 }
 0x1d0   :  { %v416_v39 = vadd.f32 %v400_v10, %v380_v29  ;;  %v436_v40 = vmul.f32 %v2681_v56, %v2832_v7  ;;  %v900_v63 = vrot.slane %v2883_v48, 1  ;;  %v472_v35 = vmul.f32 %v2684_v28, %v2844_v38 }
 0x1d1   :  { %v1014_v9 = vmul.f32 %v2820_v51, %v994_v30  ;;  %v893_v32 = vadd.f32 %v892_v1, %v890_v43  ;;  %v903_v33 = vrot.slane %v2883_v48, 2  ;;  %v906_v54 = vrot.slane %v2883_v48, 3 }
 0x1d2   :  { %v452_v37 = vadd.f32 %v436_v40, %v416_v39  ;;  %v901_v8 = vmul.f32 %v900_v63, %v2700_v5  ;;  %v909_v2 = vrot.slane %v2883_v48, 4  ;;  %v595_v21 = vadd.f32 %v579_v55, %v559_v3 }
 0x1d3   :  { %v3362_v15 = vadd.f32 %v2371_v57, %v1014_v9  ;;  %v896_v0 = vadd.f32 %v895_v23, %v893_v32  ;;  %v904_v59 = vmul.f32 %v903_v33, %v2704_v6  ;;  %v508_v42 = vmul.f32 %v2687_v58, %v2851_v20 }
 0x1d4   :  { %v488_v41 = vadd.f32 %v472_v35, %v452_v37  ;;  %v912_v13 = vrot.slane %v2883_v48, 5  ;;  %v915_v10 = vrot.slane %v2883_v48, 6  ;;  %v907_v43 = vmul.f32 %v906_v54, %v2710_v18 }
 0x1d5   :  { %v1068_v1 = vsel %vm44_vm0, %v3362_v15, 0.0  ;;  %v899_v29 = vadd.f32 %v898_v52, %v896_v0  ;;  %v905_v30 = vadd.f32 %v904_v59, %v901_v8  ;;  %v544_v3 = vmul.f32 %v2691_v36, %v2877_v26 }
 0x1d6   :  { %1069 = vadd.xlane.f32.xlu1 %v1068_v1  ;;  %v524_v55 = vadd.f32 %v508_v42, %v488_v41  ;;  %v910_v23 = vmul.f32 %v909_v2, %v2714_v22  ;;  %v918_v39 = vrot.slane %v2883_v48, 7  ;;  %v345_v9 = vmul.f32 %v2672_v46, %v2887_v61 }
 0x1d7   :  { %v975_v40 = vadd.f32 %v899_v29, %v595_v21  ;;  %v908_v63 = vadd.f32 %v907_v43, %v905_v30  ;;  %v365_v52 = vmul.f32 %v2674_v47, %v2906_v14  ;;  %v580_v35 = vmul.f32 %v2694_v60, %v2881_v27 }
 0x1d8   :  { %v560_v32 = vadd.f32 %v544_v3, %v524_v55  ;;  %v913_v33 = vmul.f32 %v912_v13, %v2722_v44  ;;  %v916_v37 = vmul.f32 %v915_v10, %v2730_v24  ;;  %v401_v57 = vmul.f32 %v2678_v53, %v2832_v7  ;;  %v2372_v3 = vld [vmem:[%s3950_s0 + $0x60] sm:$0xff] }
 0x1d9   :  { %v995_v8 = vadd.f32 %v2806_v11, %v975_v40  ;;  %v911_v54 = vadd.f32 %v910_v23, %v908_v63  ;;  %v381_v2 = vadd.f32 %v365_v52, %v345_v9  ;;  %v919_v21 = vmul.f32 %v918_v39, %v2741_v62 }
 0x1da   :  { %v437_v0 = vmul.f32 %v2681_v56, %v2844_v38  ;;  %v473_v59 = vmul.f32 %v2684_v28, %v2851_v20  ;;  %v921_v41 = vrot.slane %v2887_v61, 1  ;;  %v924_v1 = vrot.slane %v2887_v61, 2 }
 0x1db   :  { %v1015_v42 = vmul.f32 %v2820_v51, %v995_v8  ;;  %v914_v13 = vadd.f32 %v913_v33, %v911_v54  ;;  %v417_v10 = vadd.f32 %v401_v57, %v381_v2  ;;  %v596_v29 = vadd.f32 %v580_v35, %v560_v32 }
 0x1dc   :  { %v922_v30 = vmul.f32 %v921_v41, %v2700_v5  ;;  %v927_v43 = vrot.slane %v2887_v61, 3  ;;  %v930_v55 = vrot.slane %v2887_v61, 4  ;;  %v925_v63 = vmul.f32 %v924_v1, %v2704_v6 }
 0x1dd   :  { %v3401_v23 = vadd.f32 %v2372_v3, %v1015_v42  ;;  %v917_v39 = vadd.f32 %v916_v37, %v914_v13  ;;  %v453_v40 = vadd.f32 %v437_v0, %v417_v10  ;;  %v509_v9 = vmul.f32 %v2687_v58, %v2877_v26 }
 0x1de   :  { %v928_v52 = vmul.f32 %v927_v43, %v2710_v18  ;;  %v933_v32 = vrot.slane %v2887_v61, 5  ;;  %v936_v35 = vrot.slane %v2887_v61, 6  ;;  %v926_v2 = vadd.f32 %v925_v63, %v922_v30 }
 0x1df   :  { %v1071_v33 = vsel %vm44_vm0, %v3401_v23, 0.0  ;;  %v920_v8 = vadd.f32 %v919_v21, %v917_v39  ;;  %v489_v54 = vadd.f32 %v473_v59, %v453_v40  ;;  %v545_v37 = vmul.f32 %v2691_v36, %v2881_v27 }
 0x1e0   :  { %1072 = vadd.xlane.f32.xlu0 %v1071_v33  ;;  %v939_v57 = vrot.slane %v2887_v61, 7  ;;  %v346_v0 = vmul.f32 %v2672_v46, %v2906_v14  ;;  %v366_v41 = vmul.f32 %v2674_v47, %v2832_v7  ;;  %v929_v10 = vadd.f32 %v928_v52, %v926_v2 }
 0x1e1   :  { %v976_v42 = vadd.f32 %v920_v8, %v596_v29  ;;  %v525_v13 = vadd.f32 %v509_v9, %v489_v54  ;;  %v931_v1 = vmul.f32 %v930_v55, %v2714_v22  ;;  %v581_v21 = vmul.f32 %v2694_v60, %v2883_v48 }
 0x1e2   :  { %v934_v59 = vmul.f32 %v933_v32, %v2722_v44  ;;  %v382_v30 = vadd.f32 %v366_v41, %v346_v0  ;;  %v402_v43 = vmul.f32 %v2678_v53, %v2844_v38  ;;  %v937_v47 = vmul.f32 %v936_v35, %v2730_v24 }
 0x1e3   :  { %v996_v3 = vadd.f32 %v2806_v11, %v976_v42  ;;  %v561_v46 = vadd.f32 %v545_v37, %v525_v13  ;;  %v932_v39 = vadd.f32 %v931_v1, %v929_v10  ;;  %v940_v7 = vmul.f32 %v939_v57, %v2741_v62 }
 0x1e4   :  { %v418_v29 = vadd.f32 %v402_v43, %v382_v30  ;;  %v438_v55 = vmul.f32 %v2681_v56, %v2851_v20  ;;  %v942_v40 = vrot.slane %v2906_v14, 1  ;;  %v474_v53 = vmul.f32 %v2684_v28, %v2877_v26  ;;  %v2373_v20 = vld [vmem:[%s3950_s0 + $0x68] sm:$0xff] }
 0x1e5   :  { %v1016_v63 = vmul.f32 %v2820_v51, %v996_v3  ;;  %v935_v9 = vadd.f32 %v934_v59, %v932_v39  ;;  %v945_v38 = vrot.slane %v2906_v14, 2  ;;  %v597_v52 = vadd.f32 %v581_v21, %v561_v46 }
 0x1e6   :  { %v454_v32 = vadd.f32 %v438_v55, %v418_v29  ;;  %v943_v35 = vmul.f32 %v942_v40, %v2700_v5  ;;  %v948_v33 = vrot.slane %v2906_v14, 3  ;;  %v951_v2 = vrot.slane %v2906_v14, 4 }
 0x1e7   :  { %v3439_v56 = vadd.f32 %v2373_v20, %v1016_v63  ;;  %v938_v8 = vadd.f32 %v937_v47, %v935_v9  ;;  %v946_v54 = vmul.f32 %v945_v38, %v2704_v6  ;;  %v510_v26 = vmul.f32 %v2687_v58, %v2881_v27  ;;  %v2375_v9 = vld [vmem:[%s3950_s0 + $0x78] sm:$0xff] }
 0x1e8   :  { %v490_v28 = vadd.f32 %v474_v53, %v454_v32  ;;  %v954_v37 = vrot.slane %v2906_v14, 5  ;;  %v949_v41 = vmul.f32 %v948_v33, %v2710_v18  ;;  %v546_v6 = vmul.f32 %v2691_v36, %v2883_v48 }
 0x1e9   :  { %v1074_v5 = vsel %vm44_vm0, %v3439_v56, 0.0  ;;  %v941_v57 = vadd.f32 %v940_v7, %v938_v8  ;;  %v947_v0 = vadd.f32 %v946_v54, %v943_v35  ;;  %v952_v1 = vmul.f32 %v951_v2, %v2714_v22  ;;  %v2374_v22 = vld [vmem:[%s3950_s0 + $0x70] sm:$0xff] }
 0x1ea   :  { %1075 = vadd.xlane.f32.xlu1 %v1074_v5  ;;  %v526_v42 = vadd.f32 %v510_v26, %v490_v28  ;;  %v957_v58 = vrot.slane %v2906_v14, 6  ;;  %v955_v27 = vmul.f32 %v954_v37, %v2722_v44  ;;  %v960_v43 = vrot.slane %v2906_v14, 7 }
 0x1eb   :  { %v977_v13 = vadd.f32 %v941_v57, %v597_v52  ;;  %v950_v10 = vadd.f32 %v949_v41, %v947_v0  ;;  %v582_v3 = vmul.f32 %v2694_v60, %v2887_v61 }
 0x1ec   :  { %v562_v59 = vadd.f32 %v546_v6, %v526_v42  ;;  %v958_v48 = vmul.f32 %v957_v58, %v2730_v24  ;;  %v961_v47 = vmul.f32 %v960_v43, %v2741_v62 }
 0x1ed   :  { %v997_v21 = vadd.f32 %v2806_v11, %v977_v13  ;;  %v953_v30 = vadd.f32 %v952_v1, %v950_v10 }
 0x1ee   :  { %v598_v44 = vadd.f32 %v582_v3, %v562_v59 }
 0x1ef   :  { %v1017_v18 = vmul.f32 %v2820_v51, %v997_v21  ;;  %v956_v36 = vadd.f32 %v955_v27, %v953_v30 }
 0x1f1   :  { %v3463_v46 = vadd.f32 %v2374_v22, %v1017_v18  ;;  %v959_v39 = vadd.f32 %v958_v48, %v956_v36  ;;  %v1037_v7 = vpop.xlane.xlu0 %1036 }
 0x1f2   :  { %v1083_v14 = vmul.f32 0.03125, %v1037_v7 }
 0x1f3   :  { %v1077_v29 = vsel %vm44_vm0, %v3463_v46, 0.0  ;;  %v962_v55 = vadd.f32 %v961_v47, %v959_v39 }
 0x1f4   :  { %1078 = vadd.xlane.f32.xlu0 %v1077_v29  ;;  %v3469_v60 = vsub.f32 %v2923_v17, %v1083_v14 }
 0x1f5   :  { %v978_v24 = vadd.f32 %v962_v55, %v598_v44 }
 0x1f6   :  { %v1115_v61 = vmul.f32 %v3469_v60, %v3469_v60 }
 0x1f7   :  { %v998_v40 = vadd.f32 %v2806_v11, %v978_v24 }
 0x1f8   :  { %v1131_v63 = vsel %vm44_vm0, %v1115_v61, 0.0 }
 0x1f9   :  { %v1018_v62 = vmul.f32 %v2820_v51, %v998_v40  ;;  %1132 = vadd.xlane.f32.xlu0 %v1131_v63 }
 0x1fb   :  { %v3479_v53 = vadd.f32 %v2375_v9, %v1018_v62 }
 0x1fd   :  { %v1080_v38 = vsel %vm44_vm0, %v3479_v53, 0.0 }
 0x1fe   :  { %1081 = vadd.xlane.f32.xlu1 %v1080_v38 }
 0x200   :  { %v1040_v52 = vpop.xlane.xlu1 %1039 }
 0x201   :  { %v1084_v32 = vmul.f32 0.03125, %v1040_v52 }
 0x203   :  { %v3484_v35 = vsub.f32 %v2977_v49, %v1084_v32 }
 0x205   :  { %v1116_v11 = vmul.f32 %v3484_v35, %v3484_v35 }
 0x207   :  { %v1134_v51 = vsel %vm44_vm0, %v1116_v11, 0.0 }
 0x208   :  { %1135 = vadd.xlane.f32.xlu1 %v1134_v51 }
 0x209   :  { %v1043_v33 = vpop.xlane.xlu0 %1042 }
 0x20a   :  { %v1085_v20 = vmul.f32 0.03125, %v1043_v33 }
 0x20c   :  { %v3490_v8 = vsub.f32 %v3013_v50, %v1085_v20 }
 0x20e   :  { %v1117_v54 = vmul.f32 %v3490_v8, %v3490_v8 }
 0x210   :  { %v1137_v2 = vsel %vm44_vm0, %v1117_v54, 0.0 }
 0x211   :  { %1138 = vadd.xlane.f32.xlu0 %v1137_v2 }
 0x213   :  { %v1046_v28 = vpop.xlane.xlu1 %1045 }
 0x214   :  { %v1086_v26 = vmul.f32 0.03125, %v1046_v28 }
 0x216   :  { %v3496_v37 = vsub.f32 %v3052_v31, %v1086_v26 }
 0x218   :  { %v1118_v5 = vmul.f32 %v3496_v37, %v3496_v37 }
 0x21a   :  { %v1140_v57 = vsel %vm44_vm0, %v1118_v5, 0.0 }
 0x21b   :  { %1141 = vadd.xlane.f32.xlu1 %v1140_v57 }
 0x21d   :  { %v1049_v0 = vpop.xlane.xlu0 %1048 }
 0x21e   :  { %v1087_v41 = vmul.f32 0.03125, %v1049_v0 }
 0x220   :  { %v3502_v42 = vsub.f32 %v3091_v34, %v1087_v41 }
 0x222   :  { %v1119_v6 = vmul.f32 %v3502_v42, %v3502_v42 }
 0x224   :  { %v1143_v13 = vsel %vm44_vm0, %v1119_v6, 0.0 }
 0x225   :  { %1144 = vadd.xlane.f32.xlu0 %v1143_v13 }
 0x227   :  { %v1052_v10 = vpop.xlane.xlu1 %1051 }
 0x228   :  { %v1088_v1 = vmul.f32 0.03125, %v1052_v10 }
 0x22a   :  { %v3508_v58 = vsub.f32 %v3130_v45, %v1088_v1 }
 0x22c   :  { %v1120_v27 = vmul.f32 %v3508_v58, %v3508_v58 }
 0x22e   :  { %v1146_v21 = vsel %vm44_vm0, %v1120_v27, 0.0  ;;  %v2224_v27 = vld [vmem:[%s3954_s4] sm:$0xff]  }
 0x22f   :  { %1147 = vadd.xlane.f32.xlu1 %v1146_v21  ;;  %2153 = vmatprep.subr.bf16.mxu0 %v2224_v27 }
 0x230   :  { %2154 = vmatpush3.bf16.msra.mxu0 %v2224_v27 }
 0x231   :  { %v1055_v59 = vpop.xlane.xlu0 %1054 }
 0x232   :  { %v1089_v30 = vmul.f32 0.03125, %v1055_v59 }
 0x234   :  { %v3514_v43 = vsub.f32 %v3169_v16, %v1089_v30 }
 0x236   :  { %v1121_v18 = vmul.f32 %v3514_v43, %v3514_v43 }
 0x238   :  { %v1149_v3 = vsel %vm44_vm0, %v1121_v18, 0.0 }
 0x239   :  { %1150 = vadd.xlane.f32.xlu0 %v1149_v3 }
 0x23b   :  { %v1058_v36 = vpop.xlane.xlu1 %1057 }
 0x23c   :  { %v1090_v48 = vmul.f32 0.03125, %v1058_v36 }
 0x23e   :  { %v3520_v22 = vsub.f32 %v3208_v25, %v1090_v48 }
 0x240   :  { %v1122_v44 = vmul.f32 %v3520_v22, %v3520_v22 }
 0x242   :  { %v1152_v39 = vsel %vm44_vm0, %v1122_v44, 0.0 }
 0x243   :  { %1153 = vadd.xlane.f32.xlu1 %v1152_v39 }
 0x245   :  { %v1061_v47 = vpop.xlane.xlu0 %1060 }
 0x246   :  { %v1091_v7 = vmul.f32 0.03125, %v1061_v47 }
 0x248   :  { %v3526_v14 = vsub.f32 %v3247_v12, %v1091_v7 }
 0x24a   :  { %v1123_v29 = vmul.f32 %v3526_v14, %v3526_v14 }
 0x24c   :  { %v1155_v55 = vsel %vm44_vm0, %v1123_v29, 0.0 }
 0x24d   :  { %1156 = vadd.xlane.f32.xlu0 %v1155_v55 }
 0x24f   :  { %v1064_v24 = vpop.xlane.xlu1 %1063 }
 0x250   :  { %v1092_v61 = vmul.f32 0.03125, %v1064_v24  ;;  %v2225_v24 = vld [vmem:[%s3954_s4 + $0x8] sm:$0xff]  }
 0x251   :  { %2155 = vmatprep.subr.bf16.mxu0 %v2225_v24 }
 0x252   :  { %v3532_v40 = vsub.f32 %v3286_v4, %v1092_v61  ;;  %2156 = vmatpush3.bf16.msra.mxu0 %v2225_v24 }
 0x254   :  { %v1124_v63 = vmul.f32 %v3532_v40, %v3532_v40 }
 0x256   :  { %v1158_v62 = vsel %vm44_vm0, %v1124_v63, 0.0 }
 0x257   :  { %1159 = vadd.xlane.f32.xlu1 %v1158_v62 }
 0x259   :  { %v1067_v9 = vpop.xlane.xlu0 %1066 }
 0x25a   :  { %v1093_v38 = vmul.f32 0.03125, %v1067_v9 }
 0x25c   :  { %v3538_v52 = vsub.f32 %v3325_v19, %v1093_v38 }
 0x25e   :  { %v1125_v32 = vmul.f32 %v3538_v52, %v3538_v52 }
 0x260   :  { %v1161_v11 = vsel %vm44_vm0, %v1125_v32, 0.0 }
 0x261   :  { %1162 = vadd.xlane.f32.xlu0 %v1161_v11 }
 0x263   :  { %v1070_v51 = vpop.xlane.xlu1 %1069 }
 0x264   :  { %v1094_v33 = vmul.f32 0.03125, %v1070_v51  ;;  %v2376_v51 = vld [vmem:[%s3951_s1 + $0x10] sm:$0xff] }
 0x266   :  { %v3544_v20 = vsub.f32 %v3362_v15, %v1094_v33  ;;  %v3965_v33 = vld [vmem:[#allocation5_spill] sm:$0xff] }
 0x268   :  { %v1126_v54 = vmul.f32 %v3544_v20, %v3544_v20 }
 0x26a   :  { %v1164_v2 = vsel %vm44_vm0, %v1126_v54, 0.0  ;;  %v3584_v54 = vrot.slane %v2376_v51, %v3965_v33 }
 0x26b   :  { %1165 = vadd.xlane.f32.xlu1 %v1164_v2 }
 0x26d   :  { %v1073_v28 = vpop.xlane.xlu0 %1072 }
 0x26e   :  { %v1095_v26 = vmul.f32 0.03125, %v1073_v28 }
 0x270   :  { %v3550_v5 = vsub.f32 %v3401_v23, %v1095_v26 }
 0x272   :  { %v1127_v57 = vmul.f32 %v3550_v5, %v3550_v5 }
 0x274   :  { %v1167_v0 = vsel %vm44_vm0, %v1127_v57, 0.0 }
 0x275   :  { %1168 = vadd.xlane.f32.xlu0 %v1167_v0  ;;  %v3966_v0 = vld [vmem:[#allocation6_spill] sm:$0xff] }
 0x277   :  { %v1076_v41 = vpop.xlane.xlu1 %1075 }
 0x278   :  { %v1096_v6 = vmul.f32 0.03125, %v1076_v41  ;;  %v3589_v41 = vrot.slane %v2376_v51, %v3966_v0 }
 0x27a   :  { %v3556_v13 = vsub.f32 %v3439_v56, %v1096_v6 }
 0x27c   :  { %v1128_v10 = vmul.f32 %v3556_v13, %v3556_v13 }
 0x27e   :  { %v1170_v1 = vsel %vm44_vm0, %v1128_v10, 0.0 }
 0x27f   :  { %1171 = vadd.xlane.f32.xlu1 %v1170_v1 }
 0x281   :  { %v1079_v21 = vpop.xlane.xlu0 %1078 }
 0x282   :  { %v1097_v59 = vmul.f32 0.03125, %v1079_v21 }
 0x284   :  { %v3565_v30 = vsub.f32 %v3463_v46, %v1097_v59 }
 0x286   :  { %v1129_v18 = vmul.f32 %v3565_v30, %v3565_v30  ;;  %v1133_v36 = vpop.xlane.xlu0 %1132 }
 0x287   :  { %v1179_v39 = vmul.f32 0.03125, %v1133_v36 }
 0x288   :  { %v1173_v3 = vsel %vm44_vm0, %v1129_v18, 0.0 }
 0x289   :  { %1174 = vadd.xlane.f32.xlu0 %v1173_v3  ;;  %v1195_v29 = vadd.f32 1e-06, %v1179_v39 }
 0x28b   :  { %v1082_v48 = vpop.xlane.xlu1 %1081  ;;  %2266 = vrsqrt.f32 %v1195_v29 }
 0x28c   :  { %v1098_v44 = vmul.f32 0.03125, %v1082_v48 }
 0x28e   :  { %v3571_v47 = vsub.f32 %v3479_v53, %v1098_v44 }
 0x290   :  { %v1130_v7 = vmul.f32 %v3571_v47, %v3571_v47 }
 0x292   :  { %v1176_v55 = vsel %vm44_vm0, %v1130_v7, 0.0 }
 0x293   :  { %1177 = vadd.xlane.f32.xlu1 %v1176_v55 }
 0x295   :  { %v1136_v61 = vpop.xlane.xlu1 %1135  ;;  %v2267_v9 = vpop.eup %2266 }
 0x296   :  { %v1180_v63 = vmul.f32 0.03125, %v1136_v61  ;;  %v1227_v11 = vmul.f32 %v2267_v9, %v3469_v60 }
 0x298   :  { %v1196_v62 = vadd.f32 1e-06, %v1180_v63  ;;  %v1247_v57 = vmul.f32 %v3584_v54, %v1227_v11 }
 0x29a   :  { %2268 = vrsqrt.f32 %v1196_v62  ;;  %v1267_v1 = vadd.f32 %v3589_v41, %v1247_v57 }
 0x29e   :  { %v1139_v38 = vpop.xlane.xlu0 %1138 }
 0x29f   :  { %v1181_v32 = vmul.f32 0.03125, %v1139_v38 }
 0x2a1   :  { %v1197_v2 = vadd.f32 1e-06, %v1181_v32 }
 0x2a3   :  { %2270 = vrsqrt.f32 %v1197_v2 }
 0x2a4   :  { %v2269_v28 = vpop.eup %2268 }
 0x2a5   :  { %v1228_v26 = vmul.f32 %v2269_v28, %v3484_v35 }
 0x2a7   :  { %v1248_v6 = vmul.f32 %v3584_v54, %v1228_v26 }
 0x2a8   :  { %v1142_v60 = vpop.xlane.xlu1 %1141 }
 0x2a9   :  { %v1182_v10 = vmul.f32 0.03125, %v1142_v60  ;;  %v1268_v27 = vadd.f32 %v3589_v41, %v1248_v6 }
 0x2ab   :  { %v1198_v21 = vadd.f32 1e-06, %v1182_v10  ;;  %v1283_v59 = vpack.c.bf16 %v1268_v27, %v1267_v1 }
 0x2ad   :  { %2272 = vrsqrt.f32 %v1198_v21  ;;  %2157 = vmatprep.mubr.msk.bf16.mxu0 %vm44_vm0, %v1283_v59  ;;  %v2271_v35 = vpop.eup %2270 }
 0x2ae   :  { %v1229_v36 = vmul.f32 %v2271_v35, %v3490_v8 }
 0x2b0   :  { %v1249_v7 = vmul.f32 %v3584_v54, %v1229_v36 }
 0x2b2   :  { %v1145_v18 = vpop.xlane.xlu0 %1144  ;;  %v1269_v24 = vadd.f32 %v3589_v41, %v1249_v7 }
 0x2b3   :  { %v1183_v3 = vmul.f32 0.03125, %v1145_v18 }
 0x2b5   :  { %v1199_v44 = vadd.f32 1e-06, %v1183_v3 }
 0x2b7   :  { %v2273_v48 = vpop.eup %2272  ;;  %2274 = vrsqrt.f32 %v1199_v44 }
 0x2b8   :  { %v1230_v39 = vmul.f32 %v2273_v48, %v3496_v37 }
 0x2ba   :  { %v1250_v29 = vmul.f32 %v3584_v54, %v1230_v39 }
 0x2bc   :  { %v1148_v55 = vpop.xlane.xlu1 %1147  ;;  %v1270_v61 = vadd.f32 %v3589_v41, %v1250_v29 }
 0x2bd   :  { %v1184_v63 = vmul.f32 0.03125, %v1148_v55 }
 0x2be   :  { %v1284_v62 = vpack.c.bf16 %v1270_v61, %v1269_v24 }
 0x2bf   :  { %v1200_v9 = vadd.f32 1e-06, %v1184_v63 }
 0x2c0   :  { %2158 = vmatmul.mubr.msk.bf16.vlgmr.msra.gmra.mrb[0].mxu0 %vm44_vm0, %v1284_v62 }
 0x2c1   :  { %2276 = vrsqrt.f32 %v1200_v9  ;;  %v2275_v8 = vpop.eup %2274 }
 0x2c2   :  { %v1231_v37 = vmul.f32 %v2275_v8, %v3502_v42 }
 0x2c4   :  { %v1251_v2 = vmul.f32 %v3584_v54, %v1231_v37 }
 0x2c6   :  { %v1151_v38 = vpop.xlane.xlu0 %1150  ;;  %v1271_v57 = vadd.f32 %v3589_v41, %v1251_v2 }
 0x2c7   :  { %v1185_v32 = vmul.f32 0.03125, %v1151_v38 }
 0x2c9   :  { %v1201_v51 = vadd.f32 1e-06, %v1185_v32 }
 0x2cb   :  { %v2277_v11 = vpop.eup %2276  ;;  %2278 = vrsqrt.f32 %v1201_v51 }
 0x2cc   :  { %v1232_v33 = vmul.f32 %v2277_v11, %v3508_v58 }
 0x2ce   :  { %v1252_v28 = vmul.f32 %v3584_v54, %v1232_v33 }
 0x2d0   :  { %v1154_v26 = vpop.xlane.xlu1 %1153  ;;  %v1272_v0 = vadd.f32 %v3589_v41, %v1252_v28 }
 0x2d1   :  { %v1186_v6 = vmul.f32 0.03125, %v1154_v26 }
 0x2d2   :  { %v1285_v60 = vpack.c.bf16 %v1272_v0, %v1271_v57 }
 0x2d3   :  { %v1202_v10 = vadd.f32 1e-06, %v1186_v6 }
 0x2d4   :  { %2161 = vmatprep.mubr.msk.bf16.mxu0 %vm44_vm0, %v1285_v60 }
 0x2d5   :  { %2280 = vrsqrt.f32 %v1202_v10  ;;  %v2279_v42 = vpop.eup %2278 }
 0x2d6   :  { %v1233_v58 = vmul.f32 %v2279_v42, %v3514_v43 }
 0x2d8   :  { %v1253_v18 = vmul.f32 %v3584_v54, %v1233_v58 }
 0x2da   :  { %v1157_v1 = vpop.xlane.xlu0 %1156  ;;  %v1273_v48 = vadd.f32 %v3589_v41, %v1253_v18 }
 0x2db   :  { %v1187_v27 = vmul.f32 0.03125, %v1157_v1 }
 0x2dd   :  { %v1203_v59 = vadd.f32 1e-06, %v1187_v27 }
 0x2df   :  { %v2281_v21 = vpop.eup %2280  ;;  %2282 = vrsqrt.f32 %v1203_v59 }
 0x2e0   :  { %v1234_v35 = vmul.f32 %v2281_v21, %v3520_v22 }
 0x2e2   :  { %v1254_v3 = vmul.f32 %v3584_v54, %v1234_v35 }
 0x2e4   :  { %v1160_v36 = vpop.xlane.xlu1 %1159  ;;  %v1274_v44 = vadd.f32 %v3589_v41, %v1254_v3 }
 0x2e5   :  { %v1188_v39 = vmul.f32 0.03125, %v1160_v36 }
 0x2e6   :  { %v1286_v7 = vpack.c.bf16 %v1274_v44, %v1273_v48 }
 0x2e7   :  { %v1204_v29 = vadd.f32 1e-06, %v1188_v39 }
 0x2e8   :  { %2162 = vmatmul.mubr.msk.bf16.gmra.mrb[4].mxu0 %vm44_vm0, %v1286_v7 }
 0x2e9   :  { %2284 = vrsqrt.f32 %v1204_v29  ;;  %v2283_v43 = vpop.eup %2282 }
 0x2ea   :  { %v1235_v22 = vmul.f32 %v2283_v43, %v3526_v14 }
 0x2ec   :  { %v1255_v9 = vmul.f32 %v3584_v54, %v1235_v22 }
 0x2ee   :  { %v1163_v55 = vpop.xlane.xlu0 %1162  ;;  %v1275_v32 = vadd.f32 %v3589_v41, %v1255_v9 }
 0x2ef   :  { %v1189_v24 = vmul.f32 0.03125, %v1163_v55 }
 0x2f1   :  { %v1205_v63 = vadd.f32 1e-06, %v1189_v24 }
 0x2f3   :  { %v2285_v61 = vpop.eup %2284  ;;  %2286 = vrsqrt.f32 %v1205_v63 }
 0x2f4   :  { %v1236_v62 = vmul.f32 %v2285_v61, %v3532_v40 }
 0x2f6   :  { %v1256_v8 = vmul.f32 %v3584_v54, %v1236_v62 }
 0x2f8   :  { %v1166_v38 = vpop.xlane.xlu1 %1165  ;;  %v1276_v37 = vadd.f32 %v3589_v41, %v1256_v8 }
 0x2f9   :  { %v1190_v11 = vmul.f32 0.03125, %v1166_v38 }
 0x2fa   :  { %v1287_v51 = vpack.c.bf16 %v1276_v37, %v1275_v32  ;;  %v3647_v32 = vld [vmem:[%s3953_s3] ss:$0 sm:$0xff] }
 0x2fb   :  { %v1206_v33 = vadd.f32 1e-06, %v1190_v11 }
 0x2fc   :  { %2165 = vmatprep.mubr.msk.bf16.mxu0 %vm44_vm0, %v1287_v51 }
 0x2fd   :  { %2288 = vrsqrt.f32 %v1206_v33  ;;  %v2287_v14 = vpop.eup %2286 }
 0x2fe   :  { %v1237_v40 = vmul.f32 %v2287_v14, %v3538_v52 }
 0x300   :  { %v1257_v6 = vmul.f32 %v3584_v54, %v1237_v40 }
 0x302   :  { %v1169_v2 = vpop.xlane.xlu0 %1168  ;;  %v1277_v42 = vadd.f32 %v3589_v41, %v1257_v6 }
 0x303   :  { %v1191_v28 = vmul.f32 0.03125, %v1169_v2 }
 0x305   :  { %v1207_v57 = vadd.f32 1e-06, %v1191_v28  ;;  %v2226_v28 = vld [vmem:[%s3955_s5] sm:$0xff]  }
 0x306   :  { %2173 = vmatprep.subr.bf16.mxu0 %v2226_v28  ;;  %2205 = vmatprep.subr.bf16.mxu1 %v2226_v28 }
 0x307   :  { %v2289_v26 = vpop.eup %2288  ;;  %2290 = vrsqrt.f32 %v1207_v57  ;;  %2174 = vmatpush3.bf16.msra.mxu0 %v2226_v28  ;;  %2213 = vmatpush3.bf16.msra.mxu1 %v2226_v28 }
 0x308   :  { %v1238_v0 = vmul.f32 %v2289_v26, %v3544_v20 }
 0x30a   :  { %v1258_v60 = vmul.f32 %v3584_v54, %v1238_v0 }
 0x30c   :  { %v1172_v10 = vpop.xlane.xlu1 %1171  ;;  %v1278_v1 = vadd.f32 %v3589_v41, %v1258_v60 }
 0x30d   :  { %v1192_v27 = vmul.f32 0.03125, %v1172_v10 }
 0x30e   :  { %v1288_v58 = vpack.c.bf16 %v1278_v1, %v1277_v42 }
 0x30f   :  { %v1208_v21 = vadd.f32 1e-06, %v1192_v27 }
 0x310   :  { %2166 = vmatmul.mubr.msk.bf16.gmra.mrb[8].mxu0 %vm44_vm0, %v1288_v58  ;;  %v2227_v58 = vld [vmem:[%s3955_s5 + $0x8] sm:$0xff]  }
 0x311   :  { %2292 = vrsqrt.f32 %v1208_v21  ;;  %v2291_v52 = vpop.eup %2290  ;;  %2175 = vmatprep.subr.bf16.mxu0 %v2227_v58  ;;  %2206 = vmatprep.subr.bf16.mxu1 %v2227_v58 }
 0x312   :  { %v1239_v20 = vmul.f32 %v2291_v52, %v3550_v5  ;;  %2176 = vmatpush3.bf16.msra.mxu0 %v2227_v58  ;;  %2214 = vmatpush3.bf16.msra.mxu1 %v2227_v58 }
 0x314   :  { %v1259_v48 = vmul.f32 %v3584_v54, %v1239_v20 }
 0x316   :  { %v1175_v59 = vpop.xlane.xlu0 %1174  ;;  %v1279_v7 = vadd.f32 %v3589_v41, %v1259_v48  ;;  %v2230_v48 = vld [vmem:[%s3955_s5 + $0x20] sm:$0xff]  }
 0x317   :  { %v1193_v35 = vmul.f32 0.03125, %v1175_v59 }
 0x319   :  { %v1209_v3 = vadd.f32 1e-06, %v1193_v35  ;;  %v2228_v35 = vld [vmem:[%s3955_s5 + $0x10] sm:$0xff]  }
 0x31a   :  { %2177 = vmatprep.subr.bf16.mxu0 %v2228_v35  ;;  %2207 = vmatprep.subr.bf16.mxu1 %v2228_v35 }
 0x31b   :  { %v2293_v18 = vpop.eup %2292  ;;  %2294 = vrsqrt.f32 %v1209_v3  ;;  %2178 = vmatpush3.bf16.msra.mxu0 %v2228_v35  ;;  %2215 = vmatpush3.bf16.msra.mxu1 %v2228_v35 }
 0x31c   :  { %v1240_v36 = vmul.f32 %v2293_v18, %v3556_v13  ;;  %v2229_v18 = vld [vmem:[%s3955_s5 + $0x18] sm:$0xff]  }
 0x31d   :  { %2179 = vmatprep.subr.bf16.mxu0 %v2229_v18  ;;  %2208 = vmatprep.subr.bf16.mxu1 %v2229_v18 }
 0x31e   :  { %v1260_v44 = vmul.f32 %v3584_v54, %v1240_v36 }
 0x31f   :  { %2180 = vmatpush3.bf16.msra.mxu0 %v2229_v18  ;;  %2216 = vmatpush3.bf16.msra.mxu1 %v2229_v18 }
 0x320   :  { %v1178_v39 = vpop.xlane.xlu1 %1177  ;;  %v1280_v29 = vadd.f32 %v3589_v41, %v1260_v44  ;;  %2181 = vmatprep.subr.bf16.mxu0 %v2230_v48  ;;  %2209 = vmatprep.subr.bf16.mxu1 %v2230_v48 }
 0x321   :  { %v1194_v43 = vmul.f32 0.03125, %v1178_v39 }
 0x322   :  { %v1289_v55 = vpack.c.bf16 %v1280_v29, %v1279_v7 }
 0x323   :  { %v1210_v24 = vadd.f32 1e-06, %v1194_v43  ;;  %2182 = vmatpush3.bf16.msra.mxu0 %v2230_v48  ;;  %2217 = vmatpush3.bf16.msra.mxu1 %v2230_v48 }
 0x324   :  { %2169 = vmatprep.mubr.msk.bf16.mxu0 %vm44_vm0, %v1289_v55 }
 0x325   :  { %2296 = vrsqrt.f32 %v1210_v24  ;;  %v2295_v5 = vpop.eup %2294 }
 0x326   :  { %v1241_v22 = vmul.f32 %v2295_v5, %v3565_v30 }
 0x328   :  { %v1261_v63 = vmul.f32 %v3584_v54, %v1241_v22 }
 0x32a   :  { %v1281_v9 = vadd.f32 %v3589_v41, %v1261_v63 }
 0x32f   :  { %v2297_v13 = vpop.eup %2296 }
 0x330   :  { %v1242_v61 = vmul.f32 %v2297_v13, %v3571_v47  ;;  %v2231_v13 = vld [vmem:[%s3955_s5 + $0x28] sm:$0xff]  }
 0x331   :  { %2183 = vmatprep.subr.bf16.mxu0 %v2231_v13  ;;  %2210 = vmatprep.subr.bf16.mxu1 %v2231_v13 }
 0x332   :  { %v1262_v62 = vmul.f32 %v3584_v54, %v1242_v61  ;;  %2184 = vmatpush3.bf16.msra.mxu0 %v2231_v13  ;;  %2218 = vmatpush3.bf16.msra.mxu1 %v2231_v13 }
 0x334   :  { %v1282_v8 = vadd.f32 %v3589_v41, %v1262_v62 }
 0x336   :  { %v1290_v38 = vpack.c.bf16 %v1282_v8, %v1281_v9 }
 0x338   :  { %2170 = vmatmul.mubr.msk.bf16.gmra.mrb[12].mxu0 %vm44_vm0, %v1290_v38 }
 0x393   :  { %v2159_v30 = vpop.f32.mrb[0].mxu0 }
 0x394   :  { %v3650_v37 = vadd.f32 %v2159_v30, %v3647_v32  ;;  %v1372_v47 = vpop.f32.mrb[1].mxu0 }
 0x395   :  { %v3653_v11 = vadd.f32 %v3647_v32, %v1372_v47  ;;  %v2160_v54 = vpop.f32.mrb[2].mxu0 }
 0x396   :  { %v3656_v51 = vmul.f32 0.70710677, %v3650_v37  ;;  %v3659_v41 = vadd.f32 %v2160_v54, %v3647_v32  ;;  %v1375_v33 = vpop.f32.mrb[3].mxu0 }
 0x397   :  { %v3662_v14 = vmul.f32 0.70710677, %v3653_v11  ;;  %v3665_v2 = vadd.f32 %v3647_v32, %v1375_v33 }
 0x398   :  { %v1469_v40 = vand.u32 2147483647, %v3656_v51  ;;  %v3672_v26 = vmul.f32 0.70710677, %v3659_v41  ;;  %vm1789_vm1 = vcmp.ge.f32.partialorder %v3656_v51, 0.0 }
 0x399   :  { %v1467_v57 = vand.u32 2147483647, %v3662_v14  ;;  %v3676_v0 = vmul.f32 0.70710677, %v3665_v2  ;;  %vm1787_vm2 = vcmp.ge.f32.partialorder %v3662_v14, 0.0 }
 0x39a   :  { %v1485_v6 = vmul.f32 0.3275911, %v1469_v40  ;;  %v1470_v60 = vand.u32 2147483647, %v3672_v26  ;;  %v1693_v3 = vsub.f32 0.0, %v1469_v40  ;;  %vm1790_vm3 = vcmp.ge.f32.partialorder %v3672_v26, 0.0 }
 0x39b   :  { %v1483_v10 = vmul.f32 0.3275911, %v1467_v57  ;;  %v1468_v42 = vand.u32 2147483647, %v3676_v0  ;;  %v1691_v36 = vsub.f32 0.0, %v1467_v57  ;;  %vm1788_vm4 = vcmp.ge.f32.partialorder %v3676_v0, 0.0 }
 0x39c   :  { %v1501_v1 = vadd.f32 1.0, %v1485_v6  ;;  %v1486_v27 = vmul.f32 0.3275911, %v1470_v60  ;;  %v1709_v39 = vmul.f32 %v1693_v3, %v1469_v40  ;;  %v1694_v7 = vsub.f32 0.0, %v1470_v60 }
 0x39d   :  { %v1499_v21 = vadd.f32 1.0, %v1483_v10  ;;  %v1484_v52 = vmul.f32 0.3275911, %v1468_v42  ;;  %v1707_v55 = vmul.f32 %v1691_v36, %v1467_v57  ;;  %v1692_v5 = vsub.f32 0.0, %v1468_v42  ;;  %v2232_v10 = vld [vmem:[%s3955_s5 + $0x30] sm:$0xff]  }
 0x39e   :  { %2298 = vrcp.f32 %v1501_v1  ;;  %v1502_v59 = vadd.f32 1.0, %v1486_v27  ;;  %v1727_v63 = vmul.f32 1.442695, %v1709_v39  ;;  %v1710_v9 = vmul.f32 %v1694_v7, %v1470_v60  ;;  %2185 = vmatprep.subr.bf16.mxu0 %v2232_v10  ;;  %2211 = vmatprep.subr.bf16.mxu1 %v2232_v10 }
 0x39f   :  { %2300 = vrcp.f32 %v1499_v21  ;;  %v1500_v20 = vadd.f32 1.0, %v1484_v52  ;;  %v1723_v38 = vmul.f32 1.442695, %v1707_v55  ;;  %v1708_v33 = vmul.f32 %v1692_v5, %v1468_v42  ;;  %2186 = vmatpush3.bf16.msra.mxu0 %v2232_v10  ;;  %2219 = vmatpush3.bf16.msra.mxu1 %v2232_v10 }
 0x3a0   :  { %2302 = vrcp.f32 %v1502_v59  ;;  %v1729_v60 = vmul.f32 1.442695, %v1710_v9 }
 0x3a1   :  { %2304 = vrcp.f32 %v1500_v20  ;;  %v1725_v21 = vmul.f32 1.442695, %v1708_v33  ;;  %v2233_v20 = vld [vmem:[%s3955_s5 + $0x38] sm:$0xff]  }
 0x3a2   :  { %2306 = vpow2.f32 %v1727_v63  ;;  %2187 = vmatprep.subr.bf16.mxu0 %v2233_v20  ;;  %2212 = vmatprep.subr.bf16.mxu1 %v2233_v20 }
 0x3a3   :  { %2308 = vpow2.f32 %v1723_v38  ;;  %2188 = vmatpush3.bf16.msra.mxu0 %v2233_v20  ;;  %2220 = vmatpush3.bf16.msra.mxu1 %v2233_v20 }
 0x3a4   :  { %2310 = vpow2.f32 %v1729_v60 }
 0x3a5   :  { %2312 = vpow2.f32 %v1725_v21 }
 0x3a8   :  { %v3692_v44 = vpop.eup %2298 }
 0x3a9   :  { %v3694_v29 = vpop.eup %2300  ;;  %v1549_v43 = vmul.f32 1.0614054, %v3692_v44 }
 0x3aa   :  { %v1547_v24 = vmul.f32 1.0614054, %v3694_v29  ;;  %v3701_v61 = vpop.eup %2302 }
 0x3ab   :  { %v1565_v22 = vadd.f32 -1.4531521, %v1549_v43  ;;  %v1550_v30 = vmul.f32 1.0614054, %v3701_v61  ;;  %v3705_v47 = vpop.eup %2304 }
 0x3ac   :  { %v1563_v62 = vadd.f32 -1.4531521, %v1547_v24  ;;  %v1548_v57 = vmul.f32 1.0614054, %v3705_v47  ;;  %v2307_v63 = vpop.eup %2306 }
 0x3ad   :  { %v1581_v8 = vmul.f32 %v3692_v44, %v1565_v22  ;;  %v1566_v40 = vadd.f32 -1.4531521, %v1550_v30  ;;  %v2309_v9 = vpop.eup %2308 }
 0x3ae   :  { %v1579_v54 = vmul.f32 %v3694_v29, %v1563_v62  ;;  %v1564_v58 = vadd.f32 -1.4531521, %v1548_v57 }
 0x3af   :  { %v1597_v28 = vadd.f32 1.4214138, %v1581_v8  ;;  %v1582_v27 = vmul.f32 %v3701_v61, %v1566_v40 }
 0x3b0   :  { %v1595_v6 = vadd.f32 1.4214138, %v1579_v54  ;;  %v1580_v35 = vmul.f32 %v3705_v47, %v1564_v58 }
 0x3b1   :  { %v1613_v1 = vmul.f32 %v3692_v44, %v1597_v28  ;;  %v1598_v59 = vadd.f32 1.4214138, %v1582_v27 }
 0x3b2   :  { %v1611_v42 = vmul.f32 %v3694_v29, %v1595_v6  ;;  %v1596_v48 = vadd.f32 1.4214138, %v1580_v35 }
 0x3b3   :  { %v1629_v52 = vadd.f32 -0.28449672, %v1613_v1  ;;  %v1614_v36 = vmul.f32 %v3701_v61, %v1598_v59 }
 0x3b4   :  { %v1627_v18 = vadd.f32 -0.28449672, %v1611_v42  ;;  %v1612_v55 = vmul.f32 %v3705_v47, %v1596_v48  ;;  %v1437_v48 = vmul.f32 0.5, %v3650_v37 }
 0x3b5   :  { %v1645_v3 = vmul.f32 %v3692_v44, %v1629_v52  ;;  %v1630_v43 = vadd.f32 -0.28449672, %v1614_v36 }
 0x3b6   :  { %v1643_v39 = vmul.f32 %v3694_v29, %v1627_v18  ;;  %v1628_v13 = vadd.f32 -0.28449672, %v1612_v55 }
 0x3b7   :  { %v1661_v7 = vadd.f32 0.2548296, %v1645_v3  ;;  %v1646_v22 = vmul.f32 %v3701_v61, %v1630_v43 }
 0x3b8   :  { %v1659_v24 = vadd.f32 0.2548296, %v1643_v39  ;;  %v1644_v30 = vmul.f32 %v3705_v47, %v1628_v13  ;;  %v1438_v13 = vmul.f32 0.5, %v3659_v41  ;;  %v1436_v41 = vmul.f32 0.5, %v3665_v2 }
 0x3b9   :  { %v1677_v5 = vmul.f32 %v3692_v44, %v1661_v7  ;;  %v1662_v38 = vadd.f32 0.2548296, %v1646_v22 }
 0x3ba   :  { %v1675_v62 = vmul.f32 %v3694_v29, %v1659_v24  ;;  %v1660_v6 = vadd.f32 0.2548296, %v1644_v30  ;;  %v2311_v29 = vpop.eup %2310 }
 0x3bb   :  { %v1757_v8 = vmul.f32 %v2307_v63, %v1677_v5  ;;  %v2163_v54 = vpop.f32.mrb[4].mxu0  ;;  %v1678_v44 = vmul.f32 %v3701_v61, %v1662_v38  ;;  %v2313_v59 = vpop.eup %2312  ;;  %v1435_v5 = vmul.f32 0.5, %v3653_v11 }
 0x3bc   :  { %v1755_v33 = vmul.f32 %v2309_v9, %v1675_v62  ;;  %v3728_v28 = vadd.f32 %v2163_v54, %v3647_v32  ;;  %v1388_v40 = vpop.f32.mrb[5].mxu0  ;;  %v1676_v52 = vmul.f32 %v3705_v47, %v1660_v6 }
 0x3bd   :  { %v1773_v57 = vsub.f32 1.0, %v1757_v8  ;;  %v3732_v60 = vadd.f32 %v3647_v32, %v1388_v40  ;;  %v2164_v10 = vpop.f32.mrb[6].mxu0  ;;  %v1758_v21 = vmul.f32 %v2311_v29, %v1678_v44 }
 0x3be   :  { %v1771_v1 = vsub.f32 1.0, %v1755_v33  ;;  %v3735_v27 = vmul.f32 0.70710677, %v3728_v28  ;;  %v1391_v58 = vpop.f32.mrb[7].mxu0  ;;  %v1756_v36 = vmul.f32 %v2313_v59, %v1676_v52  ;;  %v3746_v7 = vadd.f32 %v2164_v10, %v3647_v32 }
 0x3bf   :  { %v1805_v42 = vsub.f32 0.0, %v1773_v57  ;;  %v3741_v20 = vmul.f32 0.70710677, %v3732_v60  ;;  %v1774_v3 = vsub.f32 1.0, %v1758_v21  ;;  %v3757_v11 = vadd.f32 %v3647_v32, %v1391_v58 }
 0x3c0   :  { %v1803_v35 = vsub.f32 0.0, %v1771_v1  ;;  %v1473_v61 = vand.u32 2147483647, %v3735_v27  ;;  %v1772_v51 = vsub.f32 1.0, %v1756_v36  ;;  %v3754_v30 = vmul.f32 0.70710677, %v3746_v7 }
 0x3c1   :  { %v1821_v18 = vsel %vm1789_vm1, %v1773_v57, %v1805_v42  ;;  %v1806_v43 = vsub.f32 0.0, %v1774_v3  ;;  %v1471_v55 = vand.u32 2147483647, %v3741_v20  ;;  %v3762_v6 = vmul.f32 0.70710677, %v3757_v11 }
 0x3c2   :  { %v1489_v39 = vmul.f32 0.3275911, %v1473_v61  ;;  %v1819_v47 = vsel %vm1787_vm2, %v1771_v1, %v1803_v35  ;;  %v1837_v24 = vadd.f32 1.0, %v1821_v18  ;;  %v1804_v63 = vsub.f32 0.0, %v1772_v51 }
 0x3c3   :  { %v1822_v37 = vsel %vm1790_vm3, %v1774_v3, %v1806_v43  ;;  %v1487_v14 = vmul.f32 0.3275911, %v1471_v55  ;;  %v1835_v62 = vadd.f32 1.0, %v1819_v47  ;;  %v1474_v40 = vand.u32 2147483647, %v3754_v30 }
 0x3c4   :  { %v1505_v22 = vadd.f32 1.0, %v1489_v39  ;;  %v1838_v9 = vadd.f32 1.0, %v1822_v37  ;;  %v1820_v8 = vsel %vm1788_vm4, %v1772_v51, %v1804_v63  ;;  %v1853_v26 = vmul.f32 %v1837_v24, %v1437_v48 }
 0x3c5   :  { %v1503_v38 = vadd.f32 1.0, %v1487_v14  ;;  %v1836_v33 = vadd.f32 1.0, %v1820_v8  ;;  %v1851_v57 = vmul.f32 %v1835_v62, %v1435_v5  ;;  %v1490_v10 = vmul.f32 0.3275911, %v1474_v40 }
 0x3c6   :  { %2314 = vrcp.f32 %v1505_v22  ;;  %v1854_v54 = vmul.f32 %v1838_v9, %v1438_v13  ;;  %v1697_v29 = vsub.f32 0.0, %v1473_v61  ;;  %v1472_v1 = vand.u32 2147483647, %v3762_v6 }
 0x3c7   :  { %2316 = vrcp.f32 %v1503_v38  ;;  %v1852_v0 = vmul.f32 %v1836_v33, %v1436_v41  ;;  %v1506_v42 = vadd.f32 1.0, %v1490_v10  ;;  %v1698_v47 = vsub.f32 0.0, %v1474_v40 }
 0x3c8   :  { %v1868_v44 = vpack.c.bf16 %v1854_v54, %v1853_v26  ;;  %v1488_v21 = vmul.f32 0.3275911, %v1472_v1  ;;  %v1713_v52 = vmul.f32 %v1697_v29, %v1473_v61  ;;  %v1695_v24 = vsub.f32 0.0, %v1471_v55 }
 0x3c9   :  { %v1867_v58 = vpack.c.bf16 %v1852_v0, %v1851_v57  ;;  %2318 = vrcp.f32 %v1506_v42  ;;  %v1714_v61 = vmul.f32 %v1698_v47, %v1474_v40  ;;  %vm1793_vm5 = vcmp.ge.f32.partialorder %v3735_v27, 0.0 }
 0x3ca   :  { %v1504_v59 = vadd.f32 1.0, %v1488_v21  ;;  %v1735_v36 = vmul.f32 1.442695, %v1713_v52  ;;  %v1711_v9 = vmul.f32 %v1695_v24, %v1471_v55  ;;  %vm1794_vm6 = vcmp.ge.f32.partialorder %v3754_v30, 0.0 }
 0x3cb   :  { %2189 = vmatprep.mubr.bf16.mxu0 %v1867_v58  ;;  %v1737_v26 = vmul.f32 1.442695, %v1714_v61  ;;  %vm1791_vm7 = vcmp.ge.f32.partialorder %v3741_v20, 0.0  ;;  %vm1792_vm8 = vcmp.ge.f32.partialorder %v3762_v6, 0.0  ;;  %v1440_v20 = vmul.f32 0.5, %v3757_v11 }
 0x3cc   :  { %2190 = vmatmul.mubr.bf16.vlgmr.msra.gmra.mrb[16].mxu0 %v1868_v44  ;;  %2320 = vrcp.f32 %v1504_v59  ;;  %v1696_v44 = vsub.f32 0.0, %v1472_v1  ;;  %v1731_v40 = vmul.f32 1.442695, %v1711_v9 }
 0x3cd   :  { %2322 = vpow2.f32 %v1735_v36 }
 0x3ce   :  { %2324 = vpow2.f32 %v1737_v26  ;;  %v1712_v55 = vmul.f32 %v1696_v44, %v1472_v1 }
 0x3cf   :  { %2326 = vpow2.f32 %v1731_v40 }
 0x3d0   :  { %v2315_v2 = vpop.eup %2314 }
 0x3d1   :  { %v1553_v35 = vmul.f32 1.0614054, %v2315_v2  ;;  %v3765_v18 = vpop.eup %2316 }
 0x3d2   :  { %v1551_v48 = vmul.f32 1.0614054, %v3765_v18 }
 0x3d3   :  { %v1569_v3 = vadd.f32 -1.4531521, %v1553_v35  ;;  %v2319_v22 = vpop.eup %2318 }
 0x3d4   :  { %v1567_v43 = vadd.f32 -1.4531521, %v1551_v48  ;;  %v1554_v37 = vmul.f32 1.0614054, %v2319_v22 }
 0x3d5   :  { %v1585_v39 = vmul.f32 %v2315_v2, %v1569_v3 }
 0x3d6   :  { %v1583_v5 = vmul.f32 %v3765_v18, %v1567_v43  ;;  %v3769_v62 = vpop.eup %2320  ;;  %v1570_v8 = vadd.f32 -1.4531521, %v1554_v37 }
 0x3d7   :  { %v1601_v51 = vadd.f32 1.4214138, %v1585_v39  ;;  %v1552_v54 = vmul.f32 1.0614054, %v3769_v62  ;;  %v2323_v42 = vpop.eup %2322 }
 0x3d8   :  { %v1599_v63 = vadd.f32 1.4214138, %v1583_v5  ;;  %v1586_v33 = vmul.f32 %v2319_v22, %v1570_v8 }
 0x3d9   :  { %v1617_v13 = vmul.f32 %v2315_v2, %v1601_v51  ;;  %v1568_v10 = vadd.f32 -1.4531521, %v1552_v54 }
 0x3da   :  { %v1615_v41 = vmul.f32 %v3765_v18, %v1599_v63  ;;  %v1602_v0 = vadd.f32 1.4214138, %v1586_v33  ;;  %v2325_v33 = vpop.eup %2324 }
 0x3db   :  { %v1633_v14 = vadd.f32 -0.28449672, %v1617_v13  ;;  %v1584_v48 = vmul.f32 %v3769_v62, %v1568_v10  ;;  %v1733_v13 = vmul.f32 1.442695, %v1712_v55  ;;  %v2327_v55 = vpop.eup %2326 }
 0x3dc   :  { %v1631_v58 = vadd.f32 -0.28449672, %v1615_v41  ;;  %v1618_v21 = vmul.f32 %v2319_v22, %v1602_v0 }
 0x3dd   :  { %v1649_v38 = vmul.f32 %v2315_v2, %v1633_v14  ;;  %v1600_v14 = vadd.f32 1.4214138, %v1584_v48  ;;  %2328 = vpow2.f32 %v1733_v13 }
 0x3de   :  { %v1634_v35 = vadd.f32 -0.28449672, %v1618_v21  ;;  %v1647_v47 = vmul.f32 %v3765_v18, %v1631_v58 }
 0x3df   :  { %v1665_v57 = vadd.f32 0.2548296, %v1649_v38  ;;  %v1616_v40 = vmul.f32 %v3769_v62, %v1600_v14 }
 0x3e0   :  { %v1650_v51 = vmul.f32 %v2319_v22, %v1634_v35  ;;  %v1663_v38 = vadd.f32 0.2548296, %v1647_v47  ;;  %v1441_v47 = vmul.f32 0.5, %v3728_v28 }
 0x3e1   :  { %v1681_v29 = vmul.f32 %v2315_v2, %v1665_v57 }
 0x3e2   :  { %v1666_v37 = vadd.f32 0.2548296, %v1650_v51  ;;  %v1679_v21 = vmul.f32 %v3765_v18, %v1663_v38 }
 0x3e3   :  { %v1761_v52 = vmul.f32 %v2323_v42, %v1681_v29  ;;  %v2167_v59 = vpop.f32.mrb[8].mxu0 }
 0x3e4   :  { %v3774_v3 = vadd.f32 %v2167_v59, %v3647_v32  ;;  %v1404_v36 = vpop.f32.mrb[9].mxu0  ;;  %v1682_v54 = vmul.f32 %v2319_v22, %v1666_v37 }
 0x3e5   :  { %v3778_v39 = vadd.f32 %v3647_v32, %v1404_v36  ;;  %v2168_v2 = vpop.f32.mrb[10].mxu0  ;;  %v1777_v43 = vsub.f32 1.0, %v1761_v52  ;;  %v1632_v36 = vadd.f32 -0.28449672, %v1616_v40 }
 0x3e6   :  { %v3782_v24 = vmul.f32 0.70710677, %v3774_v3  ;;  %v3785_v1 = vadd.f32 %v2168_v2, %v3647_v32  ;;  %v1407_v5 = vpop.f32.mrb[11].mxu0  ;;  %v1762_v0 = vmul.f32 %v2325_v33, %v1682_v54  ;;  %v1759_v2 = vmul.f32 %v2327_v55, %v1679_v21 }
 0x3e7   :  { %v3788_v61 = vmul.f32 0.70710677, %v3778_v39  ;;  %v1809_v26 = vsub.f32 0.0, %v1777_v43  ;;  %v3798_v29 = vadd.f32 %v3647_v32, %v1407_v5  ;;  %v1648_v13 = vmul.f32 %v3769_v62, %v1632_v36  ;;  %v2329_v28 = vpop.eup %2328 }
 0x3e8   :  { %v1477_v63 = vand.u32 2147483647, %v3782_v24  ;;  %v3793_v8 = vmul.f32 0.70710677, %v3785_v1  ;;  %v1778_v52 = vsub.f32 1.0, %v1762_v0  ;;  %v1775_v37 = vsub.f32 1.0, %v1759_v2 }
 0x3e9   :  { %v1475_v9 = vand.u32 2147483647, %v3788_v61  ;;  %v1825_v22 = vsel %vm1793_vm5, %v1777_v43, %v1809_v26  ;;  %v3803_v35 = vmul.f32 0.70710677, %v3798_v29  ;;  %v1442_v43 = vmul.f32 0.5, %v3746_v7 }
 0x3ea   :  { %v1493_v41 = vmul.f32 0.3275911, %v1477_v63  ;;  %v1478_v44 = vand.u32 2147483647, %v3793_v8  ;;  %v1810_v59 = vsub.f32 0.0, %v1778_v52  ;;  %v1841_v48 = vadd.f32 1.0, %v1825_v22 }
 0x3eb   :  { %v1491_v57 = vmul.f32 0.3275911, %v1475_v9  ;;  %v1476_v18 = vand.u32 2147483647, %v3803_v35  ;;  %v1701_v14 = vsub.f32 0.0, %v1477_v63  ;;  %v1699_v30 = vsub.f32 0.0, %v1475_v9 }
 0x3ec   :  { %v1509_v10 = vadd.f32 1.0, %v1493_v41  ;;  %v1494_v42 = vmul.f32 0.3275911, %v1478_v44  ;;  %v1826_v51 = vsel %vm1794_vm6, %v1778_v52, %v1810_v59  ;;  %v3810_v26 = vmul.f32 %v1841_v48, %v1441_v47 }
 0x3ed   :  { %v1507_v58 = vadd.f32 1.0, %v1491_v57  ;;  %v1842_v5 = vadd.f32 1.0, %v1826_v51  ;;  %v1492_v38 = vmul.f32 0.3275911, %v1476_v18  ;;  %v1664_v41 = vadd.f32 0.2548296, %v1648_v13 }
 0x3ee   :  { %2330 = vrcp.f32 %v1509_v10  ;;  %v1510_v27 = vadd.f32 1.0, %v1494_v42  ;;  %v1807_v0 = vsub.f32 0.0, %v1775_v37  ;;  %v1717_v40 = vmul.f32 %v1701_v14, %v1477_v63 }
 0x3ef   :  { %2332 = vrcp.f32 %v1507_v58  ;;  %v3812_v54 = vmul.f32 %v1842_v5, %v1442_v43  ;;  %v1508_v33 = vadd.f32 1.0, %v1492_v38  ;;  %v1680_v57 = vmul.f32 %v3769_v62, %v1664_v41 }
 0x3f0   :  { %2334 = vrcp.f32 %v1510_v27  ;;  %v1702_v58 = vsub.f32 0.0, %v1478_v44  ;;  %v1715_v22 = vmul.f32 %v1699_v30, %v1475_v9  ;;  %v1823_v36 = vsel %vm1791_vm7, %v1775_v37, %v1807_v0 }
 0x3f1   :  { %v1870_v7 = vpack.c.bf16 %v3812_v54, %v3810_v26  ;;  %2336 = vrcp.f32 %v1508_v33  ;;  %v1760_v52 = vmul.f32 %v2329_v28, %v1680_v57  ;;  %v1439_v62 = vmul.f32 0.5, %v3732_v60 }
 0x3f2   :  { %v1743_v2 = vmul.f32 1.442695, %v1717_v40  ;;  %v1718_v51 = vmul.f32 %v1702_v58, %v1478_v44  ;;  %v1739_v63 = vmul.f32 1.442695, %v1715_v22  ;;  %v1700_v14 = vsub.f32 0.0, %v1476_v18 }
 0x3f3   :  { %v1776_v59 = vsub.f32 1.0, %v1760_v52  ;;  %v1839_v38 = vadd.f32 1.0, %v1823_v36  ;;  %vm1797_vm9 = vcmp.ge.f32.partialorder %v3782_v24, 0.0  ;;  %v1445_v24 = vmul.f32 0.5, %v3774_v3 }
 0x3f4   :  { %2338 = vpow2.f32 %v1743_v2  ;;  %v1745_v60 = vmul.f32 1.442695, %v1718_v51  ;;  %v1716_v0 = vmul.f32 %v1700_v14, %v1476_v18  ;;  %vm1798_vm10 = vcmp.ge.f32.partialorder %v3793_v8, 0.0 }
 0x3f5   :  { %v1808_v13 = vsub.f32 0.0, %v1776_v59  ;;  %2340 = vpow2.f32 %v1739_v63  ;;  %v1855_v40 = vmul.f32 %v1839_v38, %v1439_v62  ;;  %vm1795_vm11 = vcmp.ge.f32.partialorder %v3788_v61, 0.0 }
 0x3f6   :  { %2342 = vpow2.f32 %v1745_v60  ;;  %v1741_v2 = vmul.f32 1.442695, %v1716_v0  ;;  %vm1796_vm12 = vcmp.ge.f32.partialorder %v3803_v35, 0.0 }
 0x3f7   :  { %v1824_v37 = vsel %vm1792_vm8, %v1776_v59, %v1808_v13 }
 0x3f8   :  { %v2331_v10 = vpop.eup %2330  ;;  %v1840_v41 = vadd.f32 1.0, %v1824_v37  ;;  %2344 = vpow2.f32 %v1741_v2 }
 0x3f9   :  { %v2333_v42 = vpop.eup %2332  ;;  %v1557_v21 = vmul.f32 1.0614054, %v2331_v10 }
 0x3fa   :  { %v1555_v55 = vmul.f32 1.0614054, %v2333_v42  ;;  %v2335_v48 = vpop.eup %2334  ;;  %v1856_v6 = vmul.f32 %v1840_v41, %v1440_v20 }
 0x3fb   :  { %v1573_v27 = vadd.f32 -1.4531521, %v1557_v21  ;;  %v1558_v5 = vmul.f32 1.0614054, %v2335_v48  ;;  %v2337_v28 = vpop.eup %2336 }
 0x3fc   :  { %v1571_v47 = vadd.f32 -1.4531521, %v1555_v55  ;;  %v1556_v22 = vmul.f32 1.0614054, %v2337_v28  ;;  %v1869_v11 = vpack.c.bf16 %v1856_v6, %v1855_v40 }
 0x3fd   :  { %v1589_v43 = vmul.f32 %v2331_v10, %v1573_v27  ;;  %v1574_v54 = vadd.f32 -1.4531521, %v1558_v5 }
 0x3fe   :  { %v1587_v9 = vmul.f32 %v2333_v42, %v1571_v47  ;;  %v1572_v59 = vadd.f32 -1.4531521, %v1556_v22  ;;  %2193 = vmatprep.mubr.bf16.mxu1 %v1869_v11  ;;  %v2339_v13 = vpop.eup %2338 }
 0x3ff   :  { %v1605_v26 = vadd.f32 1.4214138, %v1589_v43  ;;  %v1590_v44 = vmul.f32 %v2335_v48, %v1574_v54  ;;  %2194 = vmatmul.mubr.bf16.vlgmr.msra.gmra.mrb[0].mxu1 %v1870_v7  ;;  %v2341_v14 = vpop.eup %2340 }
 0x400   :  { %v1603_v30 = vadd.f32 1.4214138, %v1587_v9  ;;  %v1588_v43 = vmul.f32 %v2337_v28, %v1572_v59 }
 0x401   :  { %v1621_v33 = vmul.f32 %v2331_v10, %v1605_v26  ;;  %v1606_v21 = vadd.f32 1.4214138, %v1590_v44 }
 0x402   :  { %v1619_v57 = vmul.f32 %v2333_v42, %v1603_v30  ;;  %v1604_v5 = vadd.f32 1.4214138, %v1588_v43 }
 0x403   :  { %v1637_v58 = vadd.f32 -0.28449672, %v1621_v33  ;;  %v1622_v27 = vmul.f32 %v2335_v48, %v1606_v21 }
 0x404   :  { %v1635_v52 = vadd.f32 -0.28449672, %v1619_v57  ;;  %v1620_v26 = vmul.f32 %v2337_v28, %v1604_v5  ;;  %v2343_v57 = vpop.eup %2342 }
 0x405   :  { %v1653_v55 = vmul.f32 %v2331_v10, %v1637_v58  ;;  %v1638_v51 = vadd.f32 -0.28449672, %v1622_v27  ;;  %v2345_v43 = vpop.eup %2344 }
 0x406   :  { %v1651_v36 = vmul.f32 %v2333_v42, %v1635_v52  ;;  %v1636_v7 = vadd.f32 -0.28449672, %v1620_v26 }
 0x407   :  { %v1669_v47 = vadd.f32 0.2548296, %v1653_v55  ;;  %v1654_v62 = vmul.f32 %v2335_v48, %v1638_v51 }
 0x408   :  { %v1667_v63 = vadd.f32 0.2548296, %v1651_v36  ;;  %v1652_v21 = vmul.f32 %v2337_v28, %v1636_v7 }
 0x409   :  { %v1685_v18 = vmul.f32 %v2331_v10, %v1669_v47  ;;  %v1670_v20 = vadd.f32 0.2548296, %v1654_v62 }
 0x40a   :  { %v1683_v9 = vmul.f32 %v2333_v42, %v1667_v63  ;;  %v1668_v55 = vadd.f32 0.2548296, %v1652_v21 }
 0x40b   :  { %v1765_v38 = vmul.f32 %v2339_v13, %v1685_v18  ;;  %v2171_v54 = vpop.f32.mrb[12].mxu0  ;;  %v1686_v33 = vmul.f32 %v2335_v48, %v1670_v20 }
 0x40c   :  { %v1763_v37 = vmul.f32 %v2341_v14, %v1683_v9  ;;  %v3822_v30 = vadd.f32 %v2171_v54, %v3647_v32  ;;  %v1420_v60 = vpop.f32.mrb[13].mxu0  ;;  %v1684_v2 = vmul.f32 %v2337_v28, %v1668_v55  ;;  %v1446_v28 = vmul.f32 0.5, %v3785_v1 }
 0x40d   :  { %v1781_v41 = vsub.f32 1.0, %v1765_v38  ;;  %v3825_v10 = vadd.f32 %v3647_v32, %v1420_v60  ;;  %v2172_v44 = vpop.f32.mrb[14].mxu0  ;;  %v1766_v58 = vmul.f32 %v2343_v57, %v1686_v33  ;;  %v1443_v33 = vmul.f32 0.5, %v3778_v39 }
 0x40e   :  { %v1779_v42 = vsub.f32 1.0, %v1763_v37  ;;  %v3828_v0 = vmul.f32 0.70710677, %v3822_v30  ;;  %v1423_v40 = vpop.f32.mrb[15].mxu0  ;;  %v3837_v51 = vadd.f32 %v2172_v44, %v3647_v32  ;;  %v1764_v5 = vmul.f32 %v2345_v43, %v1684_v2 }
 0x40f   :  { %v1813_v6 = vsub.f32 0.0, %v1781_v41  ;;  %v3833_v48 = vmul.f32 0.70710677, %v3825_v10  ;;  %v1782_v11 = vsub.f32 1.0, %v1766_v58  ;;  %v3847_v3 = vadd.f32 %v3647_v32, %v1423_v40 }
 0x410   :  { %v1481_v22 = vand.u32 2147483647, %v3828_v0  ;;  %v1811_v27 = vsub.f32 0.0, %v1779_v42  ;;  %v1780_v38 = vsub.f32 1.0, %v1764_v5  ;;  %v3844_v26 = vmul.f32 0.70710677, %v3837_v51 }
 0x411   :  { %v1829_v52 = vsel %vm1797_vm9, %v1781_v41, %v1813_v6  ;;  %v1814_v36 = vsub.f32 0.0, %v1782_v11  ;;  %v1479_v47 = vand.u32 2147483647, %v3833_v48  ;;  %v3852_v1 = vmul.f32 0.70710677, %v3847_v3 }
 0x412   :  { %v1497_v59 = vmul.f32 0.3275911, %v1481_v22  ;;  %v1845_v63 = vadd.f32 1.0, %v1829_v52  ;;  %v1827_v9 = vsel %vm1795_vm11, %v1779_v42, %v1811_v27  ;;  %v1812_v37 = vsub.f32 0.0, %v1780_v38 }
 0x413   :  { %v1830_v62 = vsel %vm1798_vm10, %v1782_v11, %v1814_v36  ;;  %v1495_v13 = vmul.f32 0.3275911, %v1479_v47  ;;  %v1482_v61 = vand.u32 2147483647, %v3844_v26  ;;  %v1843_v60 = vadd.f32 1.0, %v1827_v9 }
 0x414   :  { %v1513_v18 = vadd.f32 1.0, %v1497_v59  ;;  %v1846_v14 = vadd.f32 1.0, %v1830_v62  ;;  %v1861_v8 = vmul.f32 %v1845_v63, %v1445_v24  ;;  %v1828_v7 = vsel %vm1796_vm12, %v1780_v38, %v1812_v37 }
 0x415   :  { %v1511_v20 = vadd.f32 1.0, %v1495_v13  ;;  %v1498_v44 = vmul.f32 0.3275911, %v1482_v61  ;;  %v1444_v32 = vmul.f32 0.5, %v3798_v29  ;;  %v1844_v57 = vadd.f32 1.0, %v1828_v7 }
 0x416   :  { %2346 = vrcp.f32 %v1513_v18  ;;  %v1862_v54 = vmul.f32 %v1846_v14, %v1446_v28  ;;  %v1705_v42 = vsub.f32 0.0, %v1481_v22  ;;  %v1480_v40 = vand.u32 2147483647, %v3852_v1 }
 0x417   :  { %2348 = vrcp.f32 %v1511_v20  ;;  %v1514_v6 = vadd.f32 1.0, %v1498_v44  ;;  %v1859_v58 = vmul.f32 %v1843_v60, %v1443_v33  ;;  %v1860_v21 = vmul.f32 %v1844_v57, %v1444_v32 }
 0x418   :  { %v1872_v41 = vpack.c.bf16 %v1862_v54, %v1861_v8  ;;  %v1496_v52 = vmul.f32 0.3275911, %v1480_v40  ;;  %v1703_v11 = vsub.f32 0.0, %v1479_v47  ;;  %v1721_v55 = vmul.f32 %v1705_v42, %v1481_v22 }
 0x419   :  { %2350 = vrcp.f32 %v1514_v6  ;;  %v1871_v59 = vpack.c.bf16 %v1860_v21, %v1859_v58  ;;  %v1706_v18 = vsub.f32 0.0, %v1482_v61  ;;  %v1704_v28 = vsub.f32 0.0, %v1480_v40 }
 0x41a   :  { %v1512_v27 = vadd.f32 1.0, %v1496_v52  ;;  %v1719_v29 = vmul.f32 %v1703_v11, %v1479_v47  ;;  %v1751_v43 = vmul.f32 1.442695, %v1721_v55  ;;  %vm1801_vm13 = vcmp.ge.f32.partialorder %v3828_v0, 0.0 }
 0x41b   :  { %2197 = vmatprep.mubr.bf16.mxu1 %v1871_v59  ;;  %v1722_v38 = vmul.f32 %v1706_v18, %v1482_v61  ;;  %vm1799_vm14 = vcmp.ge.f32.partialorder %v3833_v48, 0.0  ;;  %vm1802_vm15 = vcmp.ge.f32.partialorder %v3844_v26, 0.0  ;;  %vm1800_vm1 = vcmp.ge.f32.partialorder %v3852_v1, 0.0 }
 0x41c   :  { %2352 = vrcp.f32 %v1512_v27  ;;  %2198 = vmatmul.mubr.bf16.gmra.mrb[4].mxu1 %v1872_v41  ;;  %v1747_v13 = vmul.f32 1.442695, %v1719_v29  ;;  %v1720_v41 = vmul.f32 %v1704_v28, %v1480_v40  ;;  %v1447_v48 = vmul.f32 0.5, %v3825_v10 }
 0x41d   :  { %2354 = vpow2.f32 %v1751_v43  ;;  %v1753_v7 = vmul.f32 1.442695, %v1722_v38 }
 0x41e   :  { %2356 = vpow2.f32 %v1747_v13  ;;  %v1749_v52 = vmul.f32 1.442695, %v1720_v41 }
 0x41f   :  { %2358 = vpow2.f32 %v1753_v7 }
 0x420   :  { %v2347_v35 = vpop.eup %2346  ;;  %2360 = vpow2.f32 %v1749_v52 }
 0x421   :  { %v1561_v36 = vmul.f32 1.0614054, %v2347_v35  ;;  %v2349_v39 = vpop.eup %2348 }
 0x422   :  { %v1559_v24 = vmul.f32 1.0614054, %v2349_v39 }
 0x423   :  { %v1577_v2 = vadd.f32 -1.4531521, %v1561_v36  ;;  %v2351_v22 = vpop.eup %2350 }
 0x424   :  { %v1575_v62 = vadd.f32 -1.4531521, %v1559_v24  ;;  %v1562_v8 = vmul.f32 1.0614054, %v2351_v22 }
 0x425   :  { %v1593_v63 = vmul.f32 %v2347_v35, %v1577_v2 }
 0x426   :  { %v1591_v9 = vmul.f32 %v2349_v39, %v1575_v62  ;;  %v2353_v37 = vpop.eup %2352  ;;  %v1578_v60 = vadd.f32 -1.4531521, %v1562_v8 }
 0x427   :  { %v1609_v5 = vadd.f32 1.4214138, %v1593_v63  ;;  %v1560_v44 = vmul.f32 1.0614054, %v2353_v37  ;;  %v2355_v55 = vpop.eup %2354 }
 0x428   :  { %v1607_v20 = vadd.f32 1.4214138, %v1591_v9  ;;  %v1594_v57 = vmul.f32 %v2351_v22, %v1578_v60  ;;  %v2357_v43 = vpop.eup %2356 }
 0x429   :  { %v1625_v14 = vmul.f32 %v2347_v35, %v1609_v5  ;;  %v1576_v6 = vadd.f32 -1.4531521, %v1560_v44  ;;  %v2359_v38 = vpop.eup %2358 }
 0x42a   :  { %v1623_v47 = vmul.f32 %v2349_v39, %v1607_v20  ;;  %v1610_v21 = vadd.f32 1.4214138, %v1594_v57 }
 0x42b   :  { %v1641_v54 = vadd.f32 -0.28449672, %v1625_v14  ;;  %v1592_v61 = vmul.f32 %v2353_v37, %v1576_v6  ;;  %v1450_v6 = vmul.f32 0.5, %v3837_v51  ;;  %v3967_v51 = vld [vmem:[#allocation8_spill] sm:$0xff] }
 0x42c   :  { %v1639_v32 = vadd.f32 -0.28449672, %v1623_v47  ;;  %v1626_v59 = vmul.f32 %v2351_v22, %v1610_v21  ;;  %v2361_v47 = vpop.eup %2360 }
 0x42d   :  { %v1657_v33 = vmul.f32 %v2347_v35, %v1641_v54  ;;  %v1608_v2 = vadd.f32 1.4214138, %v1592_v61  ;;  %v1448_v61 = vmul.f32 0.5, %v3847_v3 }
 0x42e   :  { %v1655_v58 = vmul.f32 %v2349_v39, %v1639_v32  ;;  %v1642_v40 = vadd.f32 -0.28449672, %v1626_v59 }
 0x42f   :  { %v1673_v42 = vadd.f32 0.2548296, %v1657_v33  ;;  %v1624_v24 = vmul.f32 %v2353_v37, %v1608_v2  ;;  %v3968_v2 = vld [vmem:[#allocation7_spill] sm:$0xff] }
 0x430   :  { %v1671_v27 = vadd.f32 0.2548296, %v1655_v58  ;;  %v1658_v62 = vmul.f32 %v2351_v22, %v1642_v40 }
 0x431   :  { %v1689_v11 = vmul.f32 %v2347_v35, %v1673_v42  ;;  %v1640_v5 = vadd.f32 -0.28449672, %v1624_v24  ;;  %v1449_v42 = vmul.f32 0.5, %v3822_v30  ;;  %v2377_v30 = vld [vmem:[%s3951_s1 + $0x10] sm:$0xff]  ;;  %s2402_s1 = smov [#allocation2]  }
 0x432   :  { %v1687_v29 = vmul.f32 %v2349_v39, %v1671_v27  ;;  %v1674_v13 = vadd.f32 0.2548296, %v1658_v62  ;;  %v3869_v1 = vrot.slane %v2377_v30, %v3967_v51  ;;  %s2097_s2 = sshll.u32 %s2402_s1, 4  ;;  %s2098_s2 = int_to_ptr.vmem [resolvable:$true] %s2097_s2 }
 0x433   :  { %v1769_v36 = vmul.f32 %v2355_v55, %v1689_v11  ;;  %v1656_v28 = vmul.f32 %v2353_v37, %v1640_v5  ;;  %s2378_s19 = scalar_lea.vmem %s2098_s2, 2048  ;;  %p2383_p1 = scmp.lt.s32.totalorder %s2098_s2, %s2098_s2 }
 0x434   :  { %v1767_v18 = vmul.f32 %v2357_v43, %v1687_v29  ;;  %v1690_v14 = vmul.f32 %v2351_v22, %v1674_v13  ;;  %v3872_v29 = vrot.slane %v2377_v30, %v3968_v2  ;;  %p2379_p0 = scmp.ne.s32.totalorder %s2098_s2, %s2378_s19  ;;  %p2384_p2 = scmp.lt.s32.totalorder %s2378_s19, %s2378_s19 }
 0x435   :  { %v1785_v63 = vsub.f32 1.0, %v1769_v36  ;;  %v1672_v20 = vadd.f32 0.2548296, %v1656_v28 }
 0x436   :  { %v1783_v9 = vsub.f32 1.0, %v1767_v18  ;;  %v1770_v8 = vmul.f32 %v2359_v38, %v1690_v14  ;;  %p2385_p3 = por %p2384_p2, %p2383_p1 }
 0x437   :  { %v1817_v35 = vsub.f32 0.0, %v1785_v63  ;;  %v1688_v39 = vmul.f32 %v2353_v37, %v1672_v20 }
 0x438   :  { %v1815_v54 = vsub.f32 0.0, %v1783_v9  ;;  %v1786_v41 = vsub.f32 1.0, %v1770_v8  ;;  %p2386_p4 = pnand %p2385_p3, %p2379_p0 }
 0x439   :  { %v1833_v60 = vsel %vm1801_vm13, %v1785_v63, %v1817_v35  ;;  %v1768_v33 = vmul.f32 %v2361_v47, %v1688_v39 }
 0x43a   :  { %v1818_v7 = vsub.f32 0.0, %v1786_v41  ;;  %v1849_v44 = vadd.f32 1.0, %v1833_v60  ;;  %v1831_v32 = vsel %vm1799_vm14, %v1783_v9, %v1815_v54 }
 0x43b   :  { %v1784_v57 = vsub.f32 1.0, %v1768_v33  ;;  %v1847_v37 = vadd.f32 1.0, %v1831_v32 }
 0x43c   :  { %v1834_v22 = vsel %vm1802_vm15, %v1786_v41, %v1818_v7  ;;  %v1865_v21 = vmul.f32 %v1849_v44, %v1449_v42 }
 0x43d   :  { %v1850_v0 = vadd.f32 1.0, %v1834_v22  ;;  %v1816_v58 = vsub.f32 0.0, %v1784_v57  ;;  %v1863_v27 = vmul.f32 %v1847_v37, %v1447_v48 }
 0x43f   :  { %v1866_v52 = vmul.f32 %v1850_v0, %v1450_v6  ;;  %v1832_v11 = vsel %vm1800_vm1, %v1784_v57, %v1816_v58 }
 0x440   :  { %v1848_v55 = vadd.f32 1.0, %v1832_v11 }
 0x441   :  { %v1874_v26 = vpack.c.bf16 %v1866_v52, %v1865_v21 }
 0x442   :  { %v1864_v59 = vmul.f32 %v1848_v55, %v1448_v61 }
 0x444   :  { %v1873_v36 = vpack.c.bf16 %v1864_v59, %v1863_v27 }
 0x446   :  { %2201 = vmatprep.mubr.bf16.mxu1 %v1873_v36 }
 0x447   :  { %2202 = vmatmul.mubr.bf16.gmra.mrb[8].mxu1 %v1874_v26 }
 0x49f   :  { %v2191_v10 = vpop.f32.mrb[16].mxu0 }
 0x4a0   :  { %v1986_v3 = vadd.f32 %v2191_v10, %v3869_v1  ;;  %v1977_v40 = vpop.f32.mrb[17].mxu0 }
 0x4a1   :  { %v1978_v43 = vadd.f32 %v1977_v40, %v3869_v1  ;;  %v2192_v24 = vpop.f32.mrb[18].mxu0 }
 0x4a2   :  { %v2046_v63 = vmul.f32 %v3872_v29, %v1986_v3  ;;  %v1989_v18 = vadd.f32 %v2192_v24, %v3869_v1  ;;  %v1980_v62 = vpop.f32.mrb[19].mxu0 }
 0x4a3   :  { %v2044_v5 = vmul.f32 %v3872_v29, %v1978_v43  ;;  %v1981_v13 = vadd.f32 %v1980_v62, %v3869_v1 }
 0x4a4   :  { %v2062_v9 = vadd.f32 %v2046_v63, %v3013_v50  ;;  %v2047_v28 = vmul.f32 %v3872_v29, %v1989_v18 }
 0x4a5   :  { %v2060_v35 = vadd.f32 %v2044_v5, %v2923_v17  ;;  %v2045_v14 = vmul.f32 %v3872_v29, %v1981_v13 }
 0x4a6   :  { %2078 = vst.msk [vmem:[#allocation2 + $0x10] sm:$0xff] %vm44_vm0, %v2062_v9  ;;  %v2063_v38 = vadd.f32 %v2047_v28, %v3052_v31 }
 0x4a7   :  { %2076 = vst.msk [vmem:[#allocation2] sm:$0xff] %vm44_vm0, %v2060_v35  ;;  %v2061_v20 = vadd.f32 %v2045_v14, %v2977_v49 }
 0x4a8   :  { %2079 = vst.msk [vmem:[#allocation2 + $0x18] sm:$0xff] %vm44_vm0, %v2063_v38 }
 0x4a9   :  { %2077 = vst.msk [vmem:[#allocation2 + $0x8] sm:$0xff] %vm44_vm0, %v2061_v20 }
 0x4d2   :  { %v2195_v8 = vpop.f32.mrb[0].mxu1 }
 0x4d3   :  { %v2002_v50 = vadd.f32 %v2195_v8, %v3869_v1  ;;  %v1993_v54 = vpop.f32.mrb[1].mxu1 }
 0x4d4   :  { %v1994_v17 = vadd.f32 %v1993_v54, %v3869_v1  ;;  %v2196_v39 = vpop.f32.mrb[2].mxu1 }
 0x4d5   :  { %v2050_v47 = vmul.f32 %v3872_v29, %v2002_v50  ;;  %v2005_v60 = vadd.f32 %v2196_v39, %v3869_v1  ;;  %v1996_v31 = vpop.f32.mrb[3].mxu1 }
 0x4d6   :  { %v2048_v41 = vmul.f32 %v3872_v29, %v1994_v17  ;;  %v1997_v49 = vadd.f32 %v1996_v31, %v3869_v1 }
 0x4d7   :  { %v2066_v33 = vadd.f32 %v2050_v47, %v3169_v16  ;;  %v2051_v7 = vmul.f32 %v3872_v29, %v2005_v60 }
 0x4d8   :  { %v2064_v44 = vadd.f32 %v2048_v41, %v3091_v34  ;;  %v2049_v32 = vmul.f32 %v3872_v29, %v1997_v49 }
 0x4d9   :  { %2082 = vst.msk [vmem:[#allocation2 + $0x30] sm:$0xff] %vm44_vm0, %v2066_v33  ;;  %v2067_v57 = vadd.f32 %v2051_v7, %v3208_v25 }
 0x4da   :  { %2080 = vst.msk [vmem:[#allocation2 + $0x20] sm:$0xff] %vm44_vm0, %v2064_v44  ;;  %v2065_v22 = vadd.f32 %v2049_v32, %v3130_v45 }
 0x4db   :  { %2083 = vst.msk [vmem:[#allocation2 + $0x38] sm:$0xff] %vm44_vm0, %v2067_v57 }
 0x4dc   :  { %2081 = vst.msk [vmem:[#allocation2 + $0x28] sm:$0xff] %vm44_vm0, %v2065_v22 }
 0x4ef   :  { %v2199_v42 = vpop.f32.mrb[4].mxu1 }
 0x4f0   :  { %v2018_v16 = vadd.f32 %v2199_v42, %v3869_v1  ;;  %v2009_v6 = vpop.f32.mrb[5].mxu1 }
 0x4f1   :  { %v2010_v34 = vadd.f32 %v2009_v6, %v3869_v1  ;;  %v2200_v0 = vpop.f32.mrb[6].mxu1 }
 0x4f2   :  { %v2054_v58 = vmul.f32 %v3872_v29, %v2018_v16  ;;  %v2021_v37 = vadd.f32 %v2200_v0, %v3869_v1  ;;  %v2012_v25 = vpop.f32.mrb[7].mxu1 }
 0x4f3   :  { %v2052_v21 = vmul.f32 %v3872_v29, %v2010_v34  ;;  %v2013_v45 = vadd.f32 %v2012_v25, %v3869_v1 }
 0x4f4   :  { %v2070_v52 = vadd.f32 %v2054_v58, %v3325_v19  ;;  %v2055_v11 = vmul.f32 %v3872_v29, %v2021_v37 }
 0x4f5   :  { %v2068_v48 = vadd.f32 %v2052_v21, %v3247_v12  ;;  %v2053_v61 = vmul.f32 %v3872_v29, %v2013_v45 }
 0x4f6   :  { %2086 = vst.msk [vmem:[#allocation2 + $0x50] sm:$0xff] %vm44_vm0, %v2070_v52  ;;  %v2071_v55 = vadd.f32 %v2055_v11, %v3362_v15 }
 0x4f7   :  { %2084 = vst.msk [vmem:[#allocation2 + $0x40] sm:$0xff] %vm44_vm0, %v2068_v48  ;;  %v2069_v26 = vadd.f32 %v2053_v61, %v3286_v4 }
 0x4f8   :  { %2087 = vst.msk [vmem:[#allocation2 + $0x58] sm:$0xff] %vm44_vm0, %v2071_v55 }
 0x4f9   :  { %2085 = vst.msk [vmem:[#allocation2 + $0x48] sm:$0xff] %vm44_vm0, %v2069_v26 }
 0x51a   :  { %v2203_v27 = vpop.f32.mrb[8].mxu1 }
 0x51b   :  { %v2034_v19 = vadd.f32 %v2203_v27, %v3869_v1  ;;  %v2025_v59 = vpop.f32.mrb[9].mxu1 }
 0x51c   :  { %v2026_v12 = vadd.f32 %v2025_v59, %v3869_v1  ;;  %v2204_v36 = vpop.f32.mrb[10].mxu1 }
 0x51d   :  { %v2058_v30 = vmul.f32 %v3872_v29, %v2034_v19  ;;  %v2037_v51 = vadd.f32 %v2204_v36, %v3869_v1  ;;  %v2028_v15 = vpop.f32.mrb[11].mxu1 }
 0x51e   :  { %v2056_v2 = vmul.f32 %v3872_v29, %v2026_v12  ;;  %v2029_v4 = vadd.f32 %v2028_v15, %v3869_v1 }
 0x51f   :  { %v2074_v10 = vadd.f32 %v2058_v30, %v3463_v46  ;;  %v2059_v3 = vmul.f32 %v3872_v29, %v2037_v51 }
 0x520   :  { %v2072_v40 = vadd.f32 %v2056_v2, %v3401_v23  ;;  %v2057_v43 = vmul.f32 %v3872_v29, %v2029_v4 }
 0x521   :  { %2090 = vst.msk [vmem:[#allocation2 + $0x70] sm:$0xff] %vm44_vm0, %v2074_v10  ;;  %v2075_v24 = vadd.f32 %v2059_v3, %v3479_v53 }
 0x522   :  { %2088 = vst.msk [vmem:[#allocation2 + $0x60] sm:$0xff] %vm44_vm0, %v2072_v40  ;;  %v2073_v63 = vadd.f32 %v2057_v43, %v3439_v56 }
 0x523   :  { %2091 = vst.msk [vmem:[#allocation2 + $0x78] sm:$0xff] %vm44_vm0, %v2075_v24 }
 0x524   :  { %2089 = vst.msk [vmem:[#allocation2 + $0x68] sm:$0xff] %vm44_vm0, %v2073_v63 }
 0x525   :  { %2389 = shalt.err (!%p2386_p4)
}
 0x526   :  { %s2390_s21 = scalar_lea.hbm %s3956_s6, 2048 }
 0x527   :  { %p2391_p5 = scmp.ne.s32.totalorder %s3956_s6, %s2390_s21  ;;  %p2394_p6 = scmp.lt.u32.totalorder %s2390_s21, %s3956_s6 }
 0x529   :  { %p2396_p7 = pnand %p2394_p6, %p2391_p5 }
 0x52b   :  { %2399 = shalt.err (!%p2396_p7)
}
 0x52c   :  { %s2403_s4 = smov 128   ;;  %s2404_s26 = smov 8  }
 0x52d   :  { %2103 = dma.vmem_to_hbm [thread:$0]  %s2098_s2, 2048, %s3956_s6, [#allocation3], %s2403_s4, %s2403_s4, %s2404_s26  }
 0x52e   :  { %2400 = dma.done.wait [#allocation3], 2048  }
 0x52f   :  { %2401 = vsyncadd [#allocation3], 4294965248 }
 0x530   :  { %2107 = vsyncpa [#allocation3], 1 }

</bundles_post_ra>
